<compile_context>
chip_gen: v5e
topology: v5e:2x2
jax: 0.10.0
libtpu: 0.0.40
codegen_flags: <defaults>
</compile_context>

<pallas_src>
import functools

import jax
import jax.numpy as jnp
from jax.experimental import pallas as pl
from jax.experimental.pallas import tpu as pltpu

_NEG = -1e30  # masked-out sentinel for the per-graph max


def _round_up(x, m):
    return (x + m - 1) // m * m


# ----------------------------- GraphConv + ReLU (tiled, fused weight matmul) -----------------------------
def _graphconv_relu_kernel(a_ref, xnb_ref, xroot_ref, w_ref, b_ref, o_ref, acc_ref):
    k = pl.program_id(1)

    @pl.when(k == 0)
    def _():
        acc_ref[...] = jnp.zeros_like(acc_ref)

    # neighbor aggregation: bf16 x bf16 MXU matmul, f32 accumulation
    acc_ref[...] += jnp.dot(a_ref[...], xnb_ref[...], preferred_element_type=jnp.float32)

    @pl.when(k == pl.num_programs(1) - 1)
    def _():
        # single fused MXU pass: [agg | x_root] @ [W_rel ; W_root]
        feats = jnp.concatenate([acc_ref[...], xroot_ref[...]], axis=1)      # [tm, 2*Cin_pad] f32
        out = jnp.dot(feats, w_ref[...], preferred_element_type=jnp.float32) + b_ref[...]
        o_ref[...] = jnp.maximum(out, 0.0)                                   # fused ReLU


def graph_conv_relu(a_bf16, x_f32, w_stack, bias_row, *, tile):
    """a_bf16: [Np, Np] bf16; x_f32: [Np, Cin_pad] f32 (lane-dense, zero-padded cols);
    w_stack: [2*Cin_pad, Cout_pad] f32 (= [W_rel_pad ; W_root_pad]); bias_row: [1, Cout_pad]."""
    n_pad = a_bf16.shape[0]
    cin_pad = x_f32.shape[1]
    cout_pad = w_stack.shape[1]
    nt = n_pad // tile
    x_bf16 = x_f32.astype(jnp.bfloat16)  # bf16 stream feeding the A @ x MXU pass

    return pl.pallas_call(
        _graphconv_relu_kernel,
        out_shape=jax.ShapeDtypeStruct((n_pad, cout_pad), jnp.float32),
        grid_spec=pltpu.PrefetchScalarGridSpec(
            num_scalar_prefetch=0,
            grid=(nt, nt),
            in_specs=[
                pl.BlockSpec((tile, tile), lambda i, k: (i, k)),            # A tile (bf16)
                pl.BlockSpec((tile, cin_pad), lambda i, k: (k, 0)),         # x, neighbor rows (bf16)
                pl.BlockSpec((tile, cin_pad), lambda i, k: (i, 0)),         # x, root rows (f32)
                pl.BlockSpec((2 * cin_pad, cout_pad), lambda i, k: (0, 0)),  # stacked weights
                pl.BlockSpec((1, cout_pad), lambda i, k: (0, 0)),           # bias row
            ],
            out_specs=pl.BlockSpec((tile, cout_pad), lambda i, k: (i, 0)),
            scratch_shapes=[pltpu.VMEM((tile, cin_pad), jnp.float32)],
        ),
        compiler_params=pltpu.CompilerParams(
            dimension_semantics=("parallel", "arbitrary")),
    )(a_bf16, x_bf16, x_f32, w_stack, bias_row)


# ------------------- global_max_pool + Linear + log_softmax/softmax (fused, tiled over N) -------------------
def _pool_head_kernel(x_ref, bid_ref, w_ref, b_ref,
                      logp_ref, prob_ref, crit_ref,
                      maxv_sc, crit_sc,
                      *, num_graphs, num_classes, n_pad, tile):
    s = pl.program_id(0)

    @pl.when(s == 0)
    def _():
        maxv_sc[...] = jnp.full_like(maxv_sc, _NEG)
        crit_sc[...] = jnp.full_like(crit_sc, n_pad)

    x = x_ref[...]                                                    # [tile, C] f32
    bid = bid_ref[...]                                                # [tile, 1] int32 (graph id, -1 = padding)
    row_idx = jax.lax.broadcasted_iota(jnp.int32, x.shape, 0) + s * tile

    # running per-graph max + first-attaining node index (index carried alongside the max)
    for g in range(num_graphs):                                       # static, small B
        m = bid == g                                                  # [tile, 1]
        masked = jnp.where(m, x, _NEG)                                # [tile, C]
        tmax = jnp.max(masked, axis=0, keepdims=True)                 # [1, C]
        cand = jnp.where(masked == tmax, row_idx, n_pad)
        targ = jnp.min(cand, axis=0, keepdims=True)                   # [1, C]
        run_max = maxv_sc[g:g + 1, :]
        better = tmax > run_max                                       # strict >: earlier tile keeps ties
        crit_sc[g:g + 1, :] = jnp.where(better, targ, crit_sc[g:g + 1, :])
        maxv_sc[g:g + 1, :] = jnp.where(better, tmax, run_max)

    @pl.when(s == pl.num_programs(0) - 1)
    def _():
        pooled = maxv_sc[...]                                         # [B_pad, C]
        pooled = jnp.where(pooled <= _NEG * 0.5, 0.0, pooled)         # empty/pad graphs -> 0
        logits = jnp.dot(pooled, w_ref[...], preferred_element_type=jnp.float32) + b_ref[...]
        cls = jax.lax.broadcasted_iota(jnp.int32, logits.shape, 1)
        logits = jnp.where(cls < num_classes, logits, _NEG)           # mask padded class lanes
        m = jnp.max(logits, axis=1, keepdims=True)
        z = logits - m
        lse = jnp.log(jnp.sum(jnp.exp(z), axis=1, keepdims=True))
        logp = z - lse
        logp_ref[...] = logp                                          # F.log_softmax(out, dim=1)
        prob_ref[...] = jnp.exp(logp)                                 # softmax(log_softmax(out)) == softmax(out)
        crit_ref[...] = crit_sc[...]


def global_max_pool_head(x, batch2d, w_head, b_head, *, num_graphs, num_classes, tile):
    n_pad, c = x.shape
    ncp = w_head.shape[1]
    b_pad = max(8, _round_up(num_graphs, 8))
    nt = n_pad // tile
    kernel = functools.partial(_pool_head_kernel, num_graphs=num_graphs,
                               num_classes=num_classes, n_pad=n_pad, tile=tile)
    return pl.pallas_call(
        kernel,
        out_shape=(jax.ShapeDtypeStruct((b_pad, ncp), jnp.float32),
                   jax.ShapeDtypeStruct((b_pad, ncp), jnp.float32),
                   jax.ShapeDtypeStruct((b_pad, c), jnp.int32)),
        grid_spec=pltpu.PrefetchScalarGridSpec(
            num_scalar_prefetch=0,
            grid=(nt,),
            in_specs=[
                pl.BlockSpec((tile, c), lambda s: (s, 0)),            # node feature tile
                pl.BlockSpec((tile, 1), lambda s: (s, 0)),            # graph-id column
                pl.BlockSpec((c, ncp), lambda s: (0, 0)),             # head weight
                pl.BlockSpec((1, ncp), lambda s: (0, 0)),             # head bias
            ],
            out_specs=(
                pl.BlockSpec((b_pad, ncp), lambda s: (0, 0)),
                pl.BlockSpec((b_pad, ncp), lambda s: (0, 0)),
                pl.BlockSpec((b_pad, c), lambda s: (0, 0)),
            ),
            scratch_shapes=[pltpu.VMEM((b_pad, c), jnp.float32),
                            pltpu.VMEM((b_pad, c), jnp.int32)],
        ),
        compiler_params=pltpu.CompilerParams(dimension_semantics=("arbitrary",)),
    )(x, batch2d, w_head, b_head)


# ----------------------------- parameters (deterministic, nn.Linear-style init) -----------------------------
def init_params(num_classes, key):
    def lin(k, cin, cout, bias=True):
        kw, kb = jax.random.split(k)
        bound = 1.0 / float(cin) ** 0.5
        w = jax.random.uniform(kw, (cin, cout), jnp.float32, -bound, bound)
        if bias:
            b = jax.random.uniform(kb, (cout,), jnp.float32, -bound, bound)
            return w, b
        return w

    ks = jax.random.split(key, 7)
    p = {}
    p["c1_rel_w"], p["c1_rel_b"] = lin(ks[0], 6, 64)
    p["c1_root_w"] = lin(ks[1], 6, 64, bias=False)          # GraphConv lin_root has no bias
    p["c2_rel_w"], p["c2_rel_b"] = lin(ks[2], 70, 128)      # 64 + 6
    p["c2_root_w"] = lin(ks[3], 70, 128, bias=False)
    p["c3_rel_w"], p["c3_rel_b"] = lin(ks[4], 204, 256)     # 192 + 12
    p["c3_root_w"] = lin(ks[5], 204, 256, bias=False)
    p["lin1_w"], p["lin1_b"] = lin(ks[6], 256, num_classes)
    return p


def prepare_params(p):
    """Pad / remap weights to the lane-dense (multiple-of-128) padded feature layouts.

    Padded feature layouts fed to the kernels:
      conv1 in  [128]: 0:6  x_in | zeros
      conv2 in  [128]: 0:64 conv1_out | 64:70 x_in | 70:76 x_in (2nd copy, conv3 only) | zeros
      conv3 in  [256]: [conv2-in buffer (128)] ++ [conv2_out (128)]
    """
    def pad2(w, rpad, cpad):
        return jnp.zeros((rpad, cpad), jnp.float32).at[:w.shape[0], :w.shape[1]].set(w)

    def pad1(b, cpad):
        return jnp.zeros((1, cpad), jnp.float32).at[0, :b.shape[0]].set(b)

    def remap3(w):  # [204, 256] -> [256, 256] matching the padded conv3 input layout
        out = jnp.zeros((256, 256), jnp.float32)
        out = out.at[0:70, :].set(w[0:70, :])        # conv1_out(64) + x_in(6)
        out = out.at[70:76, :].set(w[198:204, :])    # second x_in copy
        out = out.at[128:256, :].set(w[70:198, :])   # conv2_out(128)
        return out

    pp = {}
    pp["W1"] = jnp.concatenate([pad2(p["c1_rel_w"], 128, 128),
                                pad2(p["c1_root_w"], 128, 128)], axis=0)       # [256, 128]
    pp["b1"] = pad1(p["c1_rel_b"], 128)
    pp["W2"] = jnp.concatenate([pad2(p["c2_rel_w"], 128, 128),
                                pad2(p["c2_root_w"], 128, 128)], axis=0)       # [256, 128]
    pp["b2"] = pad1(p["c2_rel_b"], 128)
    pp["W3"] = jnp.concatenate([remap3(p["c3_rel_w"]),
                                remap3(p["c3_root_w"])], axis=0)               # [512, 256]
    pp["b3"] = pad1(p["c3_rel_b"], 256)
    pp["Wh"] = pad2(p["lin1_w"], 256, 128)                                     # [256, 128]
    pp["bh"] = pad1(p["lin1_b"], 128)
    return pp


# ----------------------------- full forward -----------------------------
def gcn_forward(pp, norm, pos, edge_index, batch, *, num_graphs, num_classes):
    n = norm.shape[0]
    tile = min(512, _round_up(n, 128))     # tile kept modest: fits v7x's 64 MiB VMEM with headroom
    n_pad = _round_up(n, tile)

    x_in = jnp.concatenate([norm, pos], axis=1)                       # [N, 6]

    # Dense adjacency A[dst, src] with unit edge weights, streamed in bf16 (exact for
    # small integer multiplicities; halves HBM traffic and doubles MXU rate).
    # TODO(synk): for large sparse graphs, replace dense A with a CSR + scalar-prefetch
    # gather kernel instead of materializing N^2 entries.
    src, dst = edge_index[0], edge_index[1]
    a = (jnp.zeros((n_pad, n_pad), jnp.float32).at[dst, src].add(1.0)).astype(jnp.bfloat16)

    # F.dropout(..., training=False) is the identity in eval mode.
    x0 = jnp.zeros((n_pad, 128), jnp.float32).at[:n, :6].set(x_in)    # conv1 input, lane-dense
    h1 = graph_conv_relu(a, x0, pp["W1"], pp["b1"], tile=tile)        # [Np, 128] (cols 64: are 0)

    # conv2 / conv3 shared input buffer (see prepare_params layout comment)
    feat_a = h1.at[:n, 64:70].set(x_in).at[:n, 70:76].set(x_in)
    h2 = graph_conv_relu(a, feat_a, pp["W2"], pp["b2"], tile=tile)    # [Np, 128]

    feat_b = jnp.concatenate([feat_a, h2], axis=1)                    # [Np, 256]
    h3 = graph_conv_relu(a, feat_b, pp["W3"], pp["b3"], tile=tile)    # [Np, 256]

    batch2d = jnp.full((n_pad, 1), -1, jnp.int32).at[:n, 0].set(batch.astype(jnp.int32))
    logp_p, prob_p, crit_p = global_max_pool_head(
        h3, batch2d, pp["Wh"], pp["bh"],
        num_graphs=num_graphs, num_classes=num_classes, tile=tile)

    out = logp_p[:num_graphs, :num_classes]
    pred = prob_p[:num_graphs, :num_classes]
    critical_points = crit_p[:num_graphs, :]
    return out, pred, critical_points


# ----------------------------- pure-JAX reference (mirrors the bf16 A/x aggregation) -----------------------------
def reference_forward(params, norm, pos, edge_index, batch, num_graphs):
    n = norm.shape[0]
    x_in = jnp.concatenate([norm, pos], axis=1)
    src, dst = edge_index[0], edge_index[1]
    a = jnp.zeros((n, n), jnp.float32).at[dst, src].add(1.0)
    a = a.astype(jnp.bfloat16).astype(jnp.float32)

    def conv(x, wr, ws, b):
        agg = a @ x.astype(jnp.bfloat16).astype(jnp.float32)
        return jnp.maximum(agg @ wr + x @ ws + b, 0.0)

    x = conv(x_in, params["c1_rel_w"], params["c1_root_w"], params["c1_rel_b"])
    x = jnp.concatenate([x, x_in], axis=1)
    x1 = conv(x, params["c2_rel_w"], params["c2_root_w"], params["c2_rel_b"])
    x = jnp.concatenate([x, x1, x_in], axis=1)
    x = conv(x, params["c3_rel_w"], params["c3_root_w"], params["c3_rel_b"])

    onehot = batch[None, :] == jnp.arange(num_graphs, dtype=batch.dtype)[:, None]
    pooled = jnp.where(onehot[:, :, None], x[None, :, :], -jnp.inf).max(axis=1)
    logits = pooled @ params["lin1_w"] + params["lin1_b"]
    logp = jax.nn.log_softmax(logits, axis=1)
    return logp, jnp.exp(logp)


if __name__ == "__main__":
    key = jax.random.PRNGKey(0)
    k_norm, k_pos, k_params = jax.random.split(key, 3)

    num_graphs = 2
    nodes_per_graph = 16
    N = num_graphs * nodes_per_graph
    num_classes = 4

    norm = jax.random.normal(k_norm, (N, 3), jnp.float32)
    pos = jax.random.normal(k_pos, (N, 3), jnp.float32)
    batch = jnp.repeat(jnp.arange(num_graphs, dtype=jnp.int32), nodes_per_graph)

    # deterministic bidirectional ring edges within each graph
    srcs, dsts = [], []
    for g in range(num_graphs):
        base = g * nodes_per_graph
        for i in range(nodes_per_graph):
            a_node = base + i
            b_node = base + (i + 1) % nodes_per_graph
            srcs += [a_node, b_node]
            dsts += [b_node, a_node]
    edge_index = jnp.array([srcs, dsts], dtype=jnp.int32)             # [2, E]

    params = init_params(num_classes, k_params)
    pp = prepare_params(params)

    fwd = jax.jit(gcn_forward, static_argnames=("num_graphs", "num_classes"))
    out, pred, critical_points = fwd(pp, norm, pos, edge_index, batch,
                                     num_graphs=num_graphs, num_classes=num_classes)
    jax.block_until_ready((out, pred, critical_points))

    assert out.shape == (num_graphs, num_classes)
    assert pred.shape == (num_graphs, num_classes)
    assert critical_points.shape == (num_graphs, 256)

    ref_logp, ref_prob = reference_forward(params, norm, pos, edge_index, batch, num_graphs)
    assert bool(jnp.all(jnp.isfinite(out))) and bool(jnp.all(jnp.isfinite(pred)))
    assert bool(jnp.allclose(out, ref_logp, atol=5e-2, rtol=5e-2))
    assert bool(jnp.allclose(pred, ref_prob, atol=5e-2, rtol=5e-2))

    print("KERNEL_OK")
</pallas_src>

<mosaic_0001>
module attributes {stable_mosaic.version = 11 : i64} {
  func.func @_graphconv_relu_kernel(%arg0: i32, %arg1: i32, %arg2: memref<128x128xbf16, #tpu.memory_space<vmem>>, %arg3: memref<128x128xbf16, #tpu.memory_space<vmem>>, %arg4: memref<128x128xf32, #tpu.memory_space<vmem>>, %arg5: memref<256x128xf32, #tpu.memory_space<vmem>>, %arg6: memref<1x128xf32, #tpu.memory_space<vmem>>, %arg7: memref<128x128xf32, #tpu.memory_space<vmem>>, %arg8: memref<128x128xf32, #tpu.memory_space<vmem>>) attributes {dimension_semantics = [#tpu.dimension_semantics<parallel>, #tpu.dimension_semantics<arbitrary>], iteration_bounds = array<i64: 1, 1>, scalar_prefetch = 0 : i64, scratch_operands = 1 : i64, tpu.core_type = #tpu.core_type<tc>, window_params = [{transform_indices = @transform_0, window_bounds = array<i64: 128, 128>}, {transform_indices = @transform_1, window_bounds = array<i64: 128, 128>}, {transform_indices = @transform_2, window_bounds = array<i64: 128, 128>}, {pipeline_mode = #tpu.pipeline_mode<synchronous>, transform_indices = @transform_3, window_bounds = array<i64: 256, 128>}, {pipeline_mode = #tpu.pipeline_mode<synchronous>, transform_indices = @transform_4, window_bounds = array<i64: 1, 128>}, {transform_indices = @transform_5, window_bounds = array<i64: 128, 128>}]} {
    %c0_i32 = arith.constant 0 : i32
    %0 = arith.cmpi eq, %arg1, %c0_i32 : i32
    %1 = arith.extui %0 : i1 to i32
    %c0_i32_0 = arith.constant 0 : i32
    %2 = arith.cmpi ne, %1, %c0_i32_0 : i32
    scf.if %2 {
      %cst_10 = arith.constant 0.000000e+00 : f32
      %12 = vector.broadcast %cst_10 : f32 to vector<128x128xf32>
      %c0_11 = arith.constant 0 : index
      %c0_12 = arith.constant 0 : index
      %13 = vector.load %arg8[%c0_11, %c0_12] : memref<128x128xf32, #tpu.memory_space<vmem>>, vector<128x128xf32>
      tpu.vector_store %arg8[%c0_11, %c0_12], %12 {strides = array<i32>} : memref<128x128xf32, #tpu.memory_space<vmem>>, vector<128x128xf32>,
    } else {
    }
    %c0 = arith.constant 0 : index
    %c0_1 = arith.constant 0 : index
    %3 = vector.load %arg8[%c0, %c0_1] : memref<128x128xf32, #tpu.memory_space<vmem>>, vector<128x128xf32>
    %c0_2 = arith.constant 0 : index
    %c0_3 = arith.constant 0 : index
    %4 = vector.load %arg2[%c0_2, %c0_3] : memref<128x128xbf16, #tpu.memory_space<vmem>>, vector<128x128xbf16>
    %c0_4 = arith.constant 0 : index
    %c0_5 = arith.constant 0 : index
    %5 = vector.load %arg3[%c0_4, %c0_5] : memref<128x128xbf16, #tpu.memory_space<vmem>>, vector<128x128xbf16>
    %cst = arith.constant dense<0.000000e+00> : vector<128x128xf32>
    %6 = tpu.matmul %4, %5, %cst {dimension_numbers = #tpu.dot_dimension_numbers<[1], [0], [0], [1], [0, 0, 1, 1], [], []>} : vector<128x128xbf16>, vector<128x128xbf16>, vector<128x128xf32> -> vector<128x128xf32>
    %7 = arith.addf %3, %6 : vector<128x128xf32>
    %c0_6 = arith.constant 0 : index
    %c0_7 = arith.constant 0 : index
    %8 = vector.load %arg8[%c0_6, %c0_7] : memref<128x128xf32, #tpu.memory_space<vmem>>, vector<128x128xf32>
    tpu.vector_store %arg8[%c0_6, %c0_7], %7 {strides = array<i32>} : memref<128x128xf32, #tpu.memory_space<vmem>>, vector<128x128xf32>,
    %c0_i32_8 = arith.constant 0 : i32
    %9 = arith.cmpi eq, %arg1, %c0_i32_8 : i32
    %10 = arith.extui %9 : i1 to i32
    %c0_i32_9 = arith.constant 0 : i32
    %11 = arith.cmpi ne, %10, %c0_i32_9 : i32
    scf.if %11 {
      %c0_10 = arith.constant 0 : index
      %c0_11 = arith.constant 0 : index
      %12 = vector.load %arg8[%c0_10, %c0_11] : memref<128x128xf32, #tpu.memory_space<vmem>>, vector<128x128xf32>
      %c0_12 = arith.constant 0 : index
      %c0_13 = arith.constant 0 : index
      %13 = vector.load %arg4[%c0_12, %c0_13] : memref<128x128xf32, #tpu.memory_space<vmem>>, vector<128x128xf32>
      %14 = tpu.concatenate %12, %13 in 1 : vector<128x128xf32>, vector<128x128xf32> -> vector<128x256xf32>
      %c0_14 = arith.constant 0 : index
      %c0_15 = arith.constant 0 : index
      %15 = vector.load %arg5[%c0_14, %c0_15] : memref<256x128xf32, #tpu.memory_space<vmem>>, vector<256x128xf32>
      %cst_16 = arith.constant dense<0.000000e+00> : vector<128x128xf32>
      %16 = tpu.matmul %14, %15, %cst_16 {dimension_numbers = #tpu.dot_dimension_numbers<[1], [0], [0], [1], [0, 0, 1, 1], [], []>} : vector<128x256xf32>, vector<256x128xf32>, vector<128x128xf32> -> vector<128x128xf32>
      %c0_17 = arith.constant 0 : index
      %c0_18 = arith.constant 0 : index
      %17 = vector.load %arg6[%c0_17, %c0_18] : memref<1x128xf32, #tpu.memory_space<vmem>>, vector<1x128xf32>
      %18 = vector.broadcast %17 : vector<1x128xf32> to vector<128x128xf32>
      %19 = arith.addf %16, %18 : vector<128x128xf32>
      %cst_19 = arith.constant 0.000000e+00 : f32
      %20 = vector.broadcast %cst_19 : f32 to vector<128x128xf32>
      %21 = arith.maximumf %19, %20 : vector<128x128xf32>
      %c0_20 = arith.constant 0 : index
      %c0_21 = arith.constant 0 : index
      %22 = vector.load %arg7[%c0_20, %c0_21] : memref<128x128xf32, #tpu.memory_space<vmem>>, vector<128x128xf32>
      tpu.vector_store %arg7[%c0_20, %c0_21], %21 {strides = array<i32>} : memref<128x128xf32, #tpu.memory_space<vmem>>, vector<128x128xf32>,
    } else {
    }
    return
  }
  func.func @transform_0(%arg0: i32, %arg1: i32) -> (i32, i32) {
    %c0_i32 = arith.constant 0 : i32
    return %arg0, %arg1 : i32, i32
  }
  func.func @transform_1(%arg0: i32, %arg1: i32) -> (i32, i32) {
    %c0_i32 = arith.constant 0 : i32
    %c0_i32_0 = arith.constant 0 : i32
    return %arg1, %c0_i32 : i32, i32
  }
  func.func @transform_2(%arg0: i32, %arg1: i32) -> (i32, i32) {
    %c0_i32 = arith.constant 0 : i32
    %c0_i32_0 = arith.constant 0 : i32
    return %arg0, %c0_i32 : i32, i32
  }
  func.func @transform_3(%arg0: i32, %arg1: i32) -> (i32, i32) {
    %c0_i32 = arith.constant 0 : i32
    %c0_i32_0 = arith.constant 0 : i32
    %c0_i32_1 = arith.constant 0 : i32
    return %c0_i32, %c0_i32_0 : i32, i32
  }
  func.func @transform_4(%arg0: i32, %arg1: i32) -> (i32, i32) {
    %c0_i32 = arith.constant 0 : i32
    %c0_i32_0 = arith.constant 0 : i32
    %c0_i32_1 = arith.constant 0 : i32
    return %c0_i32, %c0_i32_0 : i32, i32
  }
  func.func @transform_5(%arg0: i32, %arg1: i32) -> (i32, i32) {
    %c0_i32 = arith.constant 0 : i32
    %c0_i32_0 = arith.constant 0 : i32
    return %arg0, %c0_i32 : i32, i32
  }
}

module attributes {stable_mosaic.version = 11 : i64} {
  func.func @_graphconv_relu_kernel(%arg0: i32, %arg1: i32, %arg2: memref<128x128xbf16, #tpu.memory_space<vmem>>, %arg3: memref<128x256xbf16, #tpu.memory_space<vmem>>, %arg4: memref<128x256xf32, #tpu.memory_space<vmem>>, %arg5: memref<512x256xf32, #tpu.memory_space<vmem>>, %arg6: memref<1x256xf32, #tpu.memory_space<vmem>>, %arg7: memref<128x256xf32, #tpu.memory_space<vmem>>, %arg8: memref<128x256xf32, #tpu.memory_space<vmem>>) attributes {dimension_semantics = [#tpu.dimension_semantics<parallel>, #tpu.dimension_semantics<arbitrary>], iteration_bounds = array<i64: 1, 1>, scalar_prefetch = 0 : i64, scratch_operands = 1 : i64, tpu.core_type = #tpu.core_type<tc>, window_params = [{transform_indices = @transform_0, window_bounds = array<i64: 128, 128>}, {transform_indices = @transform_1, window_bounds = array<i64: 128, 256>}, {transform_indices = @transform_2, window_bounds = array<i64: 128, 256>}, {pipeline_mode = #tpu.pipeline_mode<synchronous>, transform_indices = @transform_3, window_bounds = array<i64: 512, 256>}, {pipeline_mode = #tpu.pipeline_mode<synchronous>, transform_indices = @transform_4, window_bounds = array<i64: 1, 256>}, {transform_indices = @transform_5, window_bounds = array<i64: 128, 256>}]} {
    %c0_i32 = arith.constant 0 : i32
    %0 = arith.cmpi eq, %arg1, %c0_i32 : i32
    %1 = arith.extui %0 : i1 to i32
    %c0_i32_0 = arith.constant 0 : i32
    %2 = arith.cmpi ne, %1, %c0_i32_0 : i32
    scf.if %2 {
      %cst_10 = arith.constant 0.000000e+00 : f32
      %12 = vector.broadcast %cst_10 : f32 to vector<128x256xf32>
      %c0_11 = arith.constant 0 : index
      %c0_12 = arith.constant 0 : index
      %13 = vector.load %arg8[%c0_11, %c0_12] : memref<128x256xf32, #tpu.memory_space<vmem>>, vector<128x256xf32>
      tpu.vector_store %arg8[%c0_11, %c0_12], %12 {strides = array<i32>} : memref<128x256xf32, #tpu.memory_space<vmem>>, vector<128x256xf32>,
    } else {
    }
    %c0 = arith.constant 0 : index
    %c0_1 = arith.constant 0 : index
    %3 = vector.load %arg8[%c0, %c0_1] : memref<128x256xf32, #tpu.memory_space<vmem>>, vector<128x256xf32>
    %c0_2 = arith.constant 0 : index
    %c0_3 = arith.constant 0 : index
    %4 = vector.load %arg2[%c0_2, %c0_3] : memref<128x128xbf16, #tpu.memory_space<vmem>>, vector<128x128xbf16>
    %c0_4 = arith.constant 0 : index
    %c0_5 = arith.constant 0 : index
    %5 = vector.load %arg3[%c0_4, %c0_5] : memref<128x256xbf16, #tpu.memory_space<vmem>>, vector<128x256xbf16>
    %cst = arith.constant dense<0.000000e+00> : vector<128x256xf32>
    %6 = tpu.matmul %4, %5, %cst {dimension_numbers = #tpu.dot_dimension_numbers<[1], [0], [0], [1], [0, 0, 1, 1], [], []>} : vector<128x128xbf16>, vector<128x256xbf16>, vector<128x256xf32> -> vector<128x256xf32>
    %7 = arith.addf %3, %6 : vector<128x256xf32>
    %c0_6 = arith.constant 0 : index
    %c0_7 = arith.constant 0 : index
    %8 = vector.load %arg8[%c0_6, %c0_7] : memref<128x256xf32, #tpu.memory_space<vmem>>, vector<128x256xf32>
    tpu.vector_store %arg8[%c0_6, %c0_7], %7 {strides = array<i32>} : memref<128x256xf32, #tpu.memory_space<vmem>>, vector<128x256xf32>,
    %c0_i32_8 = arith.constant 0 : i32
    %9 = arith.cmpi eq, %arg1, %c0_i32_8 : i32
    %10 = arith.extui %9 : i1 to i32
    %c0_i32_9 = arith.constant 0 : i32
    %11 = arith.cmpi ne, %10, %c0_i32_9 : i32
    scf.if %11 {
      %c0_10 = arith.constant 0 : index
      %c0_11 = arith.constant 0 : index
      %12 = vector.load %arg8[%c0_10, %c0_11] : memref<128x256xf32, #tpu.memory_space<vmem>>, vector<128x256xf32>
      %c0_12 = arith.constant 0 : index
      %c0_13 = arith.constant 0 : index
      %13 = vector.load %arg4[%c0_12, %c0_13] : memref<128x256xf32, #tpu.memory_space<vmem>>, vector<128x256xf32>
      %14 = tpu.concatenate %12, %13 in 1 : vector<128x256xf32>, vector<128x256xf32> -> vector<128x512xf32>
      %c0_14 = arith.constant 0 : index
      %c0_15 = arith.constant 0 : index
      %15 = vector.load %arg5[%c0_14, %c0_15] : memref<512x256xf32, #tpu.memory_space<vmem>>, vector<512x256xf32>
      %cst_16 = arith.constant dense<0.000000e+00> : vector<128x256xf32>
      %16 = tpu.matmul %14, %15, %cst_16 {dimension_numbers = #tpu.dot_dimension_numbers<[1], [0], [0], [1], [0, 0, 1, 1], [], []>} : vector<128x512xf32>, vector<512x256xf32>, vector<128x256xf32> -> vector<128x256xf32>
      %c0_17 = arith.constant 0 : index
      %c0_18 = arith.constant 0 : index
      %17 = vector.load %arg6[%c0_17, %c0_18] : memref<1x256xf32, #tpu.memory_space<vmem>>, vector<1x256xf32>
      %18 = vector.broadcast %17 : vector<1x256xf32> to vector<128x256xf32>
      %19 = arith.addf %16, %18 : vector<128x256xf32>
      %cst_19 = arith.constant 0.000000e+00 : f32
      %20 = vector.broadcast %cst_19 : f32 to vector<128x256xf32>
      %21 = arith.maximumf %19, %20 : vector<128x256xf32>
      %c0_20 = arith.constant 0 : index
      %c0_21 = arith.constant 0 : index
      %22 = vector.load %arg7[%c0_20, %c0_21] : memref<128x256xf32, #tpu.memory_space<vmem>>, vector<128x256xf32>
      tpu.vector_store %arg7[%c0_20, %c0_21], %21 {strides = array<i32>} : memref<128x256xf32, #tpu.memory_space<vmem>>, vector<128x256xf32>,
    } else {
    }
    return
  }
  func.func @transform_0(%arg0: i32, %arg1: i32) -> (i32, i32) {
    %c0_i32 = arith.constant 0 : i32
    return %arg0, %arg1 : i32, i32
  }
  func.func @transform_1(%arg0: i32, %arg1: i32) -> (i32, i32) {
    %c0_i32 = arith.constant 0 : i32
    %c0_i32_0 = arith.constant 0 : i32
    return %arg1, %c0_i32 : i32, i32
  }
  func.func @transform_2(%arg0: i32, %arg1: i32) -> (i32, i32) {
    %c0_i32 = arith.constant 0 : i32
    %c0_i32_0 = arith.constant 0 : i32
    return %arg0, %c0_i32 : i32, i32
  }
  func.func @transform_3(%arg0: i32, %arg1: i32) -> (i32, i32) {
    %c0_i32 = arith.constant 0 : i32
    %c0_i32_0 = arith.constant 0 : i32
    %c0_i32_1 = arith.constant 0 : i32
    return %c0_i32, %c0_i32_0 : i32, i32
  }
  func.func @transform_4(%arg0: i32, %arg1: i32) -> (i32, i32) {
    %c0_i32 = arith.constant 0 : i32
    %c0_i32_0 = arith.constant 0 : i32
    %c0_i32_1 = arith.constant 0 : i32
    return %c0_i32, %c0_i32_0 : i32, i32
  }
  func.func @transform_5(%arg0: i32, %arg1: i32) -> (i32, i32) {
    %c0_i32 = arith.constant 0 : i32
    %c0_i32_0 = arith.constant 0 : i32
    return %arg0, %c0_i32 : i32, i32
  }
}

module attributes {stable_mosaic.version = 11 : i64} {
  func.func @_pool_head_kernel(%arg0: i32, %arg1: memref<128x256xf32, #tpu.memory_space<vmem>>, %arg2: memref<128x1xi32, #tpu.memory_space<vmem>>, %arg3: memref<256x128xf32, #tpu.memory_space<vmem>>, %arg4: memref<1x128xf32, #tpu.memory_space<vmem>>, %arg5: memref<8x128xf32, #tpu.memory_space<vmem>>, %arg6: memref<8x128xf32, #tpu.memory_space<vmem>>, %arg7: memref<8x256xi32, #tpu.memory_space<vmem>>, %arg8: memref<8x256xf32, #tpu.memory_space<vmem>>, %arg9: memref<8x256xi32, #tpu.memory_space<vmem>>) attributes {dimension_semantics = [#tpu.dimension_semantics<arbitrary>], iteration_bounds = array<i64: 1>, scalar_prefetch = 0 : i64, scratch_operands = 2 : i64, tpu.core_type = #tpu.core_type<tc>, window_params = [{transform_indices = @transform_0, window_bounds = array<i64: 128, 256>}, {transform_indices = @transform_1, window_bounds = array<i64: 128, 1>}, {pipeline_mode = #tpu.pipeline_mode<synchronous>, transform_indices = @transform_2, window_bounds = array<i64: 256, 128>}, {pipeline_mode = #tpu.pipeline_mode<synchronous>, transform_indices = @transform_3, window_bounds = array<i64: 1, 128>}, {pipeline_mode = #tpu.pipeline_mode<synchronous>, transform_indices = @transform_4, window_bounds = array<i64: 8, 128>}, {pipeline_mode = #tpu.pipeline_mode<synchronous>, transform_indices = @transform_5, window_bounds = array<i64: 8, 128>}, {pipeline_mode = #tpu.pipeline_mode<synchronous>, transform_indices = @transform_6, window_bounds = array<i64: 8, 256>}]} {
    %c0_i32 = arith.constant 0 : i32
    %0 = arith.cmpi eq, %arg0, %c0_i32 : i32
    %1 = arith.extui %0 : i1 to i32
    %c0_i32_0 = arith.constant 0 : i32
    %2 = arith.cmpi ne, %1, %c0_i32_0 : i32
    scf.if %2 {
      %cst_29 = arith.constant -1.000000e+30 : f32
      %54 = vector.broadcast %cst_29 : f32 to vector<8x256xf32>
      %c0_30 = arith.constant 0 : index
      %c0_31 = arith.constant 0 : index
      %55 = vector.load %arg8[%c0_30, %c0_31] : memref<8x256xf32, #tpu.memory_space<vmem>>, vector<8x256xf32>
      tpu.vector_store %arg8[%c0_30, %c0_31], %54 {strides = array<i32>} : memref<8x256xf32, #tpu.memory_space<vmem>>, vector<8x256xf32>,
      %c128_i32_32 = arith.constant 128 : i32
      %56 = vector.broadcast %c128_i32_32 : i32 to vector<8x256xi32>
      %c0_33 = arith.constant 0 : index
      %c0_34 = arith.constant 0 : index
      %57 = vector.load %arg9[%c0_33, %c0_34] : memref<8x256xi32, #tpu.memory_space<vmem>>, vector<8x256xi32>
      tpu.vector_store %arg9[%c0_33, %c0_34], %56 {strides = array<i32>} : memref<8x256xi32, #tpu.memory_space<vmem>>, vector<8x256xi32>,
    } else {
    }
    %c0 = arith.constant 0 : index
    %c0_1 = arith.constant 0 : index
    %3 = vector.load %arg1[%c0, %c0_1] : memref<128x256xf32, #tpu.memory_space<vmem>>, vector<128x256xf32>
    %c0_2 = arith.constant 0 : index
    %c0_3 = arith.constant 0 : index
    %4 = vector.load %arg2[%c0_2, %c0_3] : memref<128x1xi32, #tpu.memory_space<vmem>>, vector<128x1xi32>
    %5 = tpu.iota {dimensions = array<i32: 0>} : vector<128x256xi32>
    %c128_i32 = arith.constant 128 : i32
    %6 = arith.muli %arg0, %c128_i32 : i32
    %7 = vector.broadcast %6 : i32 to vector<128x256xi32>
    %8 = arith.addi %5, %7 : vector<128x256xi32>
    %c0_i32_4 = arith.constant 0 : i32
    %9 = vector.broadcast %c0_i32_4 : i32 to vector<128x1xi32>
    %10 = arith.cmpi eq, %4, %9 : vector<128x1xi32>
    %cst = arith.constant -1.000000e+30 : f32
    %11 = vector.shape_cast %10 : vector<128x1xi1> to vector<128x1xi1>
    %12 = vector.broadcast %11 : vector<128x1xi1> to vector<128x256xi1>
    %13 = vector.broadcast %cst : f32 to vector<128x256xf32>
    %14 = arith.select %12, %3, %13 : vector<128x256xi1>, vector<128x256xf32>
    %cst_5 = arith.constant dense<0xFF800000> : vector<256xf32>
    %15 = vector.multi_reduction <maximumf>, %14, %cst_5 [0] : vector<128x256xf32> to vector<256xf32>
    %16 = vector.shape_cast %15 : vector<256xf32> to vector<1x256xf32>
    %17 = vector.broadcast %16 : vector<1x256xf32> to vector<128x256xf32>
    %18 = arith.cmpf oeq, %14, %17 : vector<128x256xf32>
    %c128_i32_6 = arith.constant 128 : i32
    %19 = vector.broadcast %c128_i32_6 : i32 to vector<128x256xi32>
    %20 = arith.select %18, %8, %19 : vector<128x256xi1>, vector<128x256xi32>
    %cst_7 = arith.constant dense<2147483647> : vector<256xi32>
    %21 = vector.multi_reduction <minsi>, %20, %cst_7 [0] : vector<128x256xi32> to vector<256xi32>
    %22 = vector.shape_cast %21 : vector<256xi32> to vector<1x256xi32>
    %c0_8 = arith.constant 0 : index
    %c0_9 = arith.constant 0 : index
    %23 = vector.load %arg8[%c0_8, %c0_9] : memref<8x256xf32, #tpu.memory_space<vmem>>, vector<1x256xf32>
    %24 = arith.cmpf ogt, %16, %23 : vector<1x256xf32>
    %c0_10 = arith.constant 0 : index
    %c0_11 = arith.constant 0 : index
    %25 = vector.load %arg9[%c0_10, %c0_11] : memref<8x256xi32, #tpu.memory_space<vmem>>, vector<1x256xi32>
    %26 = arith.select %24, %22, %25 : vector<1x256xi1>, vector<1x256xi32>
    %c0_12 = arith.constant 0 : index
    %c0_13 = arith.constant 0 : index
    %27 = vector.load %arg9[%c0_12, %c0_13] : memref<8x256xi32, #tpu.memory_space<vmem>>, vector<1x256xi32>
    tpu.vector_store %arg9[%c0_12, %c0_13], %26 {strides = array<i32>} : memref<8x256xi32, #tpu.memory_space<vmem>>, vector<1x256xi32>,
    %28 = arith.select %24, %16, %23 : vector<1x256xi1>, vector<1x256xf32>
    %c0_14 = arith.constant 0 : index
    %c0_15 = arith.constant 0 : index
    %29 = vector.load %arg8[%c0_14, %c0_15] : memref<8x256xf32, #tpu.memory_space<vmem>>, vector<1x256xf32>
    tpu.vector_store %arg8[%c0_14, %c0_15], %28 {strides = array<i32>} : memref<8x256xf32, #tpu.memory_space<vmem>>, vector<1x256xf32>,
    %c1_i32 = arith.constant 1 : i32
    %30 = vector.broadcast %c1_i32 : i32 to vector<128x1xi32>
    %31 = arith.cmpi eq, %4, %30 : vector<128x1xi32>
    %cst_16 = arith.constant -1.000000e+30 : f32
    %32 = vector.shape_cast %31 : vector<128x1xi1> to vector<128x1xi1>
    %33 = vector.broadcast %32 : vector<128x1xi1> to vector<128x256xi1>
    %34 = vector.broadcast %cst_16 : f32 to vector<128x256xf32>
    %35 = arith.select %33, %3, %34 : vector<128x256xi1>, vector<128x256xf32>
    %cst_17 = arith.constant dense<0xFF800000> : vector<256xf32>
    %36 = vector.multi_reduction <maximumf>, %35, %cst_17 [0] : vector<128x256xf32> to vector<256xf32>
    %37 = vector.shape_cast %36 : vector<256xf32> to vector<1x256xf32>
    %38 = vector.broadcast %37 : vector<1x256xf32> to vector<128x256xf32>
    %39 = arith.cmpf oeq, %35, %38 : vector<128x256xf32>
    %c128_i32_18 = arith.constant 128 : i32
    %40 = vector.broadcast %c128_i32_18 : i32 to vector<128x256xi32>
    %41 = arith.select %39, %8, %40 : vector<128x256xi1>, vector<128x256xi32>
    %cst_19 = arith.constant dense<2147483647> : vector<256xi32>
    %42 = vector.multi_reduction <minsi>, %41, %cst_19 [0] : vector<128x256xi32> to vector<256xi32>
    %43 = vector.shape_cast %42 : vector<256xi32> to vector<1x256xi32>
    %c1 = arith.constant 1 : index
    %c0_20 = arith.constant 0 : index
    %44 = vector.load %arg8[%c1, %c0_20] : memref<8x256xf32, #tpu.memory_space<vmem>>, vector<1x256xf32>
    %45 = arith.cmpf ogt, %37, %44 : vector<1x256xf32>
    %c1_21 = arith.constant 1 : index
    %c0_22 = arith.constant 0 : index
    %46 = vector.load %arg9[%c1_21, %c0_22] : memref<8x256xi32, #tpu.memory_space<vmem>>, vector<1x256xi32>
    %47 = arith.select %45, %43, %46 : vector<1x256xi1>, vector<1x256xi32>
    %c1_23 = arith.constant 1 : index
    %c0_24 = arith.constant 0 : index
    %48 = vector.load %arg9[%c1_23, %c0_24] : memref<8x256xi32, #tpu.memory_space<vmem>>, vector<1x256xi32>
    tpu.vector_store %arg9[%c1_23, %c0_24], %47 {strides = array<i32>} : memref<8x256xi32, #tpu.memory_space<vmem>>, vector<1x256xi32>,
    %49 = arith.select %45, %37, %44 : vector<1x256xi1>, vector<1x256xf32>
    %c1_25 = arith.constant 1 : index
    %c0_26 = arith.constant 0 : index
    %50 = vector.load %arg8[%c1_25, %c0_26] : memref<8x256xf32, #tpu.memory_space<vmem>>, vector<1x256xf32>
    tpu.vector_store %arg8[%c1_25, %c0_26], %49 {strides = array<i32>} : memref<8x256xf32, #tpu.memory_space<vmem>>, vector<1x256xf32>,
    %c0_i32_27 = arith.constant 0 : i32
    %51 = arith.cmpi eq, %arg0, %c0_i32_27 : i32
    %52 = arith.extui %51 : i1 to i32
    %c0_i32_28 = arith.constant 0 : i32
    %53 = arith.cmpi ne, %52, %c0_i32_28 : i32
    scf.if %53 {
      %c0_29 = arith.constant 0 : index
      %c0_30 = arith.constant 0 : index
      %54 = vector.load %arg8[%c0_29, %c0_30] : memref<8x256xf32, #tpu.memory_space<vmem>>, vector<8x256xf32>
      %cst_31 = arith.constant -5.000000e+29 : f32
      %55 = vector.broadcast %cst_31 : f32 to vector<8x256xf32>
      %56 = arith.cmpf ole, %54, %55 : vector<8x256xf32>
      %cst_32 = arith.constant 0.000000e+00 : f32
      %57 = vector.broadcast %cst_32 : f32 to vector<8x256xf32>
      %58 = arith.select %56, %57, %54 : vector<8x256xi1>, vector<8x256xf32>
      %c0_33 = arith.constant 0 : index
      %c0_34 = arith.constant 0 : index
      %59 = vector.load %arg3[%c0_33, %c0_34] : memref<256x128xf32, #tpu.memory_space<vmem>>, vector<256x128xf32>
      %cst_35 = arith.constant dense<0.000000e+00> : vector<8x128xf32>
      %60 = tpu.matmul %58, %59, %cst_35 {dimension_numbers = #tpu.dot_dimension_numbers<[1], [0], [0], [1], [0, 0, 1, 1], [], []>} : vector<8x256xf32>, vector<256x128xf32>, vector<8x128xf32> -> vector<8x128xf32>
      %c0_36 = arith.constant 0 : index
      %c0_37 = arith.constant 0 : index
      %61 = vector.load %arg4[%c0_36, %c0_37] : memref<1x128xf32, #tpu.memory_space<vmem>>, vector<1x128xf32>
      %62 = vector.broadcast %61 : vector<1x128xf32> to vector<8x128xf32>
      %63 = arith.addf %60, %62 : vector<8x128xf32>
      %64 = tpu.iota {dimensions = array<i32: 1>} : vector<8x128xi32>
      %c4_i32 = arith.constant 4 : i32
      %65 = vector.broadcast %c4_i32 : i32 to vector<8x128xi32>
      %66 = arith.cmpi slt, %64, %65 : vector<8x128xi32>
      %cst_38 = arith.constant -1.000000e+30 : f32
      %67 = vector.broadcast %cst_38 : f32 to vector<8x128xf32>
      %68 = arith.select %66, %63, %67 : vector<8x128xi1>, vector<8x128xf32>
      %cst_39 = arith.constant dense<0xFF800000> : vector<8xf32>
      %69 = vector.multi_reduction <maximumf>, %68, %cst_39 [1] : vector<8x128xf32> to vector<8xf32>
      %70 = vector.shape_cast %69 : vector<8xf32> to vector<8x1xf32>
      %71 = vector.broadcast %70 : vector<8x1xf32> to vector<8x128xf32>
      %72 = arith.subf %68, %71 : vector<8x128xf32>
      %73 = math.exp %72 : vector<8x128xf32>
      %cst_40 = arith.constant dense<0.000000e+00> : vector<8xf32>
      %74 = vector.multi_reduction <add>, %73, %cst_40 [1] : vector<8x128xf32> to vector<8xf32>
      %75 = vector.shape_cast %74 : vector<8xf32> to vector<8x1xf32>
      %76 = math.log %75 : vector<8x1xf32>
      %77 = vector.broadcast %76 : vector<8x1xf32> to vector<8x128xf32>
      %78 = arith.subf %72, %77 : vector<8x128xf32>
      %c0_41 = arith.constant 0 : index
      %c0_42 = arith.constant 0 : index
      %79 = vector.load %arg5[%c0_41, %c0_42] : memref<8x128xf32, #tpu.memory_space<vmem>>, vector<8x128xf32>
      tpu.vector_store %arg5[%c0_41, %c0_42], %78 {strides = array<i32>} : memref<8x128xf32, #tpu.memory_space<vmem>>, vector<8x128xf32>,
      %80 = math.exp %78 : vector<8x128xf32>
      %c0_43 = arith.constant 0 : index
      %c0_44 = arith.constant 0 : index
      %81 = vector.load %arg6[%c0_43, %c0_44] : memref<8x128xf32, #tpu.memory_space<vmem>>, vector<8x128xf32>
      tpu.vector_store %arg6[%c0_43, %c0_44], %80 {strides = array<i32>} : memref<8x128xf32, #tpu.memory_space<vmem>>, vector<8x128xf32>,
      %c0_45 = arith.constant 0 : index
      %c0_46 = arith.constant 0 : index
      %82 = vector.load %arg9[%c0_45, %c0_46] : memref<8x256xi32, #tpu.memory_space<vmem>>, vector<8x256xi32>
      %c0_47 = arith.constant 0 : index
      %c0_48 = arith.constant 0 : index
      %83 = vector.load %arg7[%c0_47, %c0_48] : memref<8x256xi32, #tpu.memory_space<vmem>>, vector<8x256xi32>
      tpu.vector_store %arg7[%c0_47, %c0_48], %82 {strides = array<i32>} : memref<8x256xi32, #tpu.memory_space<vmem>>, vector<8x256xi32>,
    } else {
    }
    return
  }
  func.func @transform_0(%arg0: i32) -> (i32, i32) {
    %c0_i32 = arith.constant 0 : i32
    %c0_i32_0 = arith.constant 0 : i32
    return %arg0, %c0_i32 : i32, i32
  }
  func.func @transform_1(%arg0: i32) -> (i32, i32) {
    %c0_i32 = arith.constant 0 : i32
    %c0_i32_0 = arith.constant 0 : i32
    return %arg0, %c0_i32 : i32, i32
  }
  func.func @transform_2(%arg0: i32) -> (i32, i32) {
    %c0_i32 = arith.constant 0 : i32
    %c0_i32_0 = arith.constant 0 : i32
    %c0_i32_1 = arith.constant 0 : i32
    return %c0_i32, %c0_i32_0 : i32, i32
  }
  func.func @transform_3(%arg0: i32) -> (i32, i32) {
    %c0_i32 = arith.constant 0 : i32
    %c0_i32_0 = arith.constant 0 : i32
    %c0_i32_1 = arith.constant 0 : i32
    return %c0_i32, %c0_i32_0 : i32, i32
  }
  func.func @transform_4(%arg0: i32) -> (i32, i32) {
    %c0_i32 = arith.constant 0 : i32
    %c0_i32_0 = arith.constant 0 : i32
    %c0_i32_1 = arith.constant 0 : i32
    return %c0_i32, %c0_i32_0 : i32, i32
  }
  func.func @transform_5(%arg0: i32) -> (i32, i32) {
    %c0_i32 = arith.constant 0 : i32
    %c0_i32_0 = arith.constant 0 : i32
    %c0_i32_1 = arith.constant 0 : i32
    return %c0_i32, %c0_i32_0 : i32, i32
  }
  func.func @transform_6(%arg0: i32) -> (i32, i32) {
    %c0_i32 = arith.constant 0 : i32
    %c0_i32_0 = arith.constant 0 : i32
    %c0_i32_1 = arith.constant 0 : i32
    return %c0_i32, %c0_i32_0 : i32, i32
  }
}

</mosaic_0001>

<bundles_post_ra>
// kernel: gcn_forward.4
= control target key start
LH: loop header
LB: loop body
LE: loop exit
PB: predicated region body
PF: predicated region fallthrough
CT: control target
= control target key end

     0   :  { %s950_s1 = inlined_call_operand.vmem [shape: bf16[128,128], index: 1, kind: input, shape index: {}]   ;;  %s951_s0 = inlined_call_operand.vmem [shape: bf16[128,128], index: 0, kind: input, shape index: {}]   ;;  %s952_s3 = inlined_call_operand.vmem [shape: f32[256,128], index: 3, kind: input, shape index: {}]   ;;  %s953_s2 = inlined_call_operand.vmem [shape: f32[128,128], index: 2, kind: input, shape index: {}]   ;;  %s954_s4 = inlined_call_operand.vmem [shape: f32[1,128], index: 4, kind: input, shape index: {}]   ;;  %s955_s5 = inlined_call_operand.vmem [shape: f32[128,128], index: 5, kind: output, shape index: {}]  }
   0x1   :  { %v581_v0 = vld [vmem:[%s950_s1 + $0x38] sm:$0xff]  ;;  %v580_v1 = vld [vmem:[%s950_s1 + $0x30] sm:$0xff]  ;;  %v579_v2 = vld [vmem:[%s950_s1 + $0x28] sm:$0xff] }
   0x2   :  { %184 = vmatpush.bf16.msra.mxu0 %v581_v0  ;;  %582 = vmatpush.bf16.msra.mxu3 %v581_v0  ;;  %v578_v3 = vld [vmem:[%s950_s1 + $0x20] sm:$0xff]  ;;  %v577_v4 = vld [vmem:[%s950_s1 + $0x18] sm:$0xff]  ;;  %v576_v5 = vld [vmem:[%s950_s1 + $0x10] sm:$0xff] }
   0x3   :  { %v575_v6 = vld [vmem:[%s950_s1 + $0x8] sm:$0xff]  ;;  %v574_v7 = vld [vmem:[%s950_s1] sm:$0xff]  ;;  %v572_v9 = vld [vmem:[%s951_s0 + $0x30] sm:$0xff] }
   0x4   :  { %v566_v8 = vld [vmem:[%s951_s0] sm:$0xff]  ;;  %v567_v10 = vld [vmem:[%s951_s0 + $0x8] sm:$0xff]  ;;  %v573_v11 = vld [vmem:[%s951_s0 + $0x38] sm:$0xff] }
   0x5   :  { %v568_v12 = vld [vmem:[%s951_s0 + $0x10] sm:$0xff]  ;;  %v569_v13 = vld [vmem:[%s951_s0 + $0x18] sm:$0xff]  ;;  %v715_v18 = vld [vmem:[%s952_s3 + $0xe8] sm:$0xff] }
   0x6   :  { %185 = vmatpush.bf16.msra.mxu0 %v580_v1  ;;  %583 = vmatpush.bf16.msra.mxu3 %v580_v1  ;;  %v698_v14 = vld [vmem:[%s952_s3 + $0xf8] sm:$0xff]  ;;  %v703_v15 = vld [vmem:[%s952_s3 + $0xf0] sm:$0xff]  ;;  %v313_v19 = vld [vmem:[%s952_s3 + $0x68] sm:$0xff] }
   0x7   :  { %v315_v16 = vld [vmem:[%s952_s3 + $0x78] sm:$0xff]  ;;  %401 = vmatpush.msra.mxu2 %v698_v14  ;;  %v314_v17 = vld [vmem:[%s952_s3 + $0x70] sm:$0xff]  ;;  %v724_v20 = vld [vmem:[%s952_s3 + $0xe0] sm:$0xff] }
   0x8   :  { %336 = vmatpush.msra.mxu1 %v315_v16  ;;  %v312_v21 = vld [vmem:[%s952_s3 + $0x60] sm:$0xff]  ;;  %v733_v22 = vld [vmem:[%s952_s3 + $0xd8] sm:$0xff]  ;;  %v742_v24 = vld [vmem:[%s952_s3 + $0xd0] sm:$0xff] }
   0x9   :  { %402 = vmatpush.msra.mxu2 %v703_v15  ;;  %v311_v23 = vld [vmem:[%s952_s3 + $0x58] sm:$0xff]  ;;  %v310_v25 = vld [vmem:[%s952_s3 + $0x50] sm:$0xff]  ;;  %v751_v26 = vld [vmem:[%s952_s3 + $0xc8] sm:$0xff] }
   0xa   :  { %186 = vmatpush.bf16.msra.mxu0 %v579_v2  ;;  %584 = vmatpush.bf16.msra.mxu3 %v579_v2  ;;  %v309_v27 = vld [vmem:[%s952_s3 + $0x48] sm:$0xff]  ;;  %v570_v28 = vld [vmem:[%s951_s0 + $0x20] sm:$0xff]  ;;  %v772_v31 = vld [vmem:[%s952_s3 + $0xb8] sm:$0xff] }
   0xb   :  { %337 = vmatpush.msra.mxu1 %v314_v17  ;;  %403 = vmatpush.msra.mxu2 %v715_v18  ;;  %v763_v29 = vld [vmem:[%s952_s3 + $0xc0] sm:$0xff]  ;;  %v307_v32 = vld [vmem:[%s952_s3 + $0x38] sm:$0xff]  ;;  %v322_v33 = vld [vmem:[%s952_s3 + $0xb0] sm:$0xff] }
   0xc   :  { %v308_v30 = vld [vmem:[%s952_s3 + $0x40] sm:$0xff]  ;;  %v306_v34 = vld [vmem:[%s952_s3 + $0x30] sm:$0xff]  ;;  %v321_v35 = vld [vmem:[%s952_s3 + $0xa8] sm:$0xff] }
   0xd   :  { %338 = vmatpush.msra.mxu1 %v313_v19  ;;  %404 = vmatpush.msra.mxu2 %v724_v20  ;;  %v305_v36 = vld [vmem:[%s952_s3 + $0x28] sm:$0xff]  ;;  %v320_v37 = vld [vmem:[%s952_s3 + $0xa0] sm:$0xff]  ;;  %v319_v39 = vld [vmem:[%s952_s3 + $0x98] sm:$0xff] }
   0xe   :  { %187 = vmatpush.bf16.msra.mxu0 %v578_v3  ;;  %585 = vmatpush.bf16.msra.mxu3 %v578_v3  ;;  %v304_v38 = vld [vmem:[%s952_s3 + $0x20] sm:$0xff]  ;;  %v303_v40 = vld [vmem:[%s952_s3 + $0x18] sm:$0xff]  ;;  %v318_v41 = vld [vmem:[%s952_s3 + $0x90] sm:$0xff] }
   0xf   :  { %339 = vmatpush.msra.mxu1 %v312_v21  ;;  %405 = vmatpush.msra.mxu2 %v733_v22  ;;  %v302_v42 = vld [vmem:[%s952_s3 + $0x10] sm:$0xff]  ;;  %v317_v43 = vld [vmem:[%s952_s3 + $0x88] sm:$0xff]  ;;  %v316_v46 = vld [vmem:[%s952_s3 + $0x80] sm:$0xff] }
  0x10   :  { %v301_v44 = vld [vmem:[%s952_s3 + $0x8] sm:$0xff]  ;;  %v284_v47 = vld [vmem:[%s953_s2] sm:$0xff]  ;;  %v286_v50 = vld [vmem:[%s953_s2 + $0x10] sm:$0xff] }
  0x11   :  { %340 = vmatpush.msra.mxu1 %v311_v23  ;;  %406 = vmatpush.msra.mxu2 %v742_v24  ;;  %v571_v45 = vld [vmem:[%s951_s0 + $0x28] sm:$0xff]  ;;  %v300_v48 = vld [vmem:[%s952_s3] sm:$0xff]  ;;  %v287_v51 = vld [vmem:[%s953_s2 + $0x18] sm:$0xff] }
  0x12   :  { %188 = vmatpush.bf16.msra.mxu0 %v577_v4  ;;  %586 = vmatpush.bf16.msra.mxu3 %v577_v4  ;;  %v285_v49 = vld [vmem:[%s953_s2 + $0x8] sm:$0xff]  ;;  %v288_v52 = vld [vmem:[%s953_s2 + $0x20] sm:$0xff]  ;;  %v290_v57 = vld [vmem:[%s953_s2 + $0x30] sm:$0xff] }
  0x13   :  { %341 = vmatpush.msra.mxu1 %v310_v25  ;;  %407 = vmatpush.msra.mxu2 %v751_v26  ;;  %v289_v54 = vld [vmem:[%s953_s2 + $0x28] sm:$0xff]  ;;  %v291_v60 = vld [vmem:[%s953_s2 + $0x38] sm:$0xff]  ;;  %v292_v63 = vld [vmem:[%s953_s2 + $0x40] sm:$0xff] }
  0x14   :  { %v293_v2 = vld [vmem:[%s953_s2 + $0x48] sm:$0xff]  ;;  %v296_v3 = vld [vmem:[%s953_s2 + $0x60] sm:$0xff] }
  0x15   :  { %342 = vmatpush.msra.mxu1 %v309_v27  ;;  %408 = vmatpush.msra.mxu2 %v763_v29 }
  0x16   :  { %189 = vmatpush.bf16.msra.mxu0 %v576_v5  ;;  %587 = vmatpush.bf16.msra.mxu3 %v576_v5  ;;  %v294_v5 = vld [vmem:[%s953_s2 + $0x50] sm:$0xff] }
  0x17   :  { %343 = vmatpush.msra.mxu1 %v308_v30  ;;  %409 = vmatpush.msra.mxu2 %v772_v31 }
  0x19   :  { %344 = vmatpush.msra.mxu1 %v307_v32  ;;  %410 = vmatpush.msra.mxu2 %v322_v33 }
  0x1a   :  { %190 = vmatpush.bf16.msra.mxu0 %v575_v6  ;;  %588 = vmatpush.bf16.msra.mxu3 %v575_v6  ;;  %v297_v6 = vld [vmem:[%s953_s2 + $0x68] sm:$0xff] }
  0x1b   :  { %345 = vmatpush.msra.mxu1 %v306_v34  ;;  %411 = vmatpush.msra.mxu2 %v321_v35 }
  0x1d   :  { %346 = vmatpush.msra.mxu1 %v305_v36  ;;  %412 = vmatpush.msra.mxu2 %v320_v37 }
  0x1e   :  { %191 = vmatpush.bf16.msra.mxu0 %v574_v7  ;;  %589 = vmatpush.bf16.msra.mxu3 %v574_v7 }
  0x1f   :  { %347 = vmatpush.msra.mxu1 %v304_v38  ;;  %413 = vmatpush.msra.mxu2 %v319_v39 }
  0x21   :  { %192 = vmatmul.bf16.vlgmr.msra.gmra.mxu0 %v566_v8  ;;  %222 = vmatmul.bf16.vlgmr.msra.gmra.mxu3 %v572_v9  ;;  %v295_v8 = vld [vmem:[%s953_s2 + $0x58] sm:$0xff]  ;;  %v298_v9 = vld [vmem:[%s953_s2 + $0x70] sm:$0xff] }
  0x22   :  { %590 = vmatpush.msrb.mxu3 %v315_v16  ;;  %348 = vmatpush.msra.mxu1 %v303_v40 }
  0x23   :  { %414 = vmatpush.msra.mxu2 %v318_v41 }
  0x24   :  { %591 = vmatpush.msrb.mxu3 %v314_v17  ;;  %349 = vmatpush.msra.mxu1 %v302_v42 }
  0x25   :  { %415 = vmatpush.msra.mxu2 %v317_v43 }
  0x26   :  { %592 = vmatpush.msrb.mxu3 %v313_v19  ;;  %350 = vmatpush.msra.mxu1 %v301_v44 }
  0x27   :  { %416 = vmatpush.msra.mxu2 %v316_v46 }
  0x28   :  { %593 = vmatpush.msrb.mxu3 %v312_v21  ;;  %417 = vmatmul.f32.vlgmr.msra.gmra.mxu2 %v284_v47 }
  0x29   :  { %351 = vmatpush.msra.mxu1 %v300_v48 }
  0x2a   :  { %594 = vmatpush.msrb.mxu3 %v311_v23 }
  0x2c   :  { %595 = vmatpush.msrb.mxu3 %v310_v25 }
  0x2e   :  { %596 = vmatpush.msrb.mxu3 %v309_v27 }
  0x30   :  { %597 = vmatpush.msrb.mxu3 %v308_v30  ;;  %420 = vmatmul.f32.gmra.mxu2 %v285_v49 }
  0x31   :  { %197 = vmatmul.bf16.gmra.mxu0 %v567_v10  ;;  %227 = vmatmul.bf16.gmra.mxu3 %v573_v11  ;;  %v299_v11 = vld [vmem:[%s953_s2 + $0x78] sm:$0xff] }
  0x32   :  { %598 = vmatpush.msrb.mxu3 %v307_v32 }
  0x34   :  { %599 = vmatpush.msrb.mxu3 %v306_v34 }
  0x36   :  { %600 = vmatpush.msrb.mxu3 %v305_v36 }
  0x38   :  { %601 = vmatpush.msrb.mxu3 %v304_v38  ;;  %423 = vmatmul.f32.gmra.mxu2 %v286_v50 }
  0x3a   :  { %602 = vmatpush.msrb.mxu3 %v303_v40 }
  0x3c   :  { %603 = vmatpush.msrb.mxu3 %v302_v42 }
  0x3e   :  { %604 = vmatpush.msrb.mxu3 %v301_v44 }
  0x40   :  { %605 = vmatpush.msrb.mxu3 %v300_v48  ;;  %426 = vmatmul.f32.gmra.mxu2 %v287_v51 }
  0x41   :  { %202 = vmatmul.bf16.gmra.mxu0 %v568_v12 }
  0x42   :  { %606 = vmatpush.msra.mxu3 %v698_v14 }
  0x44   :  { %607 = vmatpush.msra.mxu3 %v703_v15 }
  0x46   :  { %608 = vmatpush.msra.mxu3 %v715_v18  ;;  %v884_v18 = vld [vmem:[%s954_s4] ss:$0 sm:$0xff] }
  0x48   :  { %609 = vmatpush.msra.mxu3 %v724_v20  ;;  %429 = vmatmul.f32.gmra.mxu2 %v288_v52 }
  0x4a   :  { %610 = vmatpush.msra.mxu3 %v733_v22 }
  0x4c   :  { %611 = vmatpush.msra.mxu3 %v742_v24 }
  0x4e   :  { %612 = vmatpush.msra.mxu3 %v751_v26 }
  0x50   :  { %613 = vmatpush.msra.mxu3 %v763_v29  ;;  %432 = vmatmul.f32.gmra.mxu2 %v289_v54 }
  0x51   :  { %207 = vmatmul.bf16.gmra.mxu0 %v569_v13 }
  0x52   :  { %614 = vmatpush.msra.mxu3 %v772_v31 }
  0x54   :  { %615 = vmatpush.msra.mxu3 %v322_v33 }
  0x56   :  { %616 = vmatpush.msra.mxu3 %v321_v35 }
  0x58   :  { %617 = vmatpush.msra.mxu3 %v320_v37  ;;  %435 = vmatmul.f32.gmra.mxu2 %v290_v57 }
  0x5a   :  { %618 = vmatpush.msra.mxu3 %v319_v39 }
  0x5c   :  { %619 = vmatpush.msra.mxu3 %v318_v41 }
  0x5e   :  { %620 = vmatpush.msra.mxu3 %v317_v43 }
  0x60   :  { %621 = vmatpush.msra.mxu3 %v316_v46  ;;  %438 = vmatmul.f32.gmra.mxu2 %v291_v60 }
  0x61   :  { %212 = vmatmul.bf16.gmra.mxu0 %v570_v28 }
  0x68   :  { %441 = vmatmul.f32.gmra.mxu2 %v292_v63 }
  0x70   :  { %444 = vmatmul.f32.gmra.mxu2 %v293_v2 }
  0x71   :  { %217 = vmatmul.bf16.gmra.mxu0 %v571_v45 }
  0x78   :  { %447 = vmatmul.f32.gmra.mxu2 %v294_v5 }
  0x80   :  { %450 = vmatmul.f32.gmra.mxu2 %v295_v8 }
  0x9e   :  { %v193_v53 = vpop.f32.mrf.mxu0 }
  0x9f   :  { %352 = vmatmul.f32.vlgmr.msra.gmra.mxu1 %v193_v53 }
  0xa4   :  { %v223_v55 = vpop.f32.mrf.mxu3 }
  0xa5   :  { %388 = vmatmul.f32.vlgmr.msrb.gmra.mxu3 %v223_v55 }
  0xa6   :  { %v195_v56 = vpop.f32.mrf.mxu0 }
  0xa7   :  { %355 = vmatmul.f32.gmra.mxu1 %v195_v56 }
  0xab   :  { %v418_v16 = vpop.f32.mrf.mxu2 }
  0xac   :  { %v225_v58 = vpop.f32.mrf.mxu3 }
  0xad   :  { %391 = vmatmul.f32.gmra.mxu3 %v225_v58 }
  0xae   :  { %v198_v59 = vpop.f32.mrf.mxu0 }
  0xaf   :  { %358 = vmatmul.f32.gmra.mxu1 %v198_v59 }
  0xb3   :  { %v421_v17 = vpop.f32.mrf.mxu2 }
  0xb4   :  { %v228_v61 = vpop.f32.mrf.mxu3 }
  0xb5   :  { %394 = vmatmul.f32.gmra.mxu3 %v228_v61 }
  0xb6   :  { %v200_v62 = vpop.f32.mrf.mxu0 }
  0xb7   :  { %361 = vmatmul.f32.gmra.mxu1 %v200_v62 }
  0xbb   :  { %v424_v19 = vpop.f32.mrf.mxu2 }
  0xbc   :  { %v230_v0 = vpop.f32.mrf.mxu3 }
  0xbd   :  { %397 = vmatmul.f32.gmra.mxu3 %v230_v0 }
  0xbe   :  { %v203_v1 = vpop.f32.mrf.mxu0 }
  0xbf   :  { %364 = vmatmul.f32.gmra.mxu1 %v203_v1 }
  0xc3   :  { %v427_v25 = vpop.f32.mrf.mxu2 }
  0xc5   :  { %453 = vmatmul.f32.vlgmr.msra.gmra.mxu3 %v296_v3 }
  0xc6   :  { %v205_v4 = vpop.f32.mrf.mxu0 }
  0xc7   :  { %367 = vmatmul.f32.gmra.mxu1 %v205_v4 }
  0xcb   :  { %v430_v32 = vpop.f32.mrf.mxu2 }
  0xcd   :  { %456 = vmatmul.f32.gmra.mxu3 %v297_v6 }
  0xce   :  { %v208_v7 = vpop.f32.mrf.mxu0 }
  0xcf   :  { %370 = vmatmul.f32.gmra.mxu1 %v208_v7 }
  0xd3   :  { %v433_v40 = vpop.f32.mrf.mxu2 }
  0xd5   :  { %459 = vmatmul.f32.gmra.mxu3 %v298_v9 }
  0xd6   :  { %v210_v10 = vpop.f32.mrf.mxu0 }
  0xd7   :  { %373 = vmatmul.f32.gmra.mxu1 %v210_v10 }
  0xdb   :  { %v436_v47 = vpop.f32.mrf.mxu2 }
  0xdd   :  { %462 = vmatmul.f32.gmra.mxu3 %v299_v11 }
  0xde   :  { %v213_v12 = vpop.f32.mrf.mxu0 }
  0xdf   :  { %376 = vmatmul.f32.gmra.mxu1 %v213_v12 }
  0xe3   :  { %v439_v57 = vpop.f32.mrf.mxu2 }
  0xe6   :  { %v215_v13 = vpop.f32.mrf.mxu0 }
  0xe7   :  { %379 = vmatmul.f32.gmra.mxu1 %v215_v13 }
  0xeb   :  { %v442_v3 = vpop.f32.mrf.mxu2 }
  0xee   :  { %v218_v14 = vpop.f32.mrf.mxu0 }
  0xef   :  { %382 = vmatmul.f32.gmra.mxu1 %v218_v14 }
  0xf6   :  { %v220_v15 = vpop.f32.mrf.mxu0 }
  0xf7   :  { %385 = vmatmul.f32.gmra.mxu1 %v220_v15  ;;  %v445_v15 = vpop.f32.mrf.mxu2 }
 0x11c   :  { %v353_v20 = vpop.f32.mrf.mxu1 }
 0x11d   :  { %v354_v21 = vadd.f32 %v884_v18, %v353_v20 }
 0x11f   :  { %v419_v22 = vadd.f32 %v418_v16, %v354_v21 }
 0x121   :  { %v466_v23 = vmax.f32 %v419_v22, 0.0 }
 0x123   :  { %482 = vst [vmem:[%s955_s5] sm:$0xff] %v466_v23 }
 0x124   :  { %v356_v24 = vpop.f32.mrf.mxu1 }
 0x125   :  { %v357_v26 = vadd.f32 %v884_v18, %v356_v24  ;;  %v448_v24 = vpop.f32.mrf.mxu2 }
 0x127   :  { %v422_v27 = vadd.f32 %v421_v17, %v357_v26 }
 0x128   :  { %v389_v28 = vpop.f32.mrf.mxu3 }
 0x129   :  { %v467_v29 = vmax.f32 %v422_v27, 0.0  ;;  %v390_v50 = vadd.f32 %v884_v18, %v389_v28 }
 0x12b   :  { %483 = vst [vmem:[%s955_s5 + $0x8] sm:$0xff] %v467_v29 }
 0x12c   :  { %v359_v30 = vpop.f32.mrf.mxu1 }
 0x12d   :  { %v360_v31 = vadd.f32 %v884_v18, %v359_v30  ;;  %v451_v30 = vpop.f32.mrf.mxu2 }
 0x12f   :  { %v425_v33 = vadd.f32 %v424_v19, %v360_v31 }
 0x130   :  { %v392_v34 = vpop.f32.mrf.mxu3 }
 0x131   :  { %v468_v35 = vmax.f32 %v425_v33, 0.0  ;;  %v393_v59 = vadd.f32 %v884_v18, %v392_v34 }
 0x133   :  { %484 = vst [vmem:[%s955_s5 + $0x10] sm:$0xff] %v468_v35 }
 0x134   :  { %v362_v36 = vpop.f32.mrf.mxu1 }
 0x135   :  { %v363_v37 = vadd.f32 %v884_v18, %v362_v36 }
 0x137   :  { %v428_v38 = vadd.f32 %v427_v25, %v363_v37 }
 0x138   :  { %v395_v39 = vpop.f32.mrf.mxu3 }
 0x139   :  { %v469_v41 = vmax.f32 %v428_v38, 0.0  ;;  %v396_v4 = vadd.f32 %v884_v18, %v395_v39 }
 0x13b   :  { %485 = vst [vmem:[%s955_s5 + $0x18] sm:$0xff] %v469_v41 }
 0x13c   :  { %v365_v42 = vpop.f32.mrf.mxu1 }
 0x13d   :  { %v366_v43 = vadd.f32 %v884_v18, %v365_v42 }
 0x13f   :  { %v431_v44 = vadd.f32 %v430_v32, %v366_v43 }
 0x140   :  { %v398_v45 = vpop.f32.mrf.mxu3 }
 0x141   :  { %v470_v46 = vmax.f32 %v431_v44, 0.0  ;;  %v399_v12 = vadd.f32 %v884_v18, %v398_v45 }
 0x143   :  { %486 = vst [vmem:[%s955_s5 + $0x20] sm:$0xff] %v470_v46 }
 0x144   :  { %v368_v48 = vpop.f32.mrf.mxu1 }
 0x145   :  { %v369_v49 = vadd.f32 %v884_v18, %v368_v48 }
 0x147   :  { %v434_v51 = vadd.f32 %v433_v40, %v369_v49 }
 0x148   :  { %v454_v52 = vpop.f32.mrf.mxu3 }
 0x149   :  { %v471_v53 = vmax.f32 %v434_v51, 0.0  ;;  %v455_v54 = vadd.f32 %v454_v52, %v390_v50 }
 0x14b   :  { %487 = vst [vmem:[%s955_s5 + $0x28] sm:$0xff] %v471_v53  ;;  %v478_v55 = vmax.f32 %v455_v54, 0.0 }
 0x14c   :  { %v371_v56 = vpop.f32.mrf.mxu1 }
 0x14d   :  { %494 = vst [vmem:[%s955_s5 + $0x60] sm:$0xff] %v478_v55  ;;  %v372_v58 = vadd.f32 %v884_v18, %v371_v56 }
 0x14f   :  { %v437_v60 = vadd.f32 %v436_v47, %v372_v58 }
 0x150   :  { %v457_v61 = vpop.f32.mrf.mxu3 }
 0x151   :  { %v472_v62 = vmax.f32 %v437_v60, 0.0  ;;  %v458_v63 = vadd.f32 %v457_v61, %v393_v59 }
 0x153   :  { %488 = vst [vmem:[%s955_s5 + $0x30] sm:$0xff] %v472_v62  ;;  %v479_v0 = vmax.f32 %v458_v63, 0.0 }
 0x154   :  { %v374_v1 = vpop.f32.mrf.mxu1 }
 0x155   :  { %495 = vst [vmem:[%s955_s5 + $0x68] sm:$0xff] %v479_v0  ;;  %v375_v2 = vadd.f32 %v884_v18, %v374_v1 }
 0x157   :  { %v440_v5 = vadd.f32 %v439_v57, %v375_v2 }
 0x158   :  { %v460_v6 = vpop.f32.mrf.mxu3 }
 0x159   :  { %v473_v7 = vmax.f32 %v440_v5, 0.0  ;;  %v461_v8 = vadd.f32 %v460_v6, %v396_v4 }
 0x15b   :  { %489 = vst [vmem:[%s955_s5 + $0x38] sm:$0xff] %v473_v7  ;;  %v480_v9 = vmax.f32 %v461_v8, 0.0 }
 0x15c   :  { %v377_v10 = vpop.f32.mrf.mxu1 }
 0x15d   :  { %496 = vst [vmem:[%s955_s5 + $0x70] sm:$0xff] %v480_v9  ;;  %v378_v11 = vadd.f32 %v884_v18, %v377_v10 }
 0x15f   :  { %v443_v13 = vadd.f32 %v442_v3, %v378_v11 }
 0x160   :  { %v463_v14 = vpop.f32.mrf.mxu3 }
 0x161   :  { %v474_v16 = vmax.f32 %v443_v13, 0.0  ;;  %v464_v17 = vadd.f32 %v463_v14, %v399_v12 }
 0x163   :  { %490 = vst [vmem:[%s955_s5 + $0x40] sm:$0xff] %v474_v16  ;;  %v481_v19 = vmax.f32 %v464_v17, 0.0 }
 0x164   :  { %v380_v20 = vpop.f32.mrf.mxu1 }
 0x165   :  { %497 = vst [vmem:[%s955_s5 + $0x78] sm:$0xff] %v481_v19  ;;  %v381_v21 = vadd.f32 %v884_v18, %v380_v20 }
 0x167   :  { %v446_v22 = vadd.f32 %v445_v15, %v381_v21 }
 0x169   :  { %v475_v23 = vmax.f32 %v446_v22, 0.0 }
 0x16b   :  { %491 = vst [vmem:[%s955_s5 + $0x48] sm:$0xff] %v475_v23 }
 0x16c   :  { %v383_v25 = vpop.f32.mrf.mxu1 }
 0x16d   :  { %v384_v26 = vadd.f32 %v884_v18, %v383_v25 }
 0x16f   :  { %v449_v27 = vadd.f32 %v448_v24, %v384_v26 }
 0x171   :  { %v476_v28 = vmax.f32 %v449_v27, 0.0 }
 0x173   :  { %492 = vst [vmem:[%s955_s5 + $0x50] sm:$0xff] %v476_v28 }
 0x174   :  { %v386_v29 = vpop.f32.mrf.mxu1 }
 0x175   :  { %v387_v31 = vadd.f32 %v884_v18, %v386_v29 }
 0x177   :  { %v452_v32 = vadd.f32 %v451_v30, %v387_v31 }
 0x179   :  { %v477_v33 = vmax.f32 %v452_v32, 0.0 }
 0x17b   :  { %493 = vst [vmem:[%s955_s5 + $0x58] sm:$0xff] %v477_v33 }

// kernel: gcn_forward.6
= control target key start
LH: loop header
LB: loop body
LE: loop exit
PB: predicated region body
PF: predicated region fallthrough
CT: control target
= control target key end

     0   :  { %s2360_s1 = inlined_call_operand.vmem [shape: bf16[128,256], index: 1, kind: input, shape index: {}]   ;;  %s2361_s0 = inlined_call_operand.vmem [shape: bf16[128,128], index: 0, kind: input, shape index: {}]   ;;  %s2362_s3 = inlined_call_operand.vmem [shape: f32[512,256], index: 3, kind: input, shape index: {}]   ;;  %s2363_s2 = inlined_call_operand.vmem [shape: f32[128,256], index: 2, kind: input, shape index: {}]   ;;  %s2364_s4 = inlined_call_operand.vmem [shape: f32[1,256], index: 4, kind: input, shape index: {}]   ;;  %s2365_s5 = inlined_call_operand.vmem [shape: f32[128,256], index: 5, kind: output, shape index: {}]  }
   0x1   :  { %v1289_v0 = vld [vmem:[%s2360_s1 + $0x70] sm:$0xf]  ;;  %v1318_v1 = vld [vmem:[%s2360_s1 + $0x74] sm:$0xf0]  ;;  %v1317_v2 = vld [vmem:[%s2360_s1 + $0x74] sm:$0xf] }
   0x2   :  { %v1290_v3 = vor.u32 %v1318_v1, %v1289_v0  ;;  %v1291_v4 = vld [vmem:[%s2360_s1 + $0x78] sm:$0xf0]  ;;  %v1281_v5 = vld [vmem:[%s2360_s1 + $0x60] sm:$0xf]  ;;  %v1316_v6 = vld [vmem:[%s2360_s1 + $0x64] sm:$0xf0] }
   0x3   :  { %v1294_v7 = vor.u32 %v1317_v2, %v1291_v4  ;;  %v1315_v8 = vld [vmem:[%s2360_s1 + $0x64] sm:$0xf]  ;;  %v1283_v9 = vld [vmem:[%s2360_s1 + $0x68] sm:$0xf0]  ;;  %v1282_v10 = vor.u32 %v1316_v6, %v1281_v5  ;;  %v1273_v12 = vld [vmem:[%s2360_s1 + $0x50] sm:$0xf] }
   0x4   :  { %248 = vmatpush.bf16.msra.mxu0 %v1290_v3  ;;  %1319 = vmatpush.bf16.msra.mxu2 %v1290_v3  ;;  %v1286_v11 = vor.u32 %v1315_v8, %v1283_v9  ;;  %v1314_v13 = vld [vmem:[%s2360_s1 + $0x54] sm:$0xf0]  ;;  %v1313_v14 = vld [vmem:[%s2360_s1 + $0x54] sm:$0xf]  ;;  %v1275_v15 = vld [vmem:[%s2360_s1 + $0x58] sm:$0xf0] }
   0x5   :  { %297 = vmatpush.bf16.msra.mxu1 %v1294_v7  ;;  %1327 = vmatpush.bf16.msra.mxu3 %v1294_v7  ;;  %v1274_v16 = vor.u32 %v1314_v13, %v1273_v12  ;;  %v1278_v17 = vor.u32 %v1313_v14, %v1275_v15  ;;  %v1265_v18 = vld [vmem:[%s2360_s1 + $0x40] sm:$0xf]  ;;  %v1312_v19 = vld [vmem:[%s2360_s1 + $0x44] sm:$0xf0]  ;;  %v1311_v20 = vld [vmem:[%s2360_s1 + $0x44] sm:$0xf] }
   0x6   :  { %v1267_v21 = vld [vmem:[%s2360_s1 + $0x48] sm:$0xf0]  ;;  %v1266_v22 = vor.u32 %v1312_v19, %v1265_v18  ;;  %v1257_v24 = vld [vmem:[%s2360_s1 + $0x30] sm:$0xf]  ;;  %v1310_v25 = vld [vmem:[%s2360_s1 + $0x34] sm:$0xf0] }
   0x7   :  { %v1270_v23 = vor.u32 %v1311_v20, %v1267_v21  ;;  %v1309_v26 = vld [vmem:[%s2360_s1 + $0x34] sm:$0xf]  ;;  %v1259_v27 = vld [vmem:[%s2360_s1 + $0x38] sm:$0xf0]  ;;  %v1258_v28 = vor.u32 %v1310_v25, %v1257_v24  ;;  %v1249_v30 = vld [vmem:[%s2360_s1 + $0x20] sm:$0xf] }
   0x8   :  { %249 = vmatpush.bf16.msra.mxu0 %v1282_v10  ;;  %1320 = vmatpush.bf16.msra.mxu2 %v1282_v10  ;;  %v1262_v29 = vor.u32 %v1309_v26, %v1259_v27  ;;  %v1308_v31 = vld [vmem:[%s2360_s1 + $0x24] sm:$0xf0]  ;;  %v1307_v32 = vld [vmem:[%s2360_s1 + $0x24] sm:$0xf]  ;;  %v1251_v33 = vld [vmem:[%s2360_s1 + $0x28] sm:$0xf0] }
   0x9   :  { %298 = vmatpush.bf16.msra.mxu1 %v1286_v11  ;;  %1328 = vmatpush.bf16.msra.mxu3 %v1286_v11  ;;  %v1250_v34 = vor.u32 %v1308_v31, %v1249_v30  ;;  %v1254_v35 = vor.u32 %v1307_v32, %v1251_v33  ;;  %v1241_v36 = vld [vmem:[%s2360_s1 + $0x10] sm:$0xf]  ;;  %v1306_v37 = vld [vmem:[%s2360_s1 + $0x14] sm:$0xf0]  ;;  %v1305_v38 = vld [vmem:[%s2360_s1 + $0x14] sm:$0xf] }
   0xa   :  { %v1243_v39 = vld [vmem:[%s2360_s1 + $0x18] sm:$0xf0]  ;;  %v1242_v40 = vor.u32 %v1306_v37, %v1241_v36  ;;  %v1233_v42 = vld [vmem:[%s2360_s1] sm:$0xf]  ;;  %v1304_v43 = vld [vmem:[%s2360_s1 + $0x4] sm:$0xf0] }
   0xb   :  { %v1246_v41 = vor.u32 %v1305_v38, %v1243_v39  ;;  %v1303_v44 = vld [vmem:[%s2360_s1 + $0x4] sm:$0xf]  ;;  %v1235_v45 = vld [vmem:[%s2360_s1 + $0x8] sm:$0xf0]  ;;  %v1234_v46 = vor.u32 %v1304_v43, %v1233_v42  ;;  %v507_v51 = vld [vmem:[%s2362_s3 + $0xf0] sm:$0xff] }
   0xc   :  { %250 = vmatpush.bf16.msra.mxu0 %v1274_v16  ;;  %1321 = vmatpush.bf16.msra.mxu2 %v1274_v16  ;;  %v1238_v47 = vor.u32 %v1303_v44, %v1235_v45  ;;  %v1295_v48 = vld [vmem:[%s2361_s0] sm:$0xff]  ;;  %v1296_v49 = vld [vmem:[%s2361_s0 + $0x8] sm:$0xff]  ;;  %v539_v52 = vld [vmem:[%s2362_s3 + $0x1f0] sm:$0xff] }
   0xd   :  { %299 = vmatpush.bf16.msra.mxu1 %v1278_v17  ;;  %1329 = vmatpush.bf16.msra.mxu3 %v1278_v17  ;;  %v1299_v50 = vld [vmem:[%s2361_s0 + $0x20] sm:$0xff]  ;;  %v503_v55 = vld [vmem:[%s2362_s3 + $0xd0] sm:$0xff]  ;;  %v1300_v16 = vld [vmem:[%s2361_s0 + $0x28] sm:$0xff] }
   0xe   :  { %v505_v53 = vld [vmem:[%s2362_s3 + $0xe0] sm:$0xff]  ;;  %v535_v56 = vld [vmem:[%s2362_s3 + $0x1d0] sm:$0xff] }
   0xf   :  { %v537_v54 = vld [vmem:[%s2362_s3 + $0x1e0] sm:$0xff]  ;;  %v571_v57 = vld [vmem:[%s2362_s3 + $0x2f0] sm:$0xff] }
  0x10   :  { %251 = vmatpush.bf16.msra.mxu0 %v1266_v22  ;;  %1322 = vmatpush.bf16.msra.mxu2 %v1266_v22  ;;  %v501_v58 = vld [vmem:[%s2362_s3 + $0xc0] sm:$0xff]  ;;  %v603_v59 = vld [vmem:[%s2362_s3 + $0x3f0] sm:$0xff] }
  0x11   :  { %300 = vmatpush.bf16.msra.mxu1 %v1270_v23  ;;  %1330 = vmatpush.bf16.msra.mxu3 %v1270_v23  ;;  %v533_v60 = vld [vmem:[%s2362_s3 + $0x1c0] sm:$0xff]  ;;  %v567_v63 = vld [vmem:[%s2362_s3 + $0x2d0] sm:$0xff] }
  0x12   :  { %v569_v61 = vld [vmem:[%s2362_s3 + $0x2e0] sm:$0xff]  ;;  %v499_v0 = vld [vmem:[%s2362_s3 + $0xb0] sm:$0xff] }
  0x13   :  { %v601_v62 = vld [vmem:[%s2362_s3 + $0x3e0] sm:$0xff]  ;;  %v531_v1 = vld [vmem:[%s2362_s3 + $0x1b0] sm:$0xff] }
  0x14   :  { %252 = vmatpush.bf16.msra.mxu0 %v1258_v28  ;;  %1323 = vmatpush.bf16.msra.mxu2 %v1258_v28  ;;  %v599_v2 = vld [vmem:[%s2362_s3 + $0x3d0] sm:$0xff]  ;;  %v565_v3 = vld [vmem:[%s2362_s3 + $0x2c0] sm:$0xff] }
  0x15   :  { %301 = vmatpush.bf16.msra.mxu1 %v1262_v29  ;;  %1331 = vmatpush.bf16.msra.mxu3 %v1262_v29  ;;  %v597_v4 = vld [vmem:[%s2362_s3 + $0x3c0] sm:$0xff]  ;;  %v563_v7 = vld [vmem:[%s2362_s3 + $0x2b0] sm:$0xff] }
  0x16   :  { %v497_v5 = vld [vmem:[%s2362_s3 + $0xa0] sm:$0xff]  ;;  %v595_v8 = vld [vmem:[%s2362_s3 + $0x3b0] sm:$0xff] }
  0x17   :  { %v529_v6 = vld [vmem:[%s2362_s3 + $0x1a0] sm:$0xff]  ;;  %v495_v9 = vld [vmem:[%s2362_s3 + $0x90] sm:$0xff] }
  0x18   :  { %253 = vmatpush.bf16.msra.mxu0 %v1250_v34  ;;  %1324 = vmatpush.bf16.msra.mxu2 %v1250_v34  ;;  %v527_v10 = vld [vmem:[%s2362_s3 + $0x190] sm:$0xff]  ;;  %v561_v12 = vld [vmem:[%s2362_s3 + $0x2a0] sm:$0xff] }
  0x19   :  { %302 = vmatpush.bf16.msra.mxu1 %v1254_v35  ;;  %1332 = vmatpush.bf16.msra.mxu3 %v1254_v35  ;;  %v1297_v11 = vld [vmem:[%s2361_s0 + $0x10] sm:$0xff]  ;;  %v593_v13 = vld [vmem:[%s2362_s3 + $0x3a0] sm:$0xff] }
  0x1a   :  { %v493_v14 = vld [vmem:[%s2362_s3 + $0x80] sm:$0xff]  ;;  %v491_v17 = vld [vmem:[%s2362_s3 + $0x70] sm:$0xff] }
  0x1b   :  { %v525_v15 = vld [vmem:[%s2362_s3 + $0x180] sm:$0xff]  ;;  %v559_v18 = vld [vmem:[%s2362_s3 + $0x290] sm:$0xff] }
  0x1c   :  { %254 = vmatpush.bf16.msra.mxu0 %v1242_v40  ;;  %1325 = vmatpush.bf16.msra.mxu2 %v1242_v40  ;;  %v523_v19 = vld [vmem:[%s2362_s3 + $0x170] sm:$0xff]  ;;  %v489_v20 = vld [vmem:[%s2362_s3 + $0x60] sm:$0xff] }
  0x1d   :  { %303 = vmatpush.bf16.msra.mxu1 %v1246_v41  ;;  %1333 = vmatpush.bf16.msra.mxu3 %v1246_v41  ;;  %v591_v21 = vld [vmem:[%s2362_s3 + $0x390] sm:$0xff]  ;;  %v521_v22 = vld [vmem:[%s2362_s3 + $0x160] sm:$0xff]  ;;  %v1298_v41 = vld [vmem:[%s2361_s0 + $0x18] sm:$0xff] }
  0x1e   :  { %v557_v23 = vld [vmem:[%s2362_s3 + $0x280] sm:$0xff]  ;;  %v487_v24 = vld [vmem:[%s2362_s3 + $0x50] sm:$0xff] }
  0x1f   :  { %v589_v25 = vld [vmem:[%s2362_s3 + $0x380] sm:$0xff]  ;;  %v519_v26 = vld [vmem:[%s2362_s3 + $0x150] sm:$0xff] }
  0x20   :  { %255 = vmatpush.bf16.msra.mxu0 %v1234_v46  ;;  %1326 = vmatpush.bf16.msra.mxu2 %v1234_v46  ;;  %v555_v27 = vld [vmem:[%s2362_s3 + $0x270] sm:$0xff]  ;;  %v485_v28 = vld [vmem:[%s2362_s3 + $0x40] sm:$0xff] }
  0x21   :  { %304 = vmatpush.bf16.msra.mxu1 %v1238_v47  ;;  %1334 = vmatpush.bf16.msra.mxu3 %v1238_v47  ;;  %v587_v29 = vld [vmem:[%s2362_s3 + $0x370] sm:$0xff]  ;;  %v553_v30 = vld [vmem:[%s2362_s3 + $0x260] sm:$0xff] }
  0x22   :  { %v517_v31 = vld [vmem:[%s2362_s3 + $0x140] sm:$0xff]  ;;  %v483_v32 = vld [vmem:[%s2362_s3 + $0x30] sm:$0xff] }
  0x23   :  { %256 = vmatmul.bf16.vlgmr.msra.gmra.mxu0 %v1295_v48  ;;  %276 = vmatmul.bf16.vlgmr.msra.gmra.mxu2 %v1299_v50  ;;  %v585_v33 = vld [vmem:[%s2362_s3 + $0x360] sm:$0xff]  ;;  %v551_v34 = vld [vmem:[%s2362_s3 + $0x250] sm:$0xff] }
  0x24   :  { %305 = vmatmul.bf16.vlgmr.msra.gmra.mxu1 %v1295_v48  ;;  %611 = vmatpush.msrb.mxu2 %v507_v51  ;;  %v515_v35 = vld [vmem:[%s2362_s3 + $0x130] sm:$0xff]  ;;  %v481_v36 = vld [vmem:[%s2362_s3 + $0x20] sm:$0xff] }
  0x25   :  { %676 = vmatpush.msrb.mxu3 %v539_v52  ;;  %741 = vmatpush.msrb.mxu0 %v571_v57  ;;  %v583_v37 = vld [vmem:[%s2362_s3 + $0x350] sm:$0xff]  ;;  %v549_v38 = vld [vmem:[%s2362_s3 + $0x240] sm:$0xff]  ;;  %v508_v52 = vld [vmem:[%s2362_s3 + $0xf8] sm:$0xff] }
  0x26   :  { %325 = vmatmul.bf16.vlgmr.msra.gmra.mxu3 %v1299_v50  ;;  %612 = vmatpush.msrb.mxu2 %v505_v53  ;;  %v513_v39 = vld [vmem:[%s2362_s3 + $0x120] sm:$0xff]  ;;  %v479_v40 = vld [vmem:[%s2362_s3 + $0x10] sm:$0xff]  ;;  %v1302_v50 = vld [vmem:[%s2361_s0 + $0x38] sm:$0xff] }
  0x27   :  { %677 = vmatpush.msrb.mxu3 %v537_v54  ;;  %806 = vmatpush.msrb.mxu1 %v603_v59  ;;  %v581_v42 = vld [vmem:[%s2362_s3 + $0x340] sm:$0xff]  ;;  %v547_v43 = vld [vmem:[%s2362_s3 + $0x230] sm:$0xff]  ;;  %v540_v54 = vld [vmem:[%s2362_s3 + $0x1f8] sm:$0xff] }
  0x28   :  { %613 = vmatpush.msrb.mxu2 %v503_v55  ;;  %742 = vmatpush.msrb.mxu0 %v569_v61  ;;  %v511_v44 = vld [vmem:[%s2362_s3 + $0x110] sm:$0xff]  ;;  %v477_v45 = vld [vmem:[%s2362_s3] sm:$0xff]  ;;  %v572_v61 = vld [vmem:[%s2362_s3 + $0x2f8] sm:$0xff] }
  0x29   :  { %678 = vmatpush.msrb.mxu3 %v535_v56  ;;  %807 = vmatpush.msrb.mxu1 %v601_v62  ;;  %v1301_v46 = vld [vmem:[%s2361_s0 + $0x30] sm:$0xff]  ;;  %v509_v48 = vld [vmem:[%s2362_s3 + $0x100] sm:$0xff]  ;;  %v1700_v62 = vld [vmem:[%s2363_s2 + $0x8] sm:$0xff] }
  0x2a   :  { %614 = vmatpush.msrb.mxu2 %v501_v58  ;;  %743 = vmatpush.msrb.mxu0 %v567_v63  ;;  %v579_v47 = vld [vmem:[%s2362_s3 + $0x330] sm:$0xff]  ;;  %v577_v51 = vld [vmem:[%s2362_s3 + $0x320] sm:$0xff]  ;;  %v506_v58 = vld [vmem:[%s2362_s3 + $0xe8] sm:$0xff] }
  0x2b   :  { %679 = vmatpush.msrb.mxu3 %v533_v60  ;;  %808 = vmatpush.msrb.mxu1 %v599_v2  ;;  %v543_v53 = vld [vmem:[%s2362_s3 + $0x210] sm:$0xff]  ;;  %v541_v56 = vld [vmem:[%s2362_s3 + $0x200] sm:$0xff]  ;;  %v538_v60 = vld [vmem:[%s2362_s3 + $0x1e8] sm:$0xff] }
  0x2c   :  { %615 = vmatpush.msrb.mxu2 %v499_v0  ;;  %744 = vmatpush.msrb.mxu0 %v565_v3  ;;  %v575_v55 = vld [vmem:[%s2362_s3 + $0x310] sm:$0xff]  ;;  %v573_v57 = vld [vmem:[%s2362_s3 + $0x300] sm:$0xff]  ;;  %v604_v63 = vld [vmem:[%s2362_s3 + $0x3f8] sm:$0xff] }
  0x2d   :  { %680 = vmatpush.msrb.mxu3 %v531_v1  ;;  %809 = vmatpush.msrb.mxu1 %v597_v4  ;;  %v1689_v59 = vld [vmem:[%s2363_s2] sm:$0xff]  ;;  %v504_v0 = vld [vmem:[%s2362_s3 + $0xd8] sm:$0xff]  ;;  %v1713_v1 = vld [vmem:[%s2363_s2 + $0x10] sm:$0xff] }
  0x2e   :  { %616 = vmatpush.msrb.mxu2 %v497_v5  ;;  %745 = vmatpush.msrb.mxu0 %v563_v7  ;;  %v536_v2 = vld [vmem:[%s2362_s3 + $0x1d8] sm:$0xff]  ;;  %v570_v3 = vld [vmem:[%s2362_s3 + $0x2e8] sm:$0xff]  ;;  %v1737_v7 = vld [vmem:[%s2363_s2 + $0x20] sm:$0xff] }
  0x2f   :  { %681 = vmatpush.msrb.mxu3 %v529_v6  ;;  %810 = vmatpush.msrb.mxu1 %v595_v8  ;;  %v1724_v4 = vld [vmem:[%s2363_s2 + $0x18] sm:$0xff]  ;;  %v602_v5 = vld [vmem:[%s2362_s3 + $0x3e8] sm:$0xff] }
  0x30   :  { %617 = vmatpush.msrb.mxu2 %v495_v9  ;;  %746 = vmatpush.msrb.mxu0 %v561_v12  ;;  %v502_v6 = vld [vmem:[%s2362_s3 + $0xc8] sm:$0xff]  ;;  %v568_v9 = vld [vmem:[%s2362_s3 + $0x2d8] sm:$0xff] }
  0x31   :  { %682 = vmatpush.msrb.mxu3 %v527_v10  ;;  %811 = vmatpush.msrb.mxu1 %v593_v13  ;;  %v534_v8 = vld [vmem:[%s2362_s3 + $0x1c8] sm:$0xff] }
  0x32   :  { %618 = vmatpush.msrb.mxu2 %v493_v14  ;;  %747 = vmatpush.msrb.mxu0 %v559_v18  ;;  %v1748_v10 = vld [vmem:[%s2363_s2 + $0x28] sm:$0xff]  ;;  %v500_v14 = vld [vmem:[%s2362_s3 + $0xb8] sm:$0xff] }
  0x33   :  { %261 = vmatmul.bf16.gmra.mxu0 %v1296_v49  ;;  %683 = vmatpush.msrb.mxu3 %v525_v15  ;;  %v1767_v15 = vld [vmem:[%s2363_s2 + $0x30] sm:$0xff]  ;;  %v1778_v18 = vld [vmem:[%s2363_s2 + $0x38] sm:$0xff] }
  0x34   :  { %310 = vmatmul.bf16.gmra.mxu1 %v1296_v49  ;;  %619 = vmatpush.msrb.mxu2 %v491_v17  ;;  %v545_v49 = vld [vmem:[%s2362_s3 + $0x220] sm:$0xff]  ;;  %v566_v17 = vld [vmem:[%s2362_s3 + $0x2c8] sm:$0xff] }
  0x35   :  { %281 = vmatmul.bf16.gmra.mxu2 %v1300_v16  ;;  %684 = vmatpush.msrb.mxu3 %v523_v19  ;;  %v598_v19 = vld [vmem:[%s2362_s3 + $0x3c8] sm:$0xff] }
  0x36   :  { %330 = vmatmul.bf16.gmra.mxu3 %v1300_v16  ;;  %620 = vmatpush.msrb.mxu2 %v489_v20  ;;  %v532_v16 = vld [vmem:[%s2362_s3 + $0x1b8] sm:$0xff] }
  0x37   :  { %812 = vmatpush.msrb.mxu1 %v591_v21  ;;  %748 = vmatpush.msrb.mxu0 %v557_v23  ;;  %v1797_v23 = vld [vmem:[%s2363_s2 + $0x40] sm:$0xff] }
  0x38   :  { %685 = vmatpush.msrb.mxu3 %v521_v22  ;;  %621 = vmatpush.msrb.mxu2 %v487_v24  ;;  %v498_v22 = vld [vmem:[%s2362_s3 + $0xa8] sm:$0xff] }
  0x39   :  { %813 = vmatpush.msrb.mxu1 %v589_v25  ;;  %749 = vmatpush.msrb.mxu0 %v555_v27  ;;  %v530_v24 = vld [vmem:[%s2362_s3 + $0x1a8] sm:$0xff]  ;;  %v564_v25 = vld [vmem:[%s2362_s3 + $0x2b8] sm:$0xff] }
  0x3a   :  { %686 = vmatpush.msrb.mxu3 %v519_v26  ;;  %622 = vmatpush.msrb.mxu2 %v485_v28  ;;  %v1808_v26 = vld [vmem:[%s2363_s2 + $0x48] sm:$0xff]  ;;  %v596_v27 = vld [vmem:[%s2362_s3 + $0x3b8] sm:$0xff] }
  0x3b   :  { %814 = vmatpush.msrb.mxu1 %v587_v29  ;;  %750 = vmatpush.msrb.mxu0 %v553_v30  ;;  %v496_v30 = vld [vmem:[%s2362_s3 + $0x98] sm:$0xff] }
  0x3c   :  { %687 = vmatpush.msrb.mxu3 %v517_v31  ;;  %623 = vmatpush.msrb.mxu2 %v483_v32  ;;  %v1827_v31 = vld [vmem:[%s2363_s2 + $0x50] sm:$0xff]  ;;  %v528_v32 = vld [vmem:[%s2362_s3 + $0x198] sm:$0xff] }
  0x3d   :  { %815 = vmatpush.msrb.mxu1 %v585_v33  ;;  %751 = vmatpush.msrb.mxu0 %v551_v34  ;;  %v562_v33 = vld [vmem:[%s2362_s3 + $0x2a8] sm:$0xff]  ;;  %v1838_v34 = vld [vmem:[%s2363_s2 + $0x58] sm:$0xff] }
  0x3e   :  { %688 = vmatpush.msrb.mxu3 %v515_v35  ;;  %624 = vmatpush.msrb.mxu2 %v481_v36  ;;  %v594_v35 = vld [vmem:[%s2362_s3 + $0x3a8] sm:$0xff] }
  0x3f   :  { %816 = vmatpush.msrb.mxu1 %v583_v37  ;;  %752 = vmatpush.msrb.mxu0 %v549_v38  ;;  %v494_v38 = vld [vmem:[%s2362_s3 + $0x88] sm:$0xff] }
  0x40   :  { %689 = vmatpush.msrb.mxu3 %v513_v39  ;;  %625 = vmatpush.msrb.mxu2 %v479_v40  ;;  %v1857_v39 = vld [vmem:[%s2363_s2 + $0x60] sm:$0xff]  ;;  %v526_v40 = vld [vmem:[%s2362_s3 + $0x188] sm:$0xff] }
  0x41   :  { %817 = vmatpush.msrb.mxu1 %v581_v42  ;;  %753 = vmatpush.msrb.mxu0 %v547_v43  ;;  %v1868_v42 = vld [vmem:[%s2363_s2 + $0x68] sm:$0xff]  ;;  %v592_v43 = vld [vmem:[%s2362_s3 + $0x398] sm:$0xff] }
  0x42   :  { %690 = vmatpush.msrb.mxu3 %v511_v44  ;;  %626 = vmatpush.msrb.mxu2 %v477_v45 }
  0x43   :  { %266 = vmatmul.bf16.gmra.mxu0 %v1297_v11  ;;  %818 = vmatpush.msrb.mxu1 %v579_v47  ;;  %v1887_v47 = vld [vmem:[%s2363_s2 + $0x70] sm:$0xff] }
  0x44   :  { %315 = vmatmul.bf16.gmra.mxu1 %v1297_v11  ;;  %691 = vmatpush.msrb.mxu3 %v509_v48  ;;  %v600_v11 = vld [vmem:[%s2362_s3 + $0x3d8] sm:$0xff] }
  0x45   :  { %286 = vmatmul.bf16.gmra.mxu2 %v1301_v46  ;;  %754 = vmatpush.msrb.mxu0 %v545_v49  ;;  %v524_v48 = vld [vmem:[%s2362_s3 + $0x178] sm:$0xff]  ;;  %v558_v49 = vld [vmem:[%s2362_s3 + $0x288] sm:$0xff] }
  0x46   :  { %335 = vmatmul.bf16.gmra.mxu3 %v1301_v46  ;;  %819 = vmatpush.msrb.mxu1 %v577_v51  ;;  %v492_v46 = vld [vmem:[%s2362_s3 + $0x78] sm:$0xff]  ;;  %v590_v51 = vld [vmem:[%s2362_s3 + $0x388] sm:$0xff] }
  0x47   :  { %871 = vmatpush.msra.mxu2 %v508_v52  ;;  %755 = vmatpush.msrb.mxu0 %v543_v53 }
  0x48   :  { %936 = vmatpush.msra.mxu3 %v540_v54  ;;  %820 = vmatpush.msrb.mxu1 %v575_v55  ;;  %v490_v54 = vld [vmem:[%s2362_s3 + $0x68] sm:$0xff]  ;;  %v1917_v55 = vld [vmem:[%s2363_s2 + $0x80] sm:$0xff] }
  0x49   :  { %756 = vmatpush.msrb.mxu0 %v541_v56  ;;  %872 = vmatpush.msra.mxu2 %v506_v58  ;;  %v522_v56 = vld [vmem:[%s2362_s3 + $0x168] sm:$0xff] }
  0x4a   :  { %821 = vmatpush.msrb.mxu1 %v573_v57  ;;  %937 = vmatpush.msra.mxu3 %v538_v60  ;;  %v556_v57 = vld [vmem:[%s2362_s3 + $0x278] sm:$0xff]  ;;  %v1928_v58 = vld [vmem:[%s2363_s2 + $0x88] sm:$0xff] }
  0x4b   :  { %1001 = vmatpush.msra.mxu0 %v572_v61  ;;  %873 = vmatpush.msra.mxu2 %v504_v0  ;;  %v588_v60 = vld [vmem:[%s2362_s3 + $0x378] sm:$0xff] }
  0x4c   :  { %1066 = vmatpush.msra.mxu1 %v604_v63  ;;  %938 = vmatpush.msra.mxu3 %v536_v2  ;;  %v488_v2 = vld [vmem:[%s2362_s3 + $0x58] sm:$0xff] }
  0x4d   :  { %1002 = vmatpush.msra.mxu0 %v570_v3  ;;  %874 = vmatpush.msra.mxu2 %v502_v6  ;;  %v1949_v3 = vld [vmem:[%s2363_s2 + $0x90] sm:$0xff] }
  0x4e   :  { %1067 = vmatpush.msra.mxu1 %v602_v5  ;;  %939 = vmatpush.msra.mxu3 %v534_v8  ;;  %v520_v5 = vld [vmem:[%s2362_s3 + $0x158] sm:$0xff]  ;;  %v554_v8 = vld [vmem:[%s2362_s3 + $0x268] sm:$0xff] }
  0x4f   :  { %1003 = vmatpush.msra.mxu0 %v568_v9  ;;  %875 = vmatpush.msra.mxu2 %v500_v14  ;;  %v1962_v9 = vld [vmem:[%s2363_s2 + $0x98] sm:$0xff] }
  0x50   :  { %1068 = vmatpush.msra.mxu1 %v600_v11  ;;  %940 = vmatpush.msra.mxu3 %v532_v16  ;;  %v586_v11 = vld [vmem:[%s2362_s3 + $0x368] sm:$0xff] }
  0x51   :  { %1004 = vmatpush.msra.mxu0 %v566_v17  ;;  %876 = vmatpush.msra.mxu2 %v498_v22  ;;  %v486_v17 = vld [vmem:[%s2362_s3 + $0x48] sm:$0xff] }
  0x52   :  { %1069 = vmatpush.msra.mxu1 %v598_v19  ;;  %941 = vmatpush.msra.mxu3 %v530_v24  ;;  %v1981_v19 = vld [vmem:[%s2363_s2 + $0xa0] sm:$0xff]  ;;  %v518_v22 = vld [vmem:[%s2362_s3 + $0x148] sm:$0xff]  ;;  %v552_v24 = vld [vmem:[%s2362_s3 + $0x258] sm:$0xff] }
  0x53   :  { %271 = vmatmul.bf16.gmra.mxu0 %v1298_v41  ;;  %877 = vmatpush.msra.mxu2 %v496_v30 }
  0x54   :  { %320 = vmatmul.bf16.gmra.mxu1 %v1298_v41  ;;  %1005 = vmatpush.msra.mxu0 %v564_v25  ;;  %v560_v41 = vld [vmem:[%s2362_s3 + $0x298] sm:$0xff]  ;;  %v1992_v25 = vld [vmem:[%s2363_s2 + $0xa8] sm:$0xff] }
  0x55   :  { %291 = vmatmul.bf16.gmra.mxu2 %v1302_v50  ;;  %1070 = vmatpush.msra.mxu1 %v596_v27  ;;  %v584_v27 = vld [vmem:[%s2362_s3 + $0x358] sm:$0xff] }
  0x56   :  { %340 = vmatmul.bf16.gmra.mxu3 %v1302_v50  ;;  %1006 = vmatpush.msra.mxu0 %v562_v33  ;;  %v1898_v50 = vld [vmem:[%s2363_s2 + $0x78] sm:$0xff] }
  0x57   :  { %942 = vmatpush.msra.mxu3 %v528_v32  ;;  %1071 = vmatpush.msra.mxu1 %v594_v35  ;;  %v484_v33 = vld [vmem:[%s2362_s3 + $0x38] sm:$0xff]  ;;  %v2011_v35 = vld [vmem:[%s2363_s2 + $0xb0] sm:$0xff] }
  0x58   :  { %878 = vmatpush.msra.mxu2 %v494_v38  ;;  %1007 = vmatpush.msra.mxu0 %v560_v41  ;;  %v516_v38 = vld [vmem:[%s2362_s3 + $0x138] sm:$0xff] }
  0x59   :  { %943 = vmatpush.msra.mxu3 %v526_v40  ;;  %1072 = vmatpush.msra.mxu1 %v592_v43  ;;  %v550_v40 = vld [vmem:[%s2362_s3 + $0x248] sm:$0xff]  ;;  %v2022_v41 = vld [vmem:[%s2363_s2 + $0xb8] sm:$0xff] }
  0x5a   :  { %879 = vmatpush.msra.mxu2 %v492_v46  ;;  %1008 = vmatpush.msra.mxu0 %v558_v49  ;;  %v582_v43 = vld [vmem:[%s2362_s3 + $0x348] sm:$0xff] }
  0x5b   :  { %944 = vmatpush.msra.mxu3 %v524_v48  ;;  %1073 = vmatpush.msra.mxu1 %v590_v51  ;;  %v482_v49 = vld [vmem:[%s2362_s3 + $0x28] sm:$0xff]  ;;  %v2041_v51 = vld [vmem:[%s2363_s2 + $0xc0] sm:$0xff] }
  0x5c   :  { %880 = vmatpush.msra.mxu2 %v490_v54  ;;  %1009 = vmatpush.msra.mxu0 %v556_v57  ;;  %v514_v54 = vld [vmem:[%s2362_s3 + $0x128] sm:$0xff] }
  0x5d   :  { %945 = vmatpush.msra.mxu3 %v522_v56  ;;  %1074 = vmatpush.msra.mxu1 %v588_v60  ;;  %v548_v56 = vld [vmem:[%s2362_s3 + $0x238] sm:$0xff]  ;;  %v2052_v57 = vld [vmem:[%s2363_s2 + $0xc8] sm:$0xff] }
  0x5e   :  { %881 = vmatpush.msra.mxu2 %v488_v2  ;;  %1010 = vmatpush.msra.mxu0 %v554_v8  ;;  %v580_v60 = vld [vmem:[%s2362_s3 + $0x338] sm:$0xff] }
  0x5f   :  { %946 = vmatpush.msra.mxu3 %v520_v5  ;;  %1075 = vmatpush.msra.mxu1 %v586_v11  ;;  %v480_v8 = vld [vmem:[%s2362_s3 + $0x18] sm:$0xff]  ;;  %v2071_v11 = vld [vmem:[%s2363_s2 + $0xd0] sm:$0xff] }
  0x60   :  { %882 = vmatpush.msra.mxu2 %v486_v17  ;;  %1011 = vmatpush.msra.mxu0 %v552_v24  ;;  %v512_v17 = vld [vmem:[%s2362_s3 + $0x118] sm:$0xff] }
  0x61   :  { %947 = vmatpush.msra.mxu3 %v518_v22  ;;  %1076 = vmatpush.msra.mxu1 %v584_v27  ;;  %v546_v22 = vld [vmem:[%s2362_s3 + $0x228] sm:$0xff]  ;;  %v2082_v24 = vld [vmem:[%s2363_s2 + $0xd8] sm:$0xff] }
  0x62   :  { %883 = vmatpush.msra.mxu2 %v484_v33  ;;  %1012 = vmatpush.msra.mxu0 %v550_v40  ;;  %v578_v27 = vld [vmem:[%s2362_s3 + $0x328] sm:$0xff]  ;;  %v2099_v40 = vld [vmem:[%s2363_s2 + $0xe0] sm:$0xff] }
  0x63   :  { %757 = vmatmul.f32.vlgmr.msrb.gmra.mxu0 %v1689_v59  ;;  %948 = vmatpush.msra.mxu3 %v516_v38  ;;  %v478_v38 = vld [vmem:[%s2362_s3 + $0x8] sm:$0xff]  ;;  %2380 = vst [vmem:[#allocation4_spill] sm:$0xff] %v2099_v40 }
  0x64   :  { %822 = vmatmul.f32.vlgmr.msrb.gmra.mxu1 %v1700_v62  ;;  %884 = vmatpush.msra.mxu2 %v482_v49 }
  0x65   :  { %1077 = vmatpush.msra.mxu1 %v582_v43  ;;  %949 = vmatpush.msra.mxu3 %v514_v54  ;;  %v510_v43 = vld [vmem:[%s2362_s3 + $0x108] sm:$0xff]  ;;  %v544_v54 = vld [vmem:[%s2362_s3 + $0x218] sm:$0xff] }
  0x66   :  { %1013 = vmatpush.msra.mxu0 %v548_v56  ;;  %885 = vmatpush.msra.mxu2 %v480_v8  ;;  %v2112_v56 = vld [vmem:[%s2363_s2 + $0xe8] sm:$0xff]  ;;  %v2124_v8 = vld [vmem:[%s2363_s2 + $0xf0] sm:$0xff] }
  0x67   :  { %1078 = vmatpush.msra.mxu1 %v580_v60  ;;  %950 = vmatpush.msra.mxu3 %v512_v17  ;;  %2382 = vst [vmem:[#allocation6_spill] sm:$0xff] %v2112_v56  ;;  %v576_v60 = vld [vmem:[%s2362_s3 + $0x318] sm:$0xff]  ;;  %v542_v17 = vld [vmem:[%s2362_s3 + $0x208] sm:$0xff] }
  0x68   :  { %1014 = vmatpush.msra.mxu0 %v546_v22  ;;  %886 = vmatpush.msra.mxu2 %v478_v38  ;;  %2383 = vst [vmem:[#allocation7_spill] sm:$0xff] %v2124_v8  ;;  %v2137_v38 = vld [vmem:[%s2363_s2 + $0xf8] sm:$0xff] }
  0x69   :  { %1079 = vmatpush.msra.mxu1 %v578_v27  ;;  %951 = vmatpush.msra.mxu3 %v510_v43  ;;  %2386 = vst [vmem:[#allocation10_spill] sm:$0xff] %v2137_v38  ;;  %v574_v43 = vld [vmem:[%s2362_s3 + $0x308] sm:$0xff] }
  0x6a   :  { %1015 = vmatpush.msra.mxu0 %v544_v54 }
  0x6b   :  { %760 = vmatmul.f32.gmra.mxu0 %v1713_v1  ;;  %1080 = vmatpush.msra.mxu1 %v576_v60 }
  0x6c   :  { %825 = vmatmul.f32.gmra.mxu1 %v1724_v4  ;;  %1016 = vmatpush.msra.mxu0 %v542_v17 }
  0x6d   :  { %1081 = vmatpush.msra.mxu1 %v574_v43 }
  0x73   :  { %763 = vmatmul.f32.gmra.mxu0 %v1737_v7 }
  0x74   :  { %828 = vmatmul.f32.gmra.mxu1 %v1748_v10 }
  0x7b   :  { %766 = vmatmul.f32.gmra.mxu0 %v1767_v15 }
  0x7c   :  { %831 = vmatmul.f32.gmra.mxu1 %v1778_v18 }
  0x83   :  { %769 = vmatmul.f32.gmra.mxu0 %v1797_v23 }
  0x84   :  { %834 = vmatmul.f32.gmra.mxu1 %v1808_v26 }
  0x8b   :  { %772 = vmatmul.f32.gmra.mxu0 %v1827_v31 }
  0x8c   :  { %837 = vmatmul.f32.gmra.mxu1 %v1838_v34 }
  0x93   :  { %775 = vmatmul.f32.gmra.mxu0 %v1857_v39 }
  0x94   :  { %840 = vmatmul.f32.gmra.mxu1 %v1868_v42 }
  0x9b   :  { %778 = vmatmul.f32.gmra.mxu0 %v1887_v47 }
  0x9c   :  { %843 = vmatmul.f32.gmra.mxu1 %v1898_v50 }
  0xa0   :  { %v1755_v12 = vpop.f32.mrf.mxu0 }
  0xa1   :  { %v1757_v13 = vpop.f32.mrf.mxu1  ;;  %627 = vmatmul.f32.vlgmr.msrb.gmra.mxu2 %v1755_v12 }
  0xa2   :  { %692 = vmatmul.f32.vlgmr.msrb.gmra.mxu3 %v1757_v13 }
  0xa3   :  { %781 = vmatmul.f32.gmra.mxu0 %v1917_v55 }
  0xa4   :  { %846 = vmatmul.f32.gmra.mxu1 %v1928_v58 }
  0xa6   :  { %v1941_v0 = vpop.f32.mrf.mxu2 }
  0xa8   :  { %v1785_v20 = vpop.f32.mrf.mxu0 }
  0xa9   :  { %v1787_v21 = vpop.f32.mrf.mxu1  ;;  %630 = vmatmul.f32.gmra.mxu2 %v1785_v20  ;;  %v1954_v6 = vpop.f32.mrf.mxu3 }
  0xaa   :  { %695 = vmatmul.f32.gmra.mxu3 %v1787_v21 }
  0xab   :  { %784 = vmatmul.f32.gmra.mxu0 %v1949_v3 }
  0xac   :  { %849 = vmatmul.f32.gmra.mxu1 %v1962_v9 }
  0xae   :  { %v1997_v30 = vpop.f32.mrf.mxu2 }
  0xb0   :  { %v1815_v28 = vpop.f32.mrf.mxu0 }
  0xb1   :  { %v1817_v29 = vpop.f32.mrf.mxu1  ;;  %633 = vmatmul.f32.gmra.mxu2 %v1815_v28  ;;  %v2000_v32 = vpop.f32.mrf.mxu3 }
  0xb2   :  { %698 = vmatmul.f32.gmra.mxu3 %v1817_v29 }
  0xb3   :  { %787 = vmatmul.f32.gmra.mxu0 %v1981_v19 }
  0xb4   :  { %852 = vmatmul.f32.gmra.mxu1 %v1992_v25 }
  0xb8   :  { %v1845_v36 = vpop.f32.mrf.mxu0  ;;  %v2029_v46 = vpop.f32.mrf.mxu2 }
  0xb9   :  { %v1847_v37 = vpop.f32.mrf.mxu1  ;;  %636 = vmatmul.f32.gmra.mxu2 %v1845_v36  ;;  %v2031_v48 = vpop.f32.mrf.mxu3 }
  0xba   :  { %701 = vmatmul.f32.gmra.mxu3 %v1847_v37 }
  0xbb   :  { %790 = vmatmul.f32.gmra.mxu0 %v2011_v35 }
  0xbc   :  { %855 = vmatmul.f32.gmra.mxu1 %v2022_v41 }
  0xc0   :  { %v1875_v44 = vpop.f32.mrf.mxu0  ;;  %v2059_v2 = vpop.f32.mrf.mxu2 }
  0xc1   :  { %v1877_v45 = vpop.f32.mrf.mxu1  ;;  %639 = vmatmul.f32.gmra.mxu2 %v1875_v44  ;;  %v2062_v5 = vpop.f32.mrf.mxu3 }
  0xc2   :  { %704 = vmatmul.f32.gmra.mxu3 %v1877_v45 }
  0xc3   :  { %793 = vmatmul.f32.gmra.mxu0 %v2041_v51 }
  0xc4   :  { %858 = vmatmul.f32.gmra.mxu1 %v2052_v57 }
  0xc8   :  { %v1905_v52 = vpop.f32.mrf.mxu0  ;;  %v2090_v33 = vpop.f32.mrf.mxu2 }
  0xc9   :  { %v1907_v53 = vpop.f32.mrf.mxu1  ;;  %642 = vmatmul.f32.gmra.mxu2 %v1905_v52  ;;  %2379 = vst [vmem:[#allocation3_spill] sm:$0xff] %v2090_v33  ;;  %v2104_v49 = vpop.f32.mrf.mxu3 }
  0xca   :  { %707 = vmatmul.f32.gmra.mxu3 %v1907_v53  ;;  %2381 = vst [vmem:[#allocation5_spill] sm:$0xff] %v2104_v49 }
  0xcb   :  { %796 = vmatmul.f32.gmra.mxu0 %v2071_v11 }
  0xcc   :  { %861 = vmatmul.f32.gmra.mxu1 %v2082_v24 }
  0xd0   :  { %v1935_v61 = vpop.f32.mrf.mxu0  ;;  %v2129_v22 = vpop.f32.mrf.mxu2 }
  0xd1   :  { %v1937_v63 = vpop.f32.mrf.mxu1  ;;  %645 = vmatmul.f32.gmra.mxu2 %v1935_v61  ;;  %2384 = vst [vmem:[#allocation8_spill] sm:$0xff] %v2129_v22  ;;  %v2132_v27 = vpop.f32.mrf.mxu3 }
  0xd2   :  { %710 = vmatmul.f32.gmra.mxu3 %v1937_v63  ;;  %2385 = vst [vmem:[#allocation9_spill] sm:$0xff] %v2132_v27 }
  0xd3   :  { %799 = vmatmul.f32.gmra.mxu0 %v2099_v40 }
  0xd4   :  { %864 = vmatmul.f32.gmra.mxu1 %v2112_v56 }
  0xd8   :  { %v1969_v14 = vpop.f32.mrf.mxu0  ;;  %v2146_v17 = vpop.f32.mrf.mxu2 }
  0xd9   :  { %v1971_v16 = vpop.f32.mrf.mxu1  ;;  %648 = vmatmul.f32.gmra.mxu2 %v1969_v14  ;;  %2387 = vst [vmem:[#allocation11_spill] sm:$0xff] %v2146_v17 }
  0xda   :  { %713 = vmatmul.f32.gmra.mxu3 %v1971_v16 }
  0xdb   :  { %802 = vmatmul.f32.gmra.mxu0 %v2124_v8  ;;  %v2149_v8 = vpop.f32.mrf.mxu3 }
  0xdc   :  { %867 = vmatmul.f32.gmra.mxu1 %v2137_v38  ;;  %2388 = vst [vmem:[#allocation12_spill] sm:$0xff] %v2149_v8 }
  0xe0   :  { %v758_v54 = vpop.f32.mrf.mxu0 }
  0xe1   :  { %651 = vmatmul.f32.gmra.mxu2 %v1941_v0  ;;  %v823_v60 = vpop.f32.mrf.mxu1 }
  0xe2   :  { %716 = vmatmul.f32.gmra.mxu3 %v1954_v6 }
  0xe3   :  { %1017 = vmatmul.f32.vlgmr.msra.gmra.mxu0 %v1689_v59 }
  0xe4   :  { %1082 = vmatmul.f32.vlgmr.msra.gmra.mxu1 %v1700_v62 }
  0xe8   :  { %v761_v38 = vpop.f32.mrf.mxu0 }
  0xe9   :  { %654 = vmatmul.f32.gmra.mxu2 %v1997_v30  ;;  %v826_v43 = vpop.f32.mrf.mxu1 }
  0xea   :  { %719 = vmatmul.f32.gmra.mxu3 %v2000_v32 }
  0xeb   :  { %1020 = vmatmul.f32.gmra.mxu0 %v1713_v1 }
  0xec   :  { %1085 = vmatmul.f32.gmra.mxu1 %v1724_v4 }
  0xf0   :  { %v764_v59 = vpop.f32.mrf.mxu0 }
  0xf1   :  { %657 = vmatmul.f32.gmra.mxu2 %v2029_v46  ;;  %v829_v62 = vpop.f32.mrf.mxu1 }
  0xf2   :  { %722 = vmatmul.f32.gmra.mxu3 %v2031_v48 }
  0xf3   :  { %1023 = vmatmul.f32.gmra.mxu0 %v1737_v7 }
  0xf4   :  { %1088 = vmatmul.f32.gmra.mxu1 %v1748_v10 }
  0xf8   :  { %v767_v4 = vpop.f32.mrf.mxu0 }
  0xf9   :  { %660 = vmatmul.f32.gmra.mxu2 %v2059_v2 }
  0xfa   :  { %725 = vmatmul.f32.gmra.mxu3 %v2062_v5 }
  0xfb   :  { %1026 = vmatmul.f32.gmra.mxu0 %v1767_v15 }
  0xfc   :  { %1091 = vmatmul.f32.gmra.mxu1 %v1778_v18 }
 0x100   :  { %v770_v10 = vpop.f32.mrf.mxu0 }
 0x101   :  { %663 = vmatmul.f32.gmra.mxu2 %v2090_v33 }
 0x102   :  { %728 = vmatmul.f32.gmra.mxu3 %v2104_v49 }
 0x103   :  { %1029 = vmatmul.f32.gmra.mxu0 %v1797_v23 }
 0x104   :  { %1094 = vmatmul.f32.gmra.mxu1 %v1808_v26 }
 0x109   :  { %666 = vmatmul.f32.gmra.mxu2 %v2129_v22  ;;  %v2157_v22 = vpop.f32.mrf.mxu3 }
 0x10a   :  { %731 = vmatmul.f32.gmra.mxu3 %v2132_v27  ;;  %v2155_v27 = vpop.f32.mrf.mxu2  ;;  %2390 = vst [vmem:[#allocation14_spill] sm:$0xff] %v2157_v22 }
 0x10b   :  { %2389 = vst [vmem:[#allocation13_spill] sm:$0xff] %v2155_v27  ;;  %1032 = vmatmul.f32.gmra.mxu0 %v1827_v31 }
 0x10c   :  { %1097 = vmatmul.f32.gmra.mxu1 %v1838_v34 }
 0x111   :  { %669 = vmatmul.f32.gmra.mxu2 %v2146_v17 }
 0x112   :  { %734 = vmatmul.f32.gmra.mxu3 %v2149_v8  ;;  %v2165_v8 = vld [vmem:[%s2364_s4] sm:$0x3] }
 0x113   :  { %2391 = vst [vmem:[#allocation15_spill] sm:$0xff] %v2165_v8  ;;  %v2170_v1 = vperm.slane %v2165_v8, 0  ;;  %1035 = vmatmul.f32.gmra.mxu0 %v1857_v39 }
 0x114   :  { %1100 = vmatmul.f32.gmra.mxu1 %v1868_v42 }
 0x119   :  { %672 = vmatmul.f32.gmra.mxu2 %v2155_v27  ;;  %v832_v27 = vpop.f32.mrf.mxu1 }
 0x11a   :  { %737 = vmatmul.f32.gmra.mxu3 %v2157_v22 }
 0x11b   :  { %1038 = vmatmul.f32.gmra.mxu0 %v1887_v47 }
 0x11c   :  { %1103 = vmatmul.f32.gmra.mxu1 %v1898_v50 }
 0x121   :  { %887 = vmatmul.f32.vlgmr.msra.gmra.mxu2 %v1755_v12  ;;  %v835_v12 = vpop.f32.mrf.mxu1 }
 0x122   :  { %952 = vmatmul.f32.vlgmr.msra.gmra.mxu3 %v1757_v13 }
 0x123   :  { %1041 = vmatmul.f32.gmra.mxu0 %v1917_v55 }
 0x124   :  { %v628_v22 = vpop.f32.mrf.mxu2  ;;  %1106 = vmatmul.f32.gmra.mxu1 %v1928_v58 }
 0x125   :  { %v629_v7 = vadd.f32 %v628_v22, %v2170_v1  ;;  %v693_v17 = vpop.f32.mrf.mxu3 }
 0x127   :  { %v694_v49 = vadd.f32 %v693_v17, %v629_v7 }
 0x129   :  { %v759_v33 = vadd.f32 %v758_v54, %v694_v49  ;;  %890 = vmatmul.f32.gmra.mxu2 %v1785_v20 }
 0x12a   :  { %955 = vmatmul.f32.gmra.mxu3 %v1787_v21  ;;  %v773_v21 = vpop.f32.mrf.mxu0 }
 0x12b   :  { %v824_v8 = vadd.f32 %v823_v60, %v759_v33  ;;  %v838_v33 = vpop.f32.mrf.mxu1  ;;  %1044 = vmatmul.f32.gmra.mxu0 %v1949_v3 }
 0x12c   :  { %v631_v56 = vpop.f32.mrf.mxu2  ;;  %1109 = vmatmul.f32.gmra.mxu1 %v1962_v9 }
 0x12d   :  { %v1131_v13 = vmax.f32 %v824_v8, 0.0  ;;  %v632_v15 = vadd.f32 %v631_v56, %v2170_v1  ;;  %v696_v40 = vpop.f32.mrf.mxu3 }
 0x12f   :  { %1163 = vst [vmem:[%s2365_s5] sm:$0xff] %v1131_v13  ;;  %v697_v18 = vadd.f32 %v696_v40, %v632_v15 }
 0x131   :  { %v762_v20 = vadd.f32 %v761_v38, %v697_v18  ;;  %893 = vmatmul.f32.gmra.mxu2 %v1815_v28 }
 0x132   :  { %958 = vmatmul.f32.gmra.mxu3 %v1817_v29  ;;  %v776_v29 = vpop.f32.mrf.mxu0 }
 0x133   :  { %v827_v49 = vadd.f32 %v826_v43, %v762_v20  ;;  %v841_v22 = vpop.f32.mrf.mxu1  ;;  %1047 = vmatmul.f32.gmra.mxu0 %v1981_v19 }
 0x134   :  { %v634_v23 = vpop.f32.mrf.mxu2  ;;  %1112 = vmatmul.f32.gmra.mxu1 %v1992_v25 }
 0x135   :  { %v1133_v56 = vmax.f32 %v827_v49, 0.0  ;;  %v635_v8 = vadd.f32 %v634_v23, %v2170_v1  ;;  %v699_v26 = vpop.f32.mrf.mxu3 }
 0x137   :  { %1165 = vst [vmem:[%s2365_s5 + $0x10] sm:$0xff] %v1133_v56  ;;  %v700_v40 = vadd.f32 %v699_v26, %v635_v8 }
 0x139   :  { %v765_v28 = vadd.f32 %v764_v59, %v700_v40  ;;  %896 = vmatmul.f32.gmra.mxu2 %v1845_v36 }
 0x13a   :  { %961 = vmatmul.f32.gmra.mxu3 %v1847_v37  ;;  %v779_v37 = vpop.f32.mrf.mxu0 }
 0x13b   :  { %v830_v38 = vadd.f32 %v829_v62, %v765_v28  ;;  %v844_v43 = vpop.f32.mrf.mxu1  ;;  %1050 = vmatmul.f32.gmra.mxu0 %v2011_v35 }
 0x13c   :  { %v637_v31 = vpop.f32.mrf.mxu2  ;;  %1115 = vmatmul.f32.gmra.mxu1 %v2022_v41 }
 0x13d   :  { %v1135_v54 = vmax.f32 %v830_v38, 0.0  ;;  %v638_v60 = vadd.f32 %v637_v31, %v2170_v1  ;;  %v702_v34 = vpop.f32.mrf.mxu3 }
 0x13f   :  { %1167 = vst [vmem:[%s2365_s5 + $0x20] sm:$0xff] %v1135_v54  ;;  %v703_v17 = vadd.f32 %v702_v34, %v638_v60 }
 0x141   :  { %v768_v36 = vadd.f32 %v767_v4, %v703_v17  ;;  %899 = vmatmul.f32.gmra.mxu2 %v1875_v44 }
 0x142   :  { %964 = vmatmul.f32.gmra.mxu3 %v1877_v45  ;;  %v782_v45 = vpop.f32.mrf.mxu0 }
 0x143   :  { %v833_v59 = vadd.f32 %v832_v27, %v768_v36  ;;  %v847_v27 = vpop.f32.mrf.mxu1  ;;  %1053 = vmatmul.f32.gmra.mxu0 %v2041_v51 }
 0x144   :  { %v640_v39 = vpop.f32.mrf.mxu2  ;;  %1118 = vmatmul.f32.gmra.mxu1 %v2052_v57 }
 0x145   :  { %v1137_v62 = vmax.f32 %v833_v59, 0.0  ;;  %v641_v7 = vadd.f32 %v640_v39, %v2170_v1  ;;  %v705_v42 = vpop.f32.mrf.mxu3 }
 0x147   :  { %1169 = vst [vmem:[%s2365_s5 + $0x30] sm:$0xff] %v1137_v62  ;;  %v706_v4 = vadd.f32 %v705_v42, %v641_v7 }
 0x149   :  { %v771_v44 = vadd.f32 %v770_v10, %v706_v4  ;;  %902 = vmatmul.f32.gmra.mxu2 %v1905_v52  ;;  %v2392_v4 = vld [vmem:[#allocation4_spill] sm:$0xff] }
 0x14a   :  { %967 = vmatmul.f32.gmra.mxu3 %v1907_v53  ;;  %v785_v53 = vpop.f32.mrf.mxu0 }
 0x14b   :  { %v836_v13 = vadd.f32 %v835_v12, %v771_v44  ;;  %v850_v12 = vpop.f32.mrf.mxu1  ;;  %1056 = vmatmul.f32.gmra.mxu0 %v2071_v11 }
 0x14c   :  { %v643_v47 = vpop.f32.mrf.mxu2  ;;  %1121 = vmatmul.f32.gmra.mxu1 %v2082_v24 }
 0x14d   :  { %v1139_v15 = vmax.f32 %v836_v13, 0.0  ;;  %v644_v18 = vadd.f32 %v643_v47, %v2170_v1  ;;  %v708_v50 = vpop.f32.mrf.mxu3  ;;  %v2394_v47 = vld [vmem:[#allocation3_spill] sm:$0xff] }
 0x14f   :  { %1171 = vst [vmem:[%s2365_s5 + $0x40] sm:$0xff] %v1139_v15  ;;  %v709_v10 = vadd.f32 %v708_v50, %v644_v18  ;;  %v2395_v15 = vld [vmem:[#allocation5_spill] sm:$0xff] }
 0x151   :  { %v774_v52 = vadd.f32 %v773_v21, %v709_v10  ;;  %905 = vmatmul.f32.gmra.mxu2 %v1935_v61 }
 0x152   :  { %970 = vmatmul.f32.gmra.mxu3 %v1937_v63  ;;  %v788_v63 = vpop.f32.mrf.mxu0 }
 0x153   :  { %v839_v20 = vadd.f32 %v838_v33, %v774_v52  ;;  %v853_v33 = vpop.f32.mrf.mxu1  ;;  %1059 = vmatmul.f32.gmra.mxu0 %v2392_v4  ;;  %v2396_v52 = vld [vmem:[#allocation7_spill] sm:$0xff] }
 0x154   :  { %v646_v55 = vpop.f32.mrf.mxu2 }
 0x155   :  { %v1141_v49 = vmax.f32 %v839_v20, 0.0  ;;  %v647_v23 = vadd.f32 %v646_v55, %v2170_v1  ;;  %v711_v58 = vpop.f32.mrf.mxu3  ;;  %v2397_v55 = vld [vmem:[#allocation10_spill] sm:$0xff] }
 0x157   :  { %1173 = vst [vmem:[%s2365_s5 + $0x50] sm:$0xff] %v1141_v49  ;;  %v712_v21 = vadd.f32 %v711_v58, %v647_v23  ;;  %v2398_v58 = vld [vmem:[#allocation8_spill] sm:$0xff] }
 0x159   :  { %v777_v61 = vadd.f32 %v776_v29, %v712_v21  ;;  %908 = vmatmul.f32.gmra.mxu2 %v1969_v14 }
 0x15a   :  { %973 = vmatmul.f32.gmra.mxu3 %v1971_v16  ;;  %v791_v16 = vpop.f32.mrf.mxu0 }
 0x15b   :  { %v842_v56 = vadd.f32 %v841_v22, %v777_v61  ;;  %v856_v28 = vpop.f32.mrf.mxu1  ;;  %1062 = vmatmul.f32.gmra.mxu0 %v2396_v52  ;;  %v2399_v61 = vld [vmem:[#allocation9_spill] sm:$0xff] }
 0x15c   :  { %v649_v3 = vpop.f32.mrf.mxu2 }
 0x15d   :  { %v1143_v8 = vmax.f32 %v842_v56, 0.0  ;;  %v650_v26 = vadd.f32 %v649_v3, %v2170_v1  ;;  %v714_v9 = vpop.f32.mrf.mxu3 }
 0x15f   :  { %1175 = vst [vmem:[%s2365_s5 + $0x60] sm:$0xff] %v1143_v8  ;;  %v715_v40 = vadd.f32 %v714_v9, %v650_v26 }
 0x161   :  { %v780_v14 = vadd.f32 %v779_v37, %v715_v40  ;;  %911 = vmatmul.f32.gmra.mxu2 %v1941_v0 }
 0x162   :  { %976 = vmatmul.f32.gmra.mxu3 %v1954_v6  ;;  %v794_v6 = vpop.f32.mrf.mxu0 }
 0x163   :  { %v845_v29 = vadd.f32 %v844_v43, %v780_v14  ;;  %v859_v54 = vpop.f32.mrf.mxu1  ;;  %v2400_v14 = vld [vmem:[#allocation11_spill] sm:$0xff] }
 0x164   :  { %v652_v19 = vpop.f32.mrf.mxu2 }
 0x165   :  { %v1145_v22 = vmax.f32 %v845_v29, 0.0  ;;  %v653_v38 = vadd.f32 %v652_v19, %v2170_v1  ;;  %v717_v25 = vpop.f32.mrf.mxu3 }
 0x167   :  { %1177 = vst [vmem:[%s2365_s5 + $0x70] sm:$0xff] %v1145_v22  ;;  %v718_v31 = vadd.f32 %v717_v25, %v653_v38 }
 0x169   :  { %v783_v0 = vadd.f32 %v782_v45, %v718_v31  ;;  %914 = vmatmul.f32.gmra.mxu2 %v1997_v30 }
 0x16a   :  { %979 = vmatmul.f32.gmra.mxu3 %v2000_v32  ;;  %v797_v32 = vpop.f32.mrf.mxu0 }
 0x16b   :  { %v848_v60 = vadd.f32 %v847_v27, %v783_v0  ;;  %v862_v37 = vpop.f32.mrf.mxu1  ;;  %v2393_v27 = vld [vmem:[#allocation6_spill] sm:$0xff] }
 0x16c   :  { %v655_v35 = vpop.f32.mrf.mxu2  ;;  %1124 = vmatmul.f32.gmra.mxu1 %v2393_v27 }
 0x16d   :  { %v1147_v34 = vmax.f32 %v848_v60, 0.0  ;;  %v656_v17 = vadd.f32 %v655_v35, %v2170_v1  ;;  %v720_v41 = vpop.f32.mrf.mxu3  ;;  %v2403_v60 = vld [vmem:[#allocation14_spill] sm:$0xff] }
 0x16f   :  { %1179 = vst [vmem:[%s2365_s5 + $0x80] sm:$0xff] %v1147_v34  ;;  %v721_v36 = vadd.f32 %v720_v41, %v656_v17 }
 0x171   :  { %v786_v30 = vadd.f32 %v785_v53, %v721_v36  ;;  %917 = vmatmul.f32.gmra.mxu2 %v2029_v46 }
 0x172   :  { %982 = vmatmul.f32.gmra.mxu3 %v2031_v48  ;;  %v800_v48 = vpop.f32.mrf.mxu0 }
 0x173   :  { %v851_v43 = vadd.f32 %v850_v12, %v786_v30  ;;  %v865_v7 = vpop.f32.mrf.mxu1 }
 0x174   :  { %v658_v51 = vpop.f32.mrf.mxu2  ;;  %1127 = vmatmul.f32.gmra.mxu1 %v2397_v55 }
 0x175   :  { %v1149_v59 = vmax.f32 %v851_v43, 0.0  ;;  %v659_v39 = vadd.f32 %v658_v51, %v2170_v1  ;;  %v723_v57 = vpop.f32.mrf.mxu3  ;;  %v2404_v51 = vld [vmem:[#allocation15_spill] sm:$0xff] }
 0x177   :  { %1181 = vst [vmem:[%s2365_s5 + $0x90] sm:$0xff] %v1149_v59  ;;  %v724_v62 = vadd.f32 %v723_v57, %v659_v39  ;;  %v2291_v59 = vperm.slane %v2404_v51, 1 }
 0x179   :  { %v789_v46 = vadd.f32 %v788_v63, %v724_v62  ;;  %920 = vmatmul.f32.gmra.mxu2 %v2059_v2 }
 0x17a   :  { %985 = vmatmul.f32.gmra.mxu3 %v2062_v5  ;;  %v803_v5 = vpop.f32.mrf.mxu0 }
 0x17b   :  { %v854_v42 = vadd.f32 %v853_v33, %v789_v46  ;;  %v868_v50 = vpop.f32.mrf.mxu1 }
 0x17c   :  { %v661_v11 = vpop.f32.mrf.mxu2 }
 0x17d   :  { %v1151_v44 = vmax.f32 %v854_v42, 0.0  ;;  %v662_v45 = vadd.f32 %v661_v11, %v2170_v1  ;;  %v726_v24 = vpop.f32.mrf.mxu3 }
 0x17f   :  { %1183 = vst [vmem:[%s2365_s5 + $0xa0] sm:$0xff] %v1151_v44  ;;  %v727_v13 = vadd.f32 %v726_v24, %v662_v45 }
 0x181   :  { %v792_v2 = vadd.f32 %v791_v16, %v727_v13  ;;  %923 = vmatmul.f32.gmra.mxu2 %v2394_v47  ;;  %v2401_v16 = vld [vmem:[#allocation12_spill] sm:$0xff] }
 0x182   :  { %988 = vmatmul.f32.gmra.mxu3 %v2395_v15  ;;  %v1018_v21 = vpop.f32.mrf.mxu0 }
 0x183   :  { %v857_v18 = vadd.f32 %v856_v28, %v792_v2  ;;  %v1083_v33 = vpop.f32.mrf.mxu1 }
 0x184   :  { %v664_v10 = vpop.f32.mrf.mxu2 }
 0x185   :  { %v1153_v53 = vmax.f32 %v857_v18, 0.0  ;;  %v665_v12 = vadd.f32 %v664_v10, %v2170_v1  ;;  %v729_v20 = vpop.f32.mrf.mxu3 }
 0x187   :  { %1185 = vst [vmem:[%s2365_s5 + $0xb0] sm:$0xff] %v1153_v53  ;;  %v730_v49 = vadd.f32 %v729_v20, %v665_v12 }
 0x189   :  { %v795_v23 = vadd.f32 %v794_v6, %v730_v49  ;;  %926 = vmatmul.f32.gmra.mxu2 %v2398_v58 }
 0x18a   :  { %991 = vmatmul.f32.gmra.mxu3 %v2399_v61  ;;  %v1021_v28 = vpop.f32.mrf.mxu0 }
 0x18b   :  { %v860_v63 = vadd.f32 %v859_v54, %v795_v23  ;;  %v1086_v22 = vpop.f32.mrf.mxu1  ;;  %v2402_v54 = vld [vmem:[#allocation13_spill] sm:$0xff] }
 0x18c   :  { %v667_v56 = vpop.f32.mrf.mxu2 }
 0x18d   :  { %v1155_v3 = vmax.f32 %v860_v63, 0.0  ;;  %v668_v8 = vadd.f32 %v667_v56, %v2170_v1  ;;  %v732_v26 = vpop.f32.mrf.mxu3 }
 0x18f   :  { %1187 = vst [vmem:[%s2365_s5 + $0xc0] sm:$0xff] %v1155_v3  ;;  %v733_v9 = vadd.f32 %v732_v26, %v668_v8 }
 0x191   :  { %v798_v40 = vadd.f32 %v797_v32, %v733_v9  ;;  %929 = vmatmul.f32.gmra.mxu2 %v2400_v14 }
 0x192   :  { %994 = vmatmul.f32.gmra.mxu3 %v2401_v16  ;;  %v1024_v17 = vpop.f32.mrf.mxu0 }
 0x193   :  { %v863_v29 = vadd.f32 %v862_v37, %v798_v40  ;;  %v1089_v32 = vpop.f32.mrf.mxu1 }
 0x194   :  { %v670_v19 = vpop.f32.mrf.mxu2 }
 0x195   :  { %v1157_v38 = vmax.f32 %v863_v29, 0.0  ;;  %v671_v25 = vadd.f32 %v670_v19, %v2170_v1  ;;  %v735_v31 = vpop.f32.mrf.mxu3 }
 0x197   :  { %1189 = vst [vmem:[%s2365_s5 + $0xd0] sm:$0xff] %v1157_v38  ;;  %v736_v0 = vadd.f32 %v735_v31, %v671_v25 }
 0x199   :  { %v801_v6 = vadd.f32 %v800_v48, %v736_v0  ;;  %932 = vmatmul.f32.gmra.mxu2 %v2402_v54 }
 0x19a   :  { %997 = vmatmul.f32.gmra.mxu3 %v2403_v60 }
 0x19b   :  { %v866_v35 = vadd.f32 %v865_v7, %v801_v6  ;;  %v1027_v7 = vpop.f32.mrf.mxu0  ;;  %v1092_v42 = vpop.f32.mrf.mxu1 }
 0x19c   :  { %v673_v34 = vpop.f32.mrf.mxu2 }
 0x19d   :  { %v1159_v41 = vmax.f32 %v866_v35, 0.0  ;;  %v674_v36 = vadd.f32 %v673_v34, %v2170_v1  ;;  %v738_v30 = vpop.f32.mrf.mxu3 }
 0x19f   :  { %1191 = vst [vmem:[%s2365_s5 + $0xe0] sm:$0xff] %v1159_v41  ;;  %v739_v37 = vadd.f32 %v738_v30, %v674_v36 }
 0x1a1   :  { %v804_v43 = vadd.f32 %v803_v5, %v739_v37 }
 0x1a3   :  { %v869_v39 = vadd.f32 %v868_v50, %v804_v43  ;;  %v1030_v2 = vpop.f32.mrf.mxu0  ;;  %v1095_v5 = vpop.f32.mrf.mxu1 }
 0x1a4   :  { %v888_v57 = vpop.f32.mrf.mxu2 }
 0x1a5   :  { %v1161_v62 = vmax.f32 %v869_v39, 0.0  ;;  %v889_v46 = vadd.f32 %v888_v57, %v2291_v59  ;;  %v953_v48 = vpop.f32.mrf.mxu3 }
 0x1a7   :  { %1193 = vst [vmem:[%s2365_s5 + $0xf0] sm:$0xff] %v1161_v62  ;;  %v954_v1 = vadd.f32 %v953_v48, %v889_v46 }
 0x1a9   :  { %v1019_v11 = vadd.f32 %v1018_v21, %v954_v1 }
 0x1ab   :  { %v1084_v4 = vadd.f32 %v1083_v33, %v1019_v11  ;;  %v1033_v20 = vpop.f32.mrf.mxu0  ;;  %v1098_v23 = vpop.f32.mrf.mxu1 }
 0x1ac   :  { %v891_v44 = vpop.f32.mrf.mxu2 }
 0x1ad   :  { %v1132_v45 = vmax.f32 %v1084_v4, 0.0  ;;  %v892_v24 = vadd.f32 %v891_v44, %v2291_v59  ;;  %v956_v27 = vpop.f32.mrf.mxu3 }
 0x1af   :  { %1164 = vst [vmem:[%s2365_s5 + $0x8] sm:$0xff] %v1132_v45  ;;  %v957_v13 = vadd.f32 %v956_v27, %v892_v24 }
 0x1b1   :  { %v1022_v47 = vadd.f32 %v1021_v28, %v957_v13 }
 0x1b3   :  { %v1087_v15 = vadd.f32 %v1086_v22, %v1022_v47  ;;  %v1036_v8 = vpop.f32.mrf.mxu0  ;;  %v1101_v14 = vpop.f32.mrf.mxu1 }
 0x1b4   :  { %v894_v18 = vpop.f32.mrf.mxu2 }
 0x1b5   :  { %v1134_v50 = vmax.f32 %v1087_v15, 0.0  ;;  %v895_v10 = vadd.f32 %v894_v18, %v2291_v59  ;;  %v959_v52 = vpop.f32.mrf.mxu3 }
 0x1b7   :  { %1166 = vst [vmem:[%s2365_s5 + $0x18] sm:$0xff] %v1134_v50  ;;  %v960_v53 = vadd.f32 %v959_v52, %v895_v10 }
 0x1b9   :  { %v1025_v12 = vadd.f32 %v1024_v17, %v960_v53 }
 0x1bb   :  { %v1090_v55 = vadd.f32 %v1089_v32, %v1025_v12  ;;  %v1039_v31 = vpop.f32.mrf.mxu0  ;;  %v1104_v6 = vpop.f32.mrf.mxu1 }
 0x1bc   :  { %v897_v49 = vpop.f32.mrf.mxu2 }
 0x1bd   :  { %v1136_v58 = vmax.f32 %v1090_v55, 0.0  ;;  %v898_v21 = vadd.f32 %v897_v49, %v2291_v59  ;;  %v962_v61 = vpop.f32.mrf.mxu3 }
 0x1bf   :  { %1168 = vst [vmem:[%s2365_s5 + $0x28] sm:$0xff] %v1136_v58  ;;  %v963_v63 = vadd.f32 %v962_v61, %v898_v21 }
 0x1c1   :  { %v1028_v33 = vadd.f32 %v1027_v7, %v963_v63 }
 0x1c3   :  { %v1093_v56 = vadd.f32 %v1092_v42, %v1028_v33  ;;  %v1042_v30 = vpop.f32.mrf.mxu0  ;;  %v1107_v37 = vpop.f32.mrf.mxu1 }
 0x1c4   :  { %v900_v3 = vpop.f32.mrf.mxu2 }
 0x1c5   :  { %v1138_v26 = vmax.f32 %v1093_v56, 0.0  ;;  %v901_v9 = vadd.f32 %v900_v3, %v2291_v59  ;;  %v965_v40 = vpop.f32.mrf.mxu3 }
 0x1c7   :  { %1170 = vst [vmem:[%s2365_s5 + $0x38] sm:$0xff] %v1138_v26  ;;  %v966_v16 = vadd.f32 %v965_v40, %v901_v9 }
 0x1c9   :  { %v1031_v28 = vadd.f32 %v1030_v2, %v966_v16 }
 0x1cb   :  { %v1096_v29 = vadd.f32 %v1095_v5, %v1031_v28  ;;  %v1045_v7 = vpop.f32.mrf.mxu0  ;;  %v1110_v11 = vpop.f32.mrf.mxu1 }
 0x1cc   :  { %v903_v19 = vpop.f32.mrf.mxu2 }
 0x1cd   :  { %v1140_v22 = vmax.f32 %v1096_v29, 0.0  ;;  %v904_v38 = vadd.f32 %v903_v19, %v2291_v59  ;;  %v968_v25 = vpop.f32.mrf.mxu3 }
 0x1cf   :  { %1172 = vst [vmem:[%s2365_s5 + $0x48] sm:$0xff] %v1140_v22  ;;  %v969_v0 = vadd.f32 %v968_v25, %v904_v38 }
 0x1d1   :  { %v1034_v54 = vadd.f32 %v1033_v20, %v969_v0 }
 0x1d3   :  { %v1099_v60 = vadd.f32 %v1098_v23, %v1034_v54  ;;  %v1048_v47 = vpop.f32.mrf.mxu0  ;;  %v1113_v50 = vpop.f32.mrf.mxu1 }
 0x1d4   :  { %v906_v35 = vpop.f32.mrf.mxu2 }
 0x1d5   :  { %v1142_v34 = vmax.f32 %v1099_v60, 0.0  ;;  %v907_v17 = vadd.f32 %v906_v35, %v2291_v59  ;;  %v971_v41 = vpop.f32.mrf.mxu3 }
 0x1d7   :  { %1174 = vst [vmem:[%s2365_s5 + $0x58] sm:$0xff] %v1142_v34  ;;  %v972_v36 = vadd.f32 %v971_v41, %v907_v17 }
 0x1d9   :  { %v1037_v32 = vadd.f32 %v1036_v8, %v972_v36 }
 0x1db   :  { %v1102_v43 = vadd.f32 %v1101_v14, %v1037_v32  ;;  %v1051_v23 = vpop.f32.mrf.mxu0  ;;  %v1116_v21 = vpop.f32.mrf.mxu1 }
 0x1dc   :  { %v909_v51 = vpop.f32.mrf.mxu2 }
 0x1dd   :  { %v1144_v39 = vmax.f32 %v1102_v43, 0.0  ;;  %v910_v57 = vadd.f32 %v909_v51, %v2291_v59  ;;  %v974_v62 = vpop.f32.mrf.mxu3 }
 0x1df   :  { %1176 = vst [vmem:[%s2365_s5 + $0x68] sm:$0xff] %v1144_v39  ;;  %v975_v46 = vadd.f32 %v974_v62, %v910_v57 }
 0x1e1   :  { %v1040_v48 = vadd.f32 %v1039_v31, %v975_v46 }
 0x1e3   :  { %v1105_v1 = vadd.f32 %v1104_v6, %v1040_v48  ;;  %v1054_v9 = vpop.f32.mrf.mxu0  ;;  %v1119_v14 = vpop.f32.mrf.mxu1 }
 0x1e4   :  { %v912_v42 = vpop.f32.mrf.mxu2 }
 0x1e5   :  { %v1146_v4 = vmax.f32 %v1105_v1, 0.0  ;;  %v913_v44 = vadd.f32 %v912_v42, %v2291_v59  ;;  %v977_v45 = vpop.f32.mrf.mxu3 }
 0x1e7   :  { %1178 = vst [vmem:[%s2365_s5 + $0x78] sm:$0xff] %v1146_v4  ;;  %v978_v24 = vadd.f32 %v977_v45, %v913_v44 }
 0x1e9   :  { %v1043_v27 = vadd.f32 %v1042_v30, %v978_v24 }
 0x1eb   :  { %v1108_v13 = vadd.f32 %v1107_v37, %v1043_v27  ;;  %v1057_v31 = vpop.f32.mrf.mxu0  ;;  %v1122_v54 = vpop.f32.mrf.mxu1 }
 0x1ec   :  { %v915_v2 = vpop.f32.mrf.mxu2 }
 0x1ed   :  { %v1148_v5 = vmax.f32 %v1108_v13, 0.0  ;;  %v916_v15 = vadd.f32 %v915_v2, %v2291_v59  ;;  %v980_v18 = vpop.f32.mrf.mxu3 }
 0x1ef   :  { %1180 = vst [vmem:[%s2365_s5 + $0x88] sm:$0xff] %v1148_v5  ;;  %v981_v10 = vadd.f32 %v980_v18, %v916_v15 }
 0x1f1   :  { %v1046_v52 = vadd.f32 %v1045_v7, %v981_v10 }
 0x1f3   :  { %v1111_v53 = vadd.f32 %v1110_v11, %v1046_v52  ;;  %v1060_v32 = vpop.f32.mrf.mxu0  ;;  %v1125_v39 = vpop.f32.mrf.mxu1 }
 0x1f4   :  { %v918_v12 = vpop.f32.mrf.mxu2 }
 0x1f5   :  { %v1150_v20 = vmax.f32 %v1111_v53, 0.0  ;;  %v919_v55 = vadd.f32 %v918_v12, %v2291_v59  ;;  %v983_v49 = vpop.f32.mrf.mxu3 }
 0x1f7   :  { %1182 = vst [vmem:[%s2365_s5 + $0x98] sm:$0xff] %v1150_v20  ;;  %v984_v58 = vadd.f32 %v983_v49, %v919_v55 }
 0x1f9   :  { %v1049_v61 = vadd.f32 %v1048_v47, %v984_v58 }
 0x1fb   :  { %v1114_v63 = vadd.f32 %v1113_v50, %v1049_v61  ;;  %v1063_v11 = vpop.f32.mrf.mxu0  ;;  %v1128_v44 = vpop.f32.mrf.mxu1 }
 0x1fc   :  { %v921_v33 = vpop.f32.mrf.mxu2 }
 0x1fd   :  { %v1152_v56 = vmax.f32 %v1114_v63, 0.0  ;;  %v922_v3 = vadd.f32 %v921_v33, %v2291_v59  ;;  %v986_v8 = vpop.f32.mrf.mxu3 }
 0x1ff   :  { %1184 = vst [vmem:[%s2365_s5 + $0xa8] sm:$0xff] %v1152_v56  ;;  %v987_v26 = vadd.f32 %v986_v8, %v922_v3 }
 0x201   :  { %v1052_v40 = vadd.f32 %v1051_v23, %v987_v26 }
 0x203   :  { %v1117_v16 = vadd.f32 %v1116_v21, %v1052_v40 }
 0x204   :  { %v924_v28 = vpop.f32.mrf.mxu2 }
 0x205   :  { %v1154_v29 = vmax.f32 %v1117_v16, 0.0  ;;  %v925_v19 = vadd.f32 %v924_v28, %v2291_v59  ;;  %v989_v22 = vpop.f32.mrf.mxu3 }
 0x207   :  { %1186 = vst [vmem:[%s2365_s5 + $0xb8] sm:$0xff] %v1154_v29  ;;  %v990_v38 = vadd.f32 %v989_v22, %v925_v19 }
 0x209   :  { %v1055_v25 = vadd.f32 %v1054_v9, %v990_v38 }
 0x20b   :  { %v1120_v0 = vadd.f32 %v1119_v14, %v1055_v25 }
 0x20c   :  { %v927_v6 = vpop.f32.mrf.mxu2 }
 0x20d   :  { %v1156_v60 = vmax.f32 %v1120_v0, 0.0  ;;  %v928_v35 = vadd.f32 %v927_v6, %v2291_v59  ;;  %v992_v34 = vpop.f32.mrf.mxu3 }
 0x20f   :  { %1188 = vst [vmem:[%s2365_s5 + $0xc8] sm:$0xff] %v1156_v60  ;;  %v993_v17 = vadd.f32 %v992_v34, %v928_v35 }
 0x211   :  { %v1058_v41 = vadd.f32 %v1057_v31, %v993_v17 }
 0x213   :  { %v1123_v36 = vadd.f32 %v1122_v54, %v1058_v41 }
 0x214   :  { %v930_v30 = vpop.f32.mrf.mxu2 }
 0x215   :  { %v1158_v37 = vmax.f32 %v1123_v36, 0.0  ;;  %v931_v43 = vadd.f32 %v930_v30, %v2291_v59  ;;  %v995_v51 = vpop.f32.mrf.mxu3 }
 0x217   :  { %1190 = vst [vmem:[%s2365_s5 + $0xd8] sm:$0xff] %v1158_v37  ;;  %v996_v57 = vadd.f32 %v995_v51, %v931_v43 }
 0x219   :  { %v1061_v62 = vadd.f32 %v1060_v32, %v996_v57 }
 0x21b   :  { %v1126_v46 = vadd.f32 %v1125_v39, %v1061_v62 }
 0x21c   :  { %v933_v48 = vpop.f32.mrf.mxu2 }
 0x21d   :  { %v1160_v7 = vmax.f32 %v1126_v46, 0.0  ;;  %v934_v1 = vadd.f32 %v933_v48, %v2291_v59  ;;  %v998_v42 = vpop.f32.mrf.mxu3 }
 0x21f   :  { %1192 = vst [vmem:[%s2365_s5 + $0xe8] sm:$0xff] %v1160_v7  ;;  %v999_v4 = vadd.f32 %v998_v42, %v934_v1 }
 0x221   :  { %v1064_v45 = vadd.f32 %v1063_v11, %v999_v4 }
 0x223   :  { %v1129_v24 = vadd.f32 %v1128_v44, %v1064_v45 }
 0x225   :  { %v1162_v27 = vmax.f32 %v1129_v24, 0.0 }
 0x227   :  { %1194 = vst [vmem:[%s2365_s5 + $0xf8] sm:$0xff] %v1162_v27 }

// kernel: gcn_forward.7
= control target key start
LH: loop header
LB: loop body
LE: loop exit
PB: predicated region body
PF: predicated region fallthrough
CT: control target
= control target key end

     0   :  { %v930_v0 = vmov 0   ;;  %s2165_s1 = inlined_call_operand.vmem [shape: s32[128,1], index: 1, kind: input, shape index: {}]   ;;  %s2166_s0 = inlined_call_operand.vmem [shape: f32[128,256], index: 0, kind: input, shape index: {}]   ;;  %s2167_s3 = inlined_call_operand.vmem [shape: f32[1,128], index: 3, kind: input, shape index: {}]   ;;  %s2168_s2 = inlined_call_operand.vmem [shape: f32[256,128], index: 2, kind: input, shape index: {}]   ;;  %s2169_s6 = inlined_call_operand.vmem [shape: s32[8,256], index: 6, kind: output, shape index: {2}]   ;;  %s2170_s4 = inlined_call_operand.vmem [shape: f32[8,128], index: 4, kind: output, shape index: {0}]   ;;  %s2171_s5 = inlined_call_operand.vmem [shape: f32[8,128], index: 5, kind: output, shape index: {1}]  }
   0x1   :  { %922 = vset.pattern.permute.xlu2 %v930_v0  ;;  %921 = vset.pattern.permute.xlu1 %v930_v0  ;;  %v62_v1 = vld [vmem:[%s2165_s1 + $0x10] sm:$0xff]  ;;  %v60_v2 = vld [vmem:[%s2165_s1] sm:$0xff]  ;;  %v63_v6 = vld [vmem:[%s2165_s1 + $0x18] sm:$0xff] }
   0x2   :  { %920 = vset.pattern.permute.xlu0 %v930_v0  ;;  %vm113_vm0 = vcmp.eq.s32.totalorder %v62_v1, 0  ;;  %vm454_vm1 = vcmp.eq.s32.totalorder %v60_v2, 1  ;;  %vm111_vm2 = vcmp.eq.s32.totalorder %v60_v2, 0  ;;  %v61_v7 = vld [vmem:[%s2165_s1 + $0x8] sm:$0xff]  ;;  %vm114_vm3 = vcmp.eq.s32.totalorder %v63_v6, 0  ;;  %v64_v11 = vld [vmem:[%s2165_s1 + $0x20] sm:$0xff] }
   0x3   :  { %v129_v3 = vsel %vm113_vm0, 1, %v930_v0  ;;  %v470_v4 = vsel %vm454_vm1, 1, %v930_v0  ;;  %v127_v5 = vsel %vm111_vm2, 1, %v930_v0  ;;  %vm455_vm4 = vcmp.eq.s32.totalorder %v61_v7, 1  ;;  %v65_v15 = vld [vmem:[%s2165_s1 + $0x28] sm:$0xff]  ;;  %v67_v19 = vld [vmem:[%s2165_s1 + $0x38] sm:$0xff] }
   0x4   :  { %150 = vperm.xlu1 %921, %v129_v3   ;;  %487 = vperm.xlu2 %922, %v470_v4   ;;  %vm112_vm5 = vcmp.eq.s32.totalorder %v61_v7, 0  ;;  %v130_v8 = vsel %vm114_vm3, 1, %v930_v0  ;;  %v471_v9 = vsel %vm455_vm4, 1, %v930_v0  ;;  %vm457_vm6 = vcmp.eq.s32.totalorder %v63_v6, 1  ;;  %v66_v20 = vld [vmem:[%s2165_s1 + $0x30] sm:$0xff]  ;;  %v73_v21 = vld [vmem:[%s2165_s1 + $0x68] sm:$0xff] }
   0x5   :  { %144 = vperm.xlu0 %920, %v127_v5   ;;  %v128_v10 = vsel %vm112_vm5, 1, %v930_v0  ;;  %vm115_vm7 = vcmp.eq.s32.totalorder %v64_v11, 0  ;;  %vm456_vm8 = vcmp.eq.s32.totalorder %v62_v1, 1  ;;  %v473_v12 = vsel %vm457_vm6, 1, %v930_v0  ;;  %v72_v26 = vld [vmem:[%s2165_s1 + $0x60] sm:$0xff]  ;;  %v69_v28 = vld [vmem:[%s2165_s1 + $0x48] sm:$0xff] }
   0x6   :  { %v131_v13 = vsel %vm115_vm7, 1, %v930_v0  ;;  %v472_v14 = vsel %vm456_vm8, 1, %v930_v0  ;;  %vm458_vm9 = vcmp.eq.s32.totalorder %v64_v11, 1  ;;  %vm459_vm10 = vcmp.eq.s32.totalorder %v65_v15, 1  ;;  %v68_v27 = vld [vmem:[%s2165_s1 + $0x40] sm:$0xff]  ;;  %v74_v31 = vld [vmem:[%s2165_s1 + $0x70] sm:$0xff] }
   0x7   :  { %vm116_vm11 = vcmp.eq.s32.totalorder %v65_v15, 0  ;;  %v474_v16 = vsel %vm458_vm9, 1, %v930_v0  ;;  %v475_v17 = vsel %vm459_vm10, 1, %v930_v0  ;;  %vm118_vm12 = vcmp.eq.s32.totalorder %v67_v19, 0  ;;  %v75_v36 = vld [vmem:[%s2165_s1 + $0x78] sm:$0xff]  ;;  %v70_v37 = vld [vmem:[%s2165_s1 + $0x50] sm:$0xff] }
   0x8   :  { %v132_v18 = vsel %vm116_vm11, 1, %v930_v0  ;;  %vm460_vm13 = vcmp.eq.s32.totalorder %v66_v20, 1  ;;  %vm124_vm14 = vcmp.eq.s32.totalorder %v73_v21, 0  ;;  %vm117_vm15 = vcmp.eq.s32.totalorder %v66_v20, 0  ;;  %v71_v44 = vld [vmem:[%s2165_s1 + $0x58] sm:$0xff]  ;;  %v1064_v57 = vld [vmem:[%s2166_s0 + $0x10] sm:$0xff] }
   0x9   :  { %v140_v22 = vsel %vm124_vm14, 1, %v930_v0  ;;  %v134_v23 = vsel %vm118_vm12, 1, %v930_v0  ;;  %v476_v24 = vsel %vm460_vm13, 1, %v930_v0  ;;  %v133_v25 = vsel %vm117_vm15, 1, %v930_v0  ;;  %v1069_v58 = vld [vmem:[%s2166_s0] sm:$0xff]  ;;  %v1074_v59 = vld [vmem:[%s2166_s0 + $0x8] sm:$0xff] }
   0xa   :  { %vm466_vm0 = vcmp.eq.s32.totalorder %v72_v26, 1  ;;  %vm123_vm1 = vcmp.eq.s32.totalorder %v72_v26, 0  ;;  %vm119_vm2 = vcmp.eq.s32.totalorder %v68_v27, 0  ;;  %vm120_vm3 = vcmp.eq.s32.totalorder %v69_v28, 0  ;;  %v1079_v60 = vld [vmem:[%s2166_s0 + $0x18] sm:$0xff]  ;;  %v1087_v62 = vld [vmem:[%s2166_s0 + $0x50] sm:$0xff] }
   0xb   :  { %v482_v29 = vsel %vm466_vm0, 1, %v930_v0  ;;  %v139_v30 = vsel %vm123_vm1, 1, %v930_v0  ;;  %vm125_vm4 = vcmp.eq.s32.totalorder %v74_v31, 0  ;;  %vm461_vm5 = vcmp.eq.s32.totalorder %v67_v19, 1  ;;  %v1092_v63 = vld [vmem:[%s2166_s0 + $0x58] sm:$0xff]  ;;  %v33_v11 = vld [vmem:[%s2166_s0 + $0x28] sm:$0xff] }
   0xc   :  { %153 = vperm.xlu1 %921, %v130_v8   ;;  %490 = vperm.xlu2 %922, %v471_v9   ;;  %v141_v32 = vsel %vm125_vm4, 1, %v930_v0  ;;  %v135_v33 = vsel %vm119_vm2, 1, %v930_v0  ;;  %v136_v34 = vsel %vm120_vm3, 1, %v930_v0  ;;  %v477_v35 = vsel %vm461_vm5, 1, %v930_v0  ;;  %v1109_v5 = vld [vmem:[%s2166_s0 + $0x38] sm:$0xff]  ;;  %v1167_v26 = vld [vmem:[%s2166_s0 + $0x68] sm:$0xff] }
   0xd   :  { %147 = vperm.xlu0 %920, %v128_v10   ;;  %vm126_vm6 = vcmp.eq.s32.totalorder %v75_v36, 0  ;;  %vm467_vm7 = vcmp.eq.s32.totalorder %v73_v21, 1  ;;  %vm469_vm8 = vcmp.eq.s32.totalorder %v75_v36, 1  ;;  %vm463_vm9 = vcmp.eq.s32.totalorder %v69_v28, 1  ;;  %v32_v10 = vld [vmem:[%s2166_s0 + $0x20] sm:$0xff] }
   0xe   :  { %v142_v38 = vsel %vm126_vm6, 1, %v930_v0  ;;  %v483_v39 = vsel %vm467_vm7, 1, %v930_v0  ;;  %vm121_vm10 = vcmp.eq.s32.totalorder %v70_v37, 0  ;;  %v485_v40 = vsel %vm469_vm8, 1, %v930_v0  ;;  %v44_v36 = vld [vmem:[%s2166_s0 + $0x80] sm:$0xff] }
   0xf   :  { %vm462_vm11 = vcmp.eq.s32.totalorder %v68_v27, 1  ;;  %v479_v41 = vsel %vm463_vm9, 1, %v930_v0  ;;  %v137_v42 = vsel %vm121_vm10, 1, %v930_v0  ;;  %vm468_vm12 = vcmp.eq.s32.totalorder %v74_v31, 1 }
  0x10   :  { %v478_v43 = vsel %vm462_vm11, 1, %v930_v0  ;;  %v484_v45 = vsel %vm468_vm12, 1, %v930_v0  ;;  %vm464_vm13 = vcmp.eq.s32.totalorder %v70_v37, 1  ;;  %vm465_vm14 = vcmp.eq.s32.totalorder %v71_v44, 1 }
  0x11   :  { %vm122_vm15 = vcmp.eq.s32.totalorder %v71_v44, 0  ;;  %v480_v46 = vsel %vm464_vm13, 1, %v930_v0  ;;  %v481_v47 = vsel %vm465_vm14, 1, %v930_v0 }
  0x12   :  { %v138_v48 = vsel %vm122_vm15, 1, %v930_v0  ;;  %v1097_v0 = vld [vmem:[%s2166_s0 + $0x30] sm:$0xff] }
  0x14   :  { %496 = vperm.xlu1 %921, %v473_v12   ;;  %156 = vperm.xlu2 %922, %v131_v13  }
  0x15   :  { %493 = vperm.xlu0 %920, %v472_v14  }
  0x1c   :  { %499 = vperm.xlu1 %921, %v474_v16   ;;  %502 = vperm.xlu2 %922, %v475_v17  }
  0x1d   :  { %159 = vperm.xlu0 %920, %v132_v18  }
  0x24   :  { %165 = vperm.xlu1 %921, %v134_v23   ;;  %505 = vperm.xlu2 %922, %v476_v24   ;;  %v37_v24 = vld [vmem:[%s2166_s0 + $0x48] sm:$0xff] }
  0x25   :  { %162 = vperm.xlu0 %920, %v133_v25   ;;  %v1162_v25 = vld [vmem:[%s2166_s0 + $0x60] sm:$0xff] }
  0x2c   :  { %168 = vperm.xlu1 %921, %v135_v33   ;;  %171 = vperm.xlu2 %922, %v136_v34  }
  0x2d   :  { %508 = vperm.xlu0 %920, %v477_v35  }
  0x34   :  { %514 = vperm.xlu1 %921, %v479_v41   ;;  %174 = vperm.xlu2 %922, %v137_v42  }
  0x35   :  { %511 = vperm.xlu0 %920, %v478_v43   ;;  %v932_v43 = vmov 128  }
  0x36   :  { %26 = vst [vmem:[#allocation3] sm:$0xff] %v932_v43 }
  0x37   :  { %27 = vst [vmem:[#allocation3 + $0x8] sm:$0xff] %v932_v43 }
  0x3c   :  { %517 = vperm.xlu1 %921, %v480_v46   ;;  %520 = vperm.xlu2 %922, %v481_v47  }
  0x3d   :  { %177 = vperm.xlu0 %920, %v138_v48  }
  0x44   :  { %183 = vperm.xlu1 %921, %v140_v22   ;;  %523 = vperm.xlu2 %922, %v482_v29   ;;  %v36_v22 = vld [vmem:[%s2166_s0 + $0x40] sm:$0xff] }
  0x45   :  { %180 = vperm.xlu0 %920, %v139_v30  }
  0x4c   :  { %186 = vperm.xlu1 %921, %v141_v32   ;;  %189 = vperm.xlu2 %922, %v142_v38  }
  0x4d   :  { %526 = vperm.xlu0 %920, %v483_v39  }
  0x54   :  { %532 = vperm.xlu1 %921, %v485_v40   ;;  %v931_v40 = vmov -1e+30  }
  0x55   :  { %529 = vperm.xlu0 %920, %v484_v45   ;;  %24 = vst [vmem:[#allocation2] sm:$0xff] %v931_v40 }
  0x56   :  { %25 = vst [vmem:[#allocation2 + $0x8] sm:$0xff] %v931_v40  ;;  %v50_v40 = vld [vmem:[%s2166_s0 + $0xb0] sm:$0xff] }
  0x5e   :  { %v488_v49 = vpop.permute.xlu2 %487 }
  0x5f   :  { %vm534_vm0 = vcmp.eq.s32.totalorder %v488_v49, 1 }
  0x60   :  { %v1082_v61 = vsel %vm534_vm0, %v1069_v58, -1e+30  ;;  %v1100_v3 = vsel %vm534_vm0, %v1074_v59, -1e+30 }
  0x61   :  { %2250 = vst [vmem:[#allocation4_spill] sm:$0xff] %v1082_v61 }
  0x62   :  { %2251 = vst [vmem:[#allocation5_spill] sm:$0xff] %v1100_v3 }
  0x66   :  { %v491_v50 = vpop.permute.xlu2 %490 }
  0x67   :  { %vm535_vm1 = vcmp.eq.s32.totalorder %v491_v50, 1 }
  0x68   :  { %v1104_v4 = vsel %vm535_vm1, %v1064_v57, -1e+30  ;;  %v1113_v7 = vsel %vm535_vm1, %v1079_v60, -1e+30 }
  0x69   :  { %2252 = vst [vmem:[#allocation6_spill] sm:$0xff] %v1104_v4 }
  0x6a   :  { %2253 = vst [vmem:[#allocation7_spill] sm:$0xff] %v1113_v7 }
  0x6e   :  { %v1051_v51 = vpop.permute.xlu2 %156 }
  0x6f   :  { %vm195_vm11 = vcmp.eq.s32.totalorder %v1051_v51, 1 }
  0x76   :  { %v1053_v52 = vpop.permute.xlu1 %150  ;;  %v503_v54 = vpop.permute.xlu2 %502 }
  0x77   :  { %v1055_v53 = vpop.permute.xlu0 %144  ;;  %vm539_vm2 = vcmp.eq.s32.totalorder %v503_v54, 1  ;;  %vm193_vm7 = vcmp.eq.s32.totalorder %v1053_v52, 1 }
  0x78   :  { %v1129_v12 = vsel %vm539_vm2, %v1087_v62, -1e+30  ;;  %v1137_v15 = vsel %vm539_vm2, %v1092_v63, -1e+30  ;;  %vm191_vm8 = vcmp.eq.s32.totalorder %v1055_v53, 1 }
  0x79   :  { %2256 = vst [vmem:[#allocation10_spill] sm:$0xff] %v1129_v12  ;;  %v1207_v47 = vsel %vm193_vm7, %v32_v10, -1e+30  ;;  %v1210_v48 = vsel %vm191_vm8, %v1069_v58, -1e+30  ;;  %v42_v58 = vld [vmem:[%s2166_s0 + $0x70] sm:$0xff] }
  0x7a   :  { %2257 = vst [vmem:[#allocation11_spill] sm:$0xff] %v1137_v15  ;;  %v1213_v49 = vsel %vm193_vm7, %v33_v11, -1e+30  ;;  %v1216_v50 = vsel %vm191_vm8, %v1074_v59, -1e+30  ;;  %v239_v54 = vmax.f32 %v1210_v48, %v1207_v47 }
  0x7b   :  { %v1237_v59 = vsel %vm195_vm11, %v36_v22, -1e+30 }
  0x7e   :  { %v1057_v55 = vpop.permute.xlu1 %153  ;;  %v506_v1 = vpop.permute.xlu2 %505 }
  0x7f   :  { %v1059_v56 = vpop.permute.xlu0 %147  ;;  %vm540_vm5 = vcmp.eq.s32.totalorder %v506_v1, 1  ;;  %vm194_vm9 = vcmp.eq.s32.totalorder %v1057_v55, 1  ;;  %v43_v1 = vld [vmem:[%s2166_s0 + $0x78] sm:$0xff] }
  0x80   :  { %v1182_v33 = vsel %vm540_vm5, %v1162_v25, -1e+30  ;;  %v1185_v34 = vsel %vm540_vm5, %v1167_v26, -1e+30  ;;  %vm192_vm10 = vcmp.eq.s32.totalorder %v1059_v56, 1 }
  0x81   :  { %v1219_v52 = vsel %vm194_vm9, %v1097_v0, -1e+30  ;;  %v1222_v53 = vsel %vm192_vm10, %v1064_v57, -1e+30  ;;  %v1227_v55 = vsel %vm194_vm9, %v1109_v5, -1e+30  ;;  %v260_v57 = vmax.f32 %v1216_v50, %v1213_v49 }
  0x82   :  { %v1230_v56 = vsel %vm192_vm10, %v1079_v60, -1e+30 }
  0x83   :  { %v261_v51 = vmax.f32 %v1230_v56, %v1227_v55 }
  0x86   :  { %v497_v2 = vpop.permute.xlu1 %496  ;;  %v1169_v28 = vpop.permute.xlu2 %171 }
  0x87   :  { %vm537_vm3 = vcmp.eq.s32.totalorder %v497_v2, 1  ;;  %v494_v6 = vpop.permute.xlu0 %493  ;;  %v1255_v2 = vsel %vm195_vm11, %v37_v24, -1e+30  ;;  %vm200_vm14 = vcmp.eq.s32.totalorder %v1169_v28, 1 }
  0x88   :  { %v1116_v8 = vsel %vm537_vm3, %v1097_v0, -1e+30  ;;  %v1119_v9 = vsel %vm537_vm3, %v1109_v5, -1e+30  ;;  %vm536_vm4 = vcmp.eq.s32.totalorder %v494_v6, 1  ;;  %v1244_v0 = vld [vmem:[%s2166_s0 + $0x90] sm:$0xff]  ;;  %v240_v5 = vmax.f32 %v1222_v53, %v1219_v52 }
  0x89   :  { %2254 = vst [vmem:[#allocation8_spill] sm:$0xff] %v1116_v8  ;;  %v583_v13 = vmax.f32 %v1104_v4, %v1116_v8  ;;  %v604_v14 = vmax.f32 %v1113_v7, %v1119_v9  ;;  %v1139_v16 = vsel %vm536_vm4, %v32_v10, -1e+30  ;;  %v1141_v17 = vsel %vm536_vm4, %v33_v11, -1e+30  ;;  %v1262_v6 = vld [vmem:[%s2166_s0 + $0x98] sm:$0xff] }
  0x8a   :  { %2255 = vst [vmem:[#allocation9_spill] sm:$0xff] %v1119_v9  ;;  %v582_v18 = vmax.f32 %v1082_v61, %v1139_v16  ;;  %v603_v19 = vmax.f32 %v1100_v3, %v1141_v17  ;;  %v262_v43 = vmax.f32 %v260_v57, %v1255_v2 }
  0x8b   :  { %2258 = vst [vmem:[#allocation12_spill] sm:$0xff] %v1139_v16  ;;  %v1148_v20 = vmax.f32 %v583_v13, %v1129_v12  ;;  %v1151_v21 = vmax.f32 %v604_v14, %v1137_v15  ;;  %v53_v12 = vld [vmem:[%s2166_s0 + $0xc8] sm:$0xff]  ;;  %v1374_v16 = vld [vmem:[%s2166_s0 + $0xd8] sm:$0xff] }
  0x8c   :  { %2259 = vst [vmem:[#allocation13_spill] sm:$0xff] %v1141_v17 }
  0x8e   :  { %v500_v23 = vpop.permute.xlu1 %499  ;;  %v1191_v39 = vpop.permute.xlu2 %174 }
  0x8f   :  { %vm538_vm6 = vcmp.eq.s32.totalorder %v500_v23, 1  ;;  %v160_v27 = vpop.permute.xlu0 %159  ;;  %vm201_vm0 = vcmp.eq.s32.totalorder %v1191_v39, 1  ;;  %v241_v23 = vmax.f32 %v239_v54, %v1237_v59  ;;  %v1352_v39 = vld [vmem:[%s2166_s0 + $0xd0] sm:$0xff] }
  0x90   :  { %v1171_v29 = vsel %vm538_vm6, %v36_v22, -1e+30  ;;  %v1173_v30 = vsel %vm538_vm6, %v37_v24, -1e+30  ;;  %vm196_vm12 = vcmp.eq.s32.totalorder %v160_v27, 1 }
  0x91   :  { %2260 = vst [vmem:[#allocation14_spill] sm:$0xff] %v1171_v29  ;;  %v1176_v31 = vmax.f32 %v582_v18, %v1171_v29  ;;  %v1179_v32 = vmax.f32 %v603_v19, %v1173_v30  ;;  %v1248_v60 = vsel %vm196_vm12, %v1087_v62, -1e+30  ;;  %v1267_v62 = vsel %vm196_vm12, %v1092_v63, -1e+30  ;;  %v1279_v18 = vld [vmem:[%s2166_s0 + $0xa0] sm:$0xff] }
  0x92   :  { %2261 = vst [vmem:[#allocation15_spill] sm:$0xff] %v1173_v30  ;;  %v1284_v63 = vld [vmem:[%s2166_s0 + $0xa8] sm:$0xff]  ;;  %v242_v19 = vmax.f32 %v240_v5, %v1248_v60  ;;  %v1293_v24 = vsel %vm200_vm14, %v1244_v0, -1e+30  ;;  %v1296_v27 = vsel %vm200_vm14, %v1262_v6, -1e+30  ;;  %v263_v28 = vmax.f32 %v261_v51, %v1267_v62 }
  0x93   :  { %v1322_v57 = vsel %vm201_vm0, %v1279_v18, -1e+30 }
  0x96   :  { %v166_v37 = vpop.permute.xlu1 %165  ;;  %v1197_v44 = vpop.permute.xlu2 %520 }
  0x97   :  { %v163_v38 = vpop.permute.xlu0 %162  ;;  %vm198_vm13 = vcmp.eq.s32.totalorder %v166_v37, 1  ;;  %v51_v37 = vld [vmem:[%s2166_s0 + $0xb8] sm:$0xff]  ;;  %vm545_vm1 = vcmp.eq.s32.totalorder %v1197_v44, 1 }
  0x98   :  { %v1274_v13 = vsel %vm198_vm13, %v42_v58, -1e+30  ;;  %vm197_vm15 = vcmp.eq.s32.totalorder %v163_v38, 1  ;;  %v1289_v22 = vsel %vm198_vm13, %v43_v1, -1e+30 }
  0x99   :  { %v244_v54 = vmax.f32 %v242_v19, %v1274_v13  ;;  %v1310_v5 = vsel %vm197_vm15, %v1162_v25, -1e+30  ;;  %v1314_v51 = vsel %vm197_vm15, %v1167_v26, -1e+30  ;;  %v265_v19 = vmax.f32 %v263_v28, %v1289_v22  ;;  %v1328_v25 = vld [vmem:[%s2166_s0 + $0x88] sm:$0xff]  ;;  %v52_v26 = vld [vmem:[%s2166_s0 + $0xc0] sm:$0xff] }
  0x9a   :  { %v1337_v38 = vsel %vm201_vm0, %v1284_v63, -1e+30  ;;  %v1340_v28 = vsel %vm545_vm1, %v50_v40, -1e+30  ;;  %v1342_v35 = vsel %vm545_vm1, %v51_v37, -1e+30  ;;  %v264_v15 = vmax.f32 %v262_v43, %v1314_v51 }
  0x9b   :  { %2262 = vst [vmem:[#allocation16_spill] sm:$0xff] %v1340_v28  ;;  %v267_v17 = vmax.f32 %v265_v19, %v1296_v27 }
  0x9e   :  { %v1193_v41 = vpop.permute.xlu1 %168  ;;  %v524_v10 = vpop.permute.xlu2 %523 }
  0x9f   :  { %v1195_v42 = vpop.permute.xlu0 %508  ;;  %vm199_vm2 = vcmp.eq.s32.totalorder %v1193_v41, 1  ;;  %vm546_vm3 = vcmp.eq.s32.totalorder %v524_v10, 1  ;;  %v243_v41 = vmax.f32 %v241_v23, %v1310_v5  ;;  %v246_v23 = vmax.f32 %v244_v54, %v1293_v24 }
  0xa0   :  { %vm541_vm4 = vcmp.eq.s32.totalorder %v1195_v42, 1  ;;  %v1354_v30 = vsel %vm199_vm2, %v44_v36, -1e+30  ;;  %v1357_v44 = vsel %vm199_vm2, %v1328_v25, -1e+30 }
  0xa1   :  { %v1360_v29 = vsel %vm546_vm3, %v52_v26, -1e+30  ;;  %v1365_v9 = vsel %vm541_vm4, %v42_v58, -1e+30  ;;  %v1378_v54 = vsel %vm541_vm4, %v43_v1, -1e+30  ;;  %v245_v19 = vmax.f32 %v243_v41, %v1354_v30 }
  0xa2   :  { %2263 = vst [vmem:[#allocation17_spill] sm:$0xff] %v1365_v9  ;;  %v266_v61 = vmax.f32 %v264_v15, %v1357_v44  ;;  %v1393_v42 = vsel %vm546_vm3, %v53_v12, -1e+30  ;;  %v587_v1 = vmax.f32 %v1148_v20, %v1365_v9  ;;  %v59_v15 = vld [vmem:[%s2166_s0 + $0xf8] sm:$0xff]  ;;  %v608_v10 = vmax.f32 %v1151_v21, %v1378_v54  ;;  %v56_v21 = vld [vmem:[%s2166_s0 + $0xe0] sm:$0xff] }
  0xa3   :  { %2265 = vst [vmem:[#allocation19_spill] sm:$0xff] %v1378_v54 }
  0xa6   :  { %v1201_v45 = vpop.permute.xlu1 %514  ;;  %v190_v58 = vpop.permute.xlu2 %189 }
  0xa7   :  { %v1203_v46 = vpop.permute.xlu0 %511  ;;  %vm543_vm7 = vcmp.eq.s32.totalorder %v1201_v45, 1  ;;  %vm206_vm9 = vcmp.eq.s32.totalorder %v190_v58, 1 }
  0xa8   :  { %v1404_v41 = vsel %vm543_vm7, %v1244_v0, -1e+30  ;;  %vm542_vm10 = vcmp.eq.s32.totalorder %v1203_v46, 1  ;;  %v1438_v45 = vsel %vm206_vm9, %v59_v15, -1e+30 }
  0xa9   :  { %2270 = vst [vmem:[#allocation23_spill] sm:$0xff] %v1404_v41 }
  0xae   :  { %v1269_v11 = vpop.permute.xlu1 %517 }
  0xaf   :  { %v178_v14 = vpop.permute.xlu0 %177  ;;  %vm544_vm11 = vcmp.eq.s32.totalorder %v1269_v11, 1 }
  0xb0   :  { %vm202_vm5 = vcmp.eq.s32.totalorder %v178_v14, 1  ;;  %v1464_v46 = vsel %vm544_vm11, %v1279_v18, -1e+30  ;;  %v2278_v18 = vmax.f32 %v1179_v32, %v1185_v34 }
  0xb1   :  { %v1368_v8 = vsel %vm202_vm5, %v50_v40, -1e+30  ;;  %v1382_v3 = vsel %vm202_vm5, %v51_v37, -1e+30  ;;  %v2267_v40 = vlaneseq  ;;  %2273 = vst [vmem:[#allocation26_spill] sm:$0xff] %v1464_v46 }
  0xb2   :  { %2264 = vst [vmem:[#allocation18_spill] sm:$0xff] %v1368_v8  ;;  %v248_v14 = vmax.f32 %v246_v23, %v1368_v8  ;;  %v269_v20 = vmax.f32 %v267_v17, %v1382_v3  ;;  %v247_v8 = vmax.f32 %v245_v19, %v1322_v57  ;;  %v268_v17 = vmax.f32 %v266_v61, %v1337_v38 }
  0xb3   :  { %2266 = vst [vmem:[#allocation20_spill] sm:$0xff] %v1382_v3  ;;  %v1385_v4 = vshrl.u32 %v2267_v40, 7  ;;  %v1424_v40 = vsel %vm543_vm7, %v1262_v6, -1e+30  ;;  %v1442_v6 = vsel %vm542_vm10, %v44_v36, -1e+30 }
  0xb4   :  { %2271 = vst [vmem:[#allocation24_spill] sm:$0xff] %v1424_v40 }
  0xb6   :  { %v184_v43 = vpop.permute.xlu1 %183 }
  0xb7   :  { %vm204_vm6 = vcmp.eq.s32.totalorder %v184_v43, 1  ;;  %v181_v7 = vpop.permute.xlu0 %180 }
  0xb8   :  { %v1390_v43 = vsel %vm204_vm6, %v1352_v39, -1e+30  ;;  %vm203_vm8 = vcmp.eq.s32.totalorder %v181_v7, 1  ;;  %v1399_v37 = vsel %vm204_vm6, %v1374_v16, -1e+30  ;;  %v58_v7 = vld [vmem:[%s2166_s0 + $0xf0] sm:$0xff] }
  0xb9   :  { %2268 = vst [vmem:[#allocation21_spill] sm:$0xff] %v1390_v43  ;;  %v250_v23 = vmax.f32 %v248_v14, %v1390_v43  ;;  %v1417_v0 = vsel %vm203_vm8, %v52_v26, -1e+30  ;;  %v1419_v9 = vsel %vm203_vm8, %v53_v12, -1e+30  ;;  %v271_v58 = vmax.f32 %v269_v20, %v1399_v37  ;;  %v57_v12 = vld [vmem:[%s2166_s0 + $0xe8] sm:$0xff] }
  0xba   :  { %2269 = vst [vmem:[#allocation22_spill] sm:$0xff] %v1399_v37  ;;  %v589_v26 = vmax.f32 %v587_v1, %v1404_v41  ;;  %v1436_v14 = vsel %vm206_vm9, %v58_v7, -1e+30  ;;  %v249_v61 = vmax.f32 %v247_v8, %v1417_v0  ;;  %v270_v20 = vmax.f32 %v268_v17, %v1419_v9 }
  0xbb   :  { %v1450_v1 = vsel %vm542_vm10, %v1328_v25, -1e+30  ;;  %v252_v41 = vmax.f32 %v250_v23, %v1436_v14  ;;  %v273_v43 = vmax.f32 %v271_v58, %v1438_v45  ;;  %v610_v17 = vmax.f32 %v608_v10, %v1424_v40 }
  0xbc   :  { %2272 = vst [vmem:[#allocation25_spill] sm:$0xff] %v1450_v1  ;;  %v1467_v25 = vadd.s32 8, %v1385_v4  ;;  %v1470_v23 = vadd.s32 16, %v1385_v4  ;;  %v2276_v58 = vmax.f32 %v1176_v31, %v1182_v33  ;;  %v1479_v10 = vsel %vm544_vm11, %v1284_v63, -1e+30 }
  0xbd   :  { %2277 = vst [vmem:[#allocation29_spill] sm:$0xff] %v1479_v10  ;;  %v609_v40 = vmax.f32 %v2278_v18, %v1450_v1  ;;  %v591_v31 = vmax.f32 %v589_v26, %v1340_v28 }
  0xbe   :  { %v187_v19 = vpop.permute.xlu1 %186  ;;  %2274 = vst [vmem:[#allocation27_spill] sm:$0xff] %v1467_v25  ;;  %v1486_v25 = vadd.s32 24, %v1385_v4 }
  0xbf   :  { %vm205_vm12 = vcmp.eq.s32.totalorder %v187_v19, 1  ;;  %v527_v54 = vpop.permute.xlu0 %526  ;;  %2275 = vst [vmem:[#allocation28_spill] sm:$0xff] %v1470_v23  ;;  %v588_v19 = vmax.f32 %v2276_v58, %v1442_v6  ;;  %v611_v32 = vmax.f32 %v609_v40, %v1479_v10 }
  0xc0   :  { %v1453_v37 = vsel %vm205_vm12, %v56_v21, -1e+30  ;;  %v1455_v36 = vsel %vm205_vm12, %v57_v12, -1e+30  ;;  %vm547_vm13 = vcmp.eq.s32.totalorder %v527_v54, 1 }
  0xc1   :  { %v251_v3 = vmax.f32 %v249_v61, %v1453_v37  ;;  %v272_v8 = vmax.f32 %v270_v20, %v1455_v36  ;;  %v1490_v23 = vsel %vm547_vm13, %v1352_v39, -1e+30  ;;  %v590_v11 = vmax.f32 %v588_v19, %v1464_v46 }
  0xc2   :  { %v612_v39 = vmax.f32 %v610_v17, %v1342_v35  ;;  %v593_v19 = vmax.f32 %v591_v31, %v1490_v23 }
  0xc3   :  { %v253_v61 = vmax.f32 %v251_v3, %v252_v41  ;;  %v274_v20 = vmax.f32 %v272_v8, %v273_v43  ;;  %v1496_v3 = vsel %vm547_vm13, %v1374_v16, -1e+30  ;;  %v1500_v43 = vadd.s32 32, %v1385_v4 }
  0xc4   :  { %2279 = vst [vmem:[#allocation30_spill] sm:$0xff] %v1496_v3  ;;  %v1503_v41 = vadd.s32 40, %v1385_v4  ;;  %v614_v16 = vmax.f32 %v612_v39, %v1496_v3  ;;  %v592_v17 = vmax.f32 %v590_v11, %v1360_v29  ;;  %v1525_v39 = vadd.s32 56, %v1385_v4 }
  0xc5   :  { %v254_v63 = vrot.slane %v253_v61, 4  ;;  %v275_v58 = vrot.slane %v274_v20, 4  ;;  %v1528_v11 = vadd.s32 64, %v1385_v4  ;;  %v2296_v3 = vld [vmem:[#allocation27_spill] sm:$0xff] }
  0xc6   :  { %v533_v8 = vpop.permute.xlu1 %532 }
  0xc7   :  { %v255_v26 = vmax.f32 %v253_v61, %v254_v63  ;;  %v276_v18 = vmax.f32 %v274_v20, %v275_v58  ;;  %vm549_vm14 = vcmp.eq.s32.totalorder %v533_v8, 1  ;;  %v530_v28 = vpop.permute.xlu0 %529  ;;  %v613_v63 = vmax.f32 %v611_v32, %v1393_v42  ;;  %2284 = vst [vmem:[#allocation35_spill] sm:$0xff] %v1528_v11  ;;  %v1537_v8 = vld [vmem:[#allocation2] ss:$8 sm:$0x3] }
  0xc8   :  { %v1508_v54 = vsel %vm549_vm14, %v58_v7, -1e+30  ;;  %v1510_v40 = vsel %vm549_vm14, %v59_v15, -1e+30  ;;  %vm548_vm15 = vcmp.eq.s32.totalorder %v530_v28, 1  ;;  %v1521_v7 = vadd.s32 48, %v1385_v4 }
  0xc9   :  { %2280 = vst [vmem:[#allocation31_spill] sm:$0xff] %v1508_v54  ;;  %v256_v10 = vrot.slane %v255_v26, 2  ;;  %v277_v46 = vrot.slane %v276_v18, 2  ;;  %v595_v1 = vmax.f32 %v593_v19, %v1508_v54  ;;  %v616_v61 = vmax.f32 %v614_v16, %v1510_v40 }
  0xca   :  { %2281 = vst [vmem:[#allocation32_spill] sm:$0xff] %v1510_v40  ;;  %v1515_v20 = vsel %vm548_vm15, %v56_v21, -1e+30  ;;  %v1517_v31 = vsel %vm548_vm15, %v57_v12, -1e+30  ;;  %v1531_v21 = vadd.s32 72, %v1385_v4 }
  0xcb   :  { %2282 = vst [vmem:[#allocation33_spill] sm:$0xff] %v1515_v20  ;;  %v257_v15 = vmax.f32 %v255_v26, %v256_v10  ;;  %v278_v58 = vmax.f32 %v276_v18, %v277_v46  ;;  %v594_v28 = vmax.f32 %v592_v17, %v1515_v20  ;;  %v615_v12 = vmax.f32 %v613_v63, %v1517_v31 }
  0xcc   :  { %2283 = vst [vmem:[#allocation34_spill] sm:$0xff] %v1517_v31  ;;  %v1535_v32 = vadd.s32 80, %v1385_v4  ;;  %v1542_v18 = vadd.s32 88, %v1385_v4  ;;  %v1545_v19 = vadd.s32 96, %v1385_v4  ;;  %v1548_v16 = vadd.s32 104, %v1385_v4 }
  0xcd   :  { %2285 = vst [vmem:[#allocation36_spill] sm:$0xff] %v1531_v21  ;;  %v258_v10 = vrot.slane %v257_v15, 1  ;;  %v279_v46 = vrot.slane %v278_v58, 1  ;;  %v1539_v26 = vmax.f32 %v594_v28, %v595_v1  ;;  %v1550_v17 = vmax.f32 %v615_v12, %v616_v61  ;;  %v2292_v61 = vld [vmem:[#allocation18_spill] sm:$0xff]  ;;  %v2297_v28 = vld [vmem:[#allocation28_spill] sm:$0xff] }
  0xce   :  { %2286 = vst [vmem:[#allocation37_spill] sm:$0xff] %v1535_v32  ;;  %v1553_v63 = vadd.s32 112, %v1385_v4  ;;  %v1556_v40 = vadd.s32 120, %v1385_v4  ;;  %v2295_v12 = vld [vmem:[#allocation22_spill] sm:$0xff] }
  0xcf   :  { %2287 = vst [vmem:[#allocation38_spill] sm:$0xff] %v1542_v18  ;;  %v1558_v54 = vmax.f32 %v257_v15, %v258_v10  ;;  %v1560_v1 = vmax.f32 %v278_v58, %v279_v46  ;;  %v2293_v15 = vld [vmem:[#allocation20_spill] sm:$0xff]  ;;  %v2294_v58 = vld [vmem:[#allocation21_spill] sm:$0xff] }
  0xd0   :  { %2288 = vst [vmem:[#allocation39_spill] sm:$0xff] %v1545_v19 }
  0xd1   :  { %2289 = vst [vmem:[#allocation40_spill] sm:$0xff] %v1548_v16  ;;  %vm281_vm0 = vcmp.eq.f32.partialorder %v1210_v48, %v1558_v54  ;;  %vm282_vm1 = vcmp.eq.f32.partialorder %v1216_v50, %v1560_v1  ;;  %vm283_vm2 = vcmp.eq.f32.partialorder %v1222_v53, %v1558_v54  ;;  %vm284_vm3 = vcmp.eq.f32.partialorder %v1230_v56, %v1560_v1 }
  0xd2   :  { %2290 = vst [vmem:[#allocation41_spill] sm:$0xff] %v1553_v63  ;;  %vm285_vm4 = vcmp.eq.f32.partialorder %v1207_v47, %v1558_v54  ;;  %vm286_vm5 = vcmp.eq.f32.partialorder %v1213_v49, %v1560_v1  ;;  %vm287_vm6 = vcmp.eq.f32.partialorder %v1219_v52, %v1558_v54  ;;  %vm288_vm7 = vcmp.eq.f32.partialorder %v1227_v55, %v1560_v1 }
  0xd3   :  { %2291 = vst [vmem:[#allocation42_spill] sm:$0xff] %v1556_v40  ;;  %vm289_vm8 = vcmp.eq.f32.partialorder %v1237_v59, %v1558_v54  ;;  %vm306_vm11 = vcmp.eq.f32.partialorder %v1419_v9, %v1560_v1  ;;  %vm307_vm12 = vcmp.eq.f32.partialorder %v2294_v58, %v1558_v54  ;;  %vm308_vm13 = vcmp.eq.f32.partialorder %v2295_v12, %v1560_v1 }
  0xd4   :  { %vm309_vm14 = vcmp.eq.f32.partialorder %v1453_v37, %v1558_v54  ;;  %vm310_vm15 = vcmp.eq.f32.partialorder %v1455_v36, %v1560_v1  ;;  %vm311_vm9 = vcmp.eq.f32.partialorder %v1436_v14, %v1558_v54  ;;  %vm312_vm10 = vcmp.eq.f32.partialorder %v1438_v45, %v1560_v1 }
  0xd5   :  { %v313_v10 = vsel %vm281_vm0, %v1385_v4, 128  ;;  %v314_v46 = vsel %vm282_vm1, %v1385_v4, 128  ;;  %v315_v20 = vsel %vm283_vm2, %v2296_v3, 128  ;;  %v316_v31 = vsel %vm284_vm3, %v2296_v3, 128 }
  0xd6   :  { %v317_v48 = vsel %vm285_vm4, %v2297_v28, 128  ;;  %v318_v50 = vsel %vm286_vm5, %v2297_v28, 128  ;;  %v319_v53 = vsel %vm287_vm6, %v1486_v25, 128  ;;  %v320_v56 = vsel %vm288_vm7, %v1486_v25, 128 }
  0xd7   :  { %v321_v47 = vsel %vm289_vm8, %v1500_v43, 128  ;;  %vm2298_vm0 = vcmp.eq.f32.partialorder %v1255_v2, %v1560_v1  ;;  %vm2299_vm1 = vcmp.eq.f32.partialorder %v1248_v60, %v1558_v54  ;;  %vm2300_vm2 = vcmp.eq.f32.partialorder %v1267_v62, %v1560_v1 }
  0xd8   :  { %v322_v49 = vsel %vm2298_vm0, %v1500_v43, 128  ;;  %v323_v52 = vsel %vm2299_vm1, %v1503_v41, 128  ;;  %v324_v55 = vsel %vm2300_vm2, %v1503_v41, 128  ;;  %vm2301_vm3 = vcmp.eq.f32.partialorder %v1310_v5, %v1558_v54 }
  0xd9   :  { %v325_v59 = vsel %vm2301_vm3, %v1521_v7, 128  ;;  %vm2302_vm4 = vcmp.eq.f32.partialorder %v1314_v51, %v1560_v1  ;;  %vm2303_vm5 = vcmp.eq.f32.partialorder %v1274_v13, %v1558_v54  ;;  %vm2304_vm6 = vcmp.eq.f32.partialorder %v1289_v22, %v1560_v1 }
  0xda   :  { %v326_v2 = vsel %vm2302_vm4, %v1521_v7, 128  ;;  %v327_v60 = vsel %vm2303_vm5, %v1525_v39, 128  ;;  %v328_v62 = vsel %vm2304_vm6, %v1525_v39, 128  ;;  %vm2305_vm7 = vcmp.eq.f32.partialorder %v1354_v30, %v1558_v54 }
  0xdb   :  { %v329_v5 = vsel %vm2305_vm7, %v1528_v11, 128  ;;  %vm2306_vm8 = vcmp.eq.f32.partialorder %v1357_v44, %v1560_v1  ;;  %vm2307_vm0 = vcmp.eq.f32.partialorder %v1293_v24, %v1558_v54  ;;  %vm2308_vm1 = vcmp.eq.f32.partialorder %v1296_v27, %v1560_v1 }
  0xdc   :  { %v330_v51 = vsel %vm2306_vm8, %v1528_v11, 128  ;;  %v331_v13 = vsel %vm2307_vm0, %v1531_v21, 128  ;;  %v332_v22 = vsel %vm2308_vm1, %v1531_v21, 128  ;;  %vm2309_vm2 = vcmp.eq.f32.partialorder %v1322_v57, %v1558_v54 }
  0xdd   :  { %v333_v30 = vsel %vm2309_vm2, %v1535_v32, 128  ;;  %vm2310_vm3 = vcmp.eq.f32.partialorder %v1337_v38, %v1560_v1  ;;  %vm2311_vm4 = vcmp.eq.f32.partialorder %v2292_v61, %v1558_v54  ;;  %vm2312_vm5 = vcmp.eq.f32.partialorder %v2293_v15, %v1560_v1 }
  0xde   :  { %v334_v44 = vsel %vm2310_vm3, %v1535_v32, 128  ;;  %v335_v24 = vsel %vm2311_vm4, %v1542_v18, 128  ;;  %v336_v27 = vsel %vm2312_vm5, %v1542_v18, 128  ;;  %vm2313_vm6 = vcmp.eq.f32.partialorder %v1417_v0, %v1558_v54 }
  0xdf   :  { %v337_v57 = vsel %vm2313_vm6, %v1545_v19, 128  ;;  %v338_v38 = vsel %vm306_vm11, %v1545_v19, 128  ;;  %v339_v61 = vsel %vm307_vm12, %v1548_v16, 128  ;;  %v340_v15 = vsel %vm308_vm13, %v1548_v16, 128 }
  0xe0   :  { %v1746_v0 = vsel %vm309_vm14, %v1553_v63, 128  ;;  %v1752_v9 = vsel %vm310_vm15, %v1553_v63, 128  ;;  %v1758_v58 = vsel %vm311_vm9, %v1556_v40, 128  ;;  %v1764_v12 = vsel %vm312_vm10, %v1556_v40, 128 }
  0xe1   :  { %vm345_vm11 = vcmp.lt.s32.totalorder %v313_v10, %v317_v48  ;;  %vm347_vm12 = vcmp.lt.s32.totalorder %v315_v20, %v319_v53  ;;  %vm384_vm13 = vcmp.lt.s32.totalorder %v314_v46, %v318_v50  ;;  %vm386_vm14 = vcmp.lt.s32.totalorder %v316_v31, %v320_v56 }
  0xe2   :  { %v346_v37 = vsel %vm345_vm11, %v313_v10, %v317_v48  ;;  %v348_v36 = vsel %vm347_vm12, %v315_v20, %v319_v53  ;;  %v385_v63 = vsel %vm384_vm13, %v314_v46, %v318_v50  ;;  %v387_v16 = vsel %vm386_vm14, %v316_v31, %v320_v56  ;;  %v817_v53 = vld [vmem:[%s2168_s2 + $0x70] sm:$0xff] }
  0xe3   :  { %vm349_vm15 = vcmp.lt.s32.totalorder %v346_v37, %v321_v47  ;;  %vm351_vm7 = vcmp.lt.s32.totalorder %v348_v36, %v323_v52  ;;  %vm388_vm8 = vcmp.lt.s32.totalorder %v385_v63, %v322_v49  ;;  %vm390_vm0 = vcmp.lt.s32.totalorder %v387_v16, %v324_v55  ;;  %v833_v56 = vld [vmem:[%s2168_s2 + $0xf0] sm:$0xff] }
  0xe4   :  { %v350_v14 = vsel %vm349_vm15, %v346_v37, %v321_v47  ;;  %v352_v19 = vsel %vm351_vm7, %v348_v36, %v323_v52  ;;  %v389_v18 = vsel %vm388_vm8, %v385_v63, %v322_v49  ;;  %v391_v32 = vsel %vm390_vm0, %v387_v16, %v324_v55  ;;  %v431_v37 = vld [vmem:[#allocation3] ss:$8 sm:$0x3] }
  0xe5   :  { %vm353_vm9 = vcmp.lt.s32.totalorder %v350_v14, %v325_v59  ;;  %vm355_vm1 = vcmp.lt.s32.totalorder %v352_v19, %v327_v60  ;;  %vm392_vm10 = vcmp.lt.s32.totalorder %v389_v18, %v326_v2  ;;  %vm394_vm2 = vcmp.lt.s32.totalorder %v391_v32, %v328_v62 }
  0xe6   :  { %v354_v45 = vsel %vm353_vm9, %v350_v14, %v325_v59  ;;  %v356_v40 = vsel %vm355_vm1, %v352_v19, %v327_v60  ;;  %v393_v21 = vsel %vm392_vm10, %v389_v18, %v326_v2  ;;  %v395_v11 = vsel %vm394_vm2, %v391_v32, %v328_v62  ;;  %v818_v32 = vld [vmem:[%s2168_s2 + $0x78] sm:$0xff]  ;;  %v2332_v62 = vld [vmem:[#allocation13_spill] sm:$0xff] }
  0xe7   :  { %vm357_vm3 = vcmp.lt.s32.totalorder %v354_v45, %v329_v5  ;;  %vm359_vm4 = vcmp.lt.s32.totalorder %v356_v40, %v331_v13  ;;  %vm396_vm5 = vcmp.lt.s32.totalorder %v393_v21, %v330_v51  ;;  %vm398_vm6 = vcmp.lt.s32.totalorder %v395_v11, %v332_v22  ;;  %839 = vmatpush.msra.mxu0 %v818_v32 }
  0xe8   :  { %v358_v20 = vsel %vm357_vm3, %v354_v45, %v329_v5  ;;  %v360_v31 = vsel %vm359_vm4, %v356_v40, %v331_v13  ;;  %v397_v10 = vsel %vm396_vm5, %v393_v21, %v330_v51  ;;  %v399_v46 = vsel %vm398_vm6, %v395_v11, %v332_v22  ;;  %v834_v40 = vld [vmem:[%s2168_s2 + $0xf8] sm:$0xff]  ;;  %v816_v5 = vld [vmem:[%s2168_s2 + $0x68] sm:$0xff] }
  0xe9   :  { %vm361_vm11 = vcmp.lt.s32.totalorder %v358_v20, %v333_v30  ;;  %vm363_vm12 = vcmp.lt.s32.totalorder %v360_v31, %v335_v24  ;;  %vm400_vm13 = vcmp.lt.s32.totalorder %v397_v10, %v334_v44  ;;  %vm402_vm14 = vcmp.lt.s32.totalorder %v399_v46, %v336_v27  ;;  %859 = vmatpush.msra.mxu1 %v834_v40  ;;  %v832_v51 = vld [vmem:[%s2168_s2 + $0xe8] sm:$0xff] }
  0xea   :  { %v362_v16 = vsel %vm361_vm11, %v358_v20, %v333_v30  ;;  %v364_v63 = vsel %vm363_vm12, %v360_v31, %v335_v24  ;;  %v401_v48 = vsel %vm400_vm13, %v397_v10, %v334_v44  ;;  %v403_v50 = vsel %vm402_vm14, %v399_v46, %v336_v27  ;;  %840 = vmatpush.msra.mxu0 %v817_v53  ;;  %v812_v40 = vld [vmem:[%s2168_s2 + $0x48] sm:$0xff] }
  0xeb   :  { %vm365_vm15 = vcmp.lt.s32.totalorder %v362_v16, %v337_v57  ;;  %vm367_vm7 = vcmp.lt.s32.totalorder %v364_v63, %v339_v61  ;;  %vm404_vm8 = vcmp.lt.s32.totalorder %v401_v48, %v338_v38  ;;  %vm406_vm0 = vcmp.lt.s32.totalorder %v403_v50, %v340_v15  ;;  %860 = vmatpush.msra.mxu1 %v833_v56 }
  0xec   :  { %v366_v11 = vsel %vm365_vm15, %v362_v16, %v337_v57  ;;  %v368_v21 = vsel %vm367_vm7, %v364_v63, %v339_v61  ;;  %v405_v18 = vsel %vm404_vm8, %v401_v48, %v338_v38  ;;  %v407_v19 = vsel %vm406_vm0, %v403_v50, %v340_v15  ;;  %841 = vmatpush.msra.mxu0 %v816_v5  ;;  %v815_v15 = vld [vmem:[%s2168_s2 + $0x60] sm:$0xff]  ;;  %v829_v63 = vld [vmem:[%s2168_s2 + $0xd0] sm:$0xff] }
  0xed   :  { %vm369_vm9 = vcmp.lt.s32.totalorder %v366_v11, %v1746_v0  ;;  %vm371_vm1 = vcmp.lt.s32.totalorder %v368_v21, %v1758_v58  ;;  %vm408_vm10 = vcmp.lt.s32.totalorder %v405_v18, %v1752_v9  ;;  %vm410_vm2 = vcmp.lt.s32.totalorder %v407_v19, %v1764_v12  ;;  %861 = vmatpush.msra.mxu1 %v832_v51  ;;  %v1848_v50 = vld [vmem:[#allocation2 + $0x1] ss:$8 sm:$0x3] }
  0xee   :  { %v370_v47 = vsel %vm369_vm9, %v366_v11, %v1746_v0  ;;  %v372_v49 = vsel %vm371_vm1, %v368_v21, %v1758_v58  ;;  %v409_v52 = vsel %vm408_vm10, %v405_v18, %v1752_v9  ;;  %v411_v55 = vsel %vm410_vm2, %v407_v19, %v1764_v12  ;;  %v831_v0 = vld [vmem:[%s2168_s2 + $0xe0] sm:$0xff]  ;;  %842 = vmatpush.msra.mxu0 %v815_v15  ;;  %v828_v11 = vld [vmem:[%s2168_s2 + $0xc8] sm:$0xff] }
  0xef   :  { %vm373_vm3 = vcmp.lt.s32.totalorder %v370_v47, %v372_v49  ;;  %vm412_vm4 = vcmp.lt.s32.totalorder %v409_v52, %v411_v55  ;;  %v2314_v59 = vperm.slane %v1537_v8, 0  ;;  %v2317_v60 = vperm.slane %v1537_v8, 1  ;;  %862 = vmatpush.msra.mxu1 %v831_v0  ;;  %v814_v8 = vld [vmem:[%s2168_s2 + $0x58] sm:$0xff] }
  0xf0   :  { %vm2249_vm11 = vcmask 1040384   ;;  %v374_v13 = vsel %vm373_vm3, %v370_v47, %v372_v49  ;;  %v413_v22 = vsel %vm412_vm4, %v409_v52, %v411_v55  ;;  %v2321_v24 = vlaneseq  ;;  %843 = vmatpush.msra.mxu0 %v814_v8  ;;  %v811_v55 = vld [vmem:[%s2168_s2 + $0x40] sm:$0xff]  ;;  %v2336_v8 = vld [vmem:[#allocation15_spill] sm:$0xff] }
  0xf1   :  { %vm1789_vm5 = vcmp.gt.f32.partialorder %v1558_v54, %v2314_v59  ;;  %vm1796_vm6 = vcmp.gt.f32.partialorder %v1560_v1, %v2317_v60  ;;  %v2320_v30 = vmov %v2317_v60  ;;  %v375_v57 = vrot.slane %v374_v13, 4 }
  0xf2   :  { %v446_v44 = vsel %vm1796_vm6, %v1560_v1, %v2320_v30  ;;  %vm1812_vm12 = vcmp.lt.s32.totalorder %v2321_v24, 256  ;;  %v414_v38 = vrot.slane %v413_v22, 4  ;;  %v2324_v1 = vmov %v2314_v59  ;;  %v827_v59 = vld [vmem:[%s2168_s2 + $0xc0] sm:$0xff]  ;;  %v826_v30 = vld [vmem:[%s2168_s2 + $0xb8] sm:$0xff] }
  0xf3   :  { %v449_v61 = vrot.slane %v446_v44, 7  ;;  %v445_v9 = vsel %vm1789_vm5, %v1558_v54, %v2324_v1  ;;  %v2325_v58 = vrot.slane %v1539_v26, 4  ;;  %vm376_vm13 = vcmp.lt.s32.totalorder %v374_v13, %v375_v57  ;;  %v830_v54 = vld [vmem:[%s2168_s2 + $0xd8] sm:$0xff]  ;;  %v2329_v1 = vld [vmem:[#allocation5_spill] sm:$0xff] }
  0xf4   :  { %vm415_vm14 = vcmp.lt.s32.totalorder %v413_v22, %v414_v38  ;;  %v2326_v14 = vrot.slane %v1550_v17, 4  ;;  %863 = vmatpush.msra.mxu1 %v830_v54  ;;  %v432_v21 = vperm.slane %v431_v37, 0  ;;  %v433_v56 = vperm.slane %v431_v37, 1  ;;  %v2331_v37 = vld [vmem:[#allocation12_spill] sm:$0xff]  ;;  %v2337_v54 = vld [vmem:[#allocation10_spill] sm:$0xff] }
  0xf5   :  { %v598_v12 = vmax.f32 %v1539_v26, %v2325_v58  ;;  %v450_v36 = vsel %vm2249_vm11, %v445_v9, %v449_v61  ;;  %v377_v26 = vsel %vm376_vm13, %v374_v13, %v375_v57  ;;  %v416_v20 = vsel %vm415_vm14, %v413_v22, %v414_v38  ;;  %v810_v22 = vld [vmem:[%s2168_s2 + $0x38] sm:$0xff]  ;;  %v2327_v38 = vld [vmem:[#allocation4_spill] sm:$0xff]  ;;  %v2328_v61 = vld [vmem:[#allocation6_spill] sm:$0xff] }
  0xf6   :  { %v619_v45 = vmax.f32 %v1550_v17, %v2326_v14  ;;  %452 = vst.msk [vmem:[#allocation2] ss:$8 sm:$0x3] %vm1812_vm12, %v450_v36  ;;  %v378_v10 = vrot.slane %v377_v26, 2  ;;  %v417_v46 = vrot.slane %v416_v20, 2  ;;  %v813_v17 = vld [vmem:[%s2168_s2 + $0x50] sm:$0xff]  ;;  %864 = vmatpush.msra.mxu1 %v829_v63 }
  0xf7   :  { %v599_v31 = vrot.slane %v598_v12, 2  ;;  %844 = vmatpush.msra.mxu0 %v813_v17  ;;  %v769_v60 = vperm.slane %v1848_v50, 0  ;;  %v770_v51 = vperm.slane %v1848_v50, 1  ;;  %v2330_v9 = vld [vmem:[#allocation7_spill] sm:$0xff]  ;;  %v809_v58 = vld [vmem:[%s2168_s2 + $0x30] sm:$0xff]  ;;  %v2333_v36 = vld [vmem:[#allocation8_spill] sm:$0xff] }
  0xf8   :  { %v620_v16 = vrot.slane %v619_v45, 2  ;;  %vm379_vm15 = vcmp.lt.s32.totalorder %v377_v26, %v378_v10  ;;  %vm418_vm7 = vcmp.lt.s32.totalorder %v416_v20, %v417_v46  ;;  %865 = vmatpush.msra.mxu1 %v828_v11  ;;  %v2334_v14 = vld [vmem:[#allocation9_spill] sm:$0xff]  ;;  %v807_v63 = vld [vmem:[%s2168_s2 + $0x20] sm:$0xff]  ;;  %v2344_v11 = vld [vmem:[#allocation26_spill] sm:$0xff] }
  0xf9   :  { %v600_v48 = vmax.f32 %v598_v12, %v599_v31  ;;  %v380_v18 = vsel %vm379_vm15, %v377_v26, %v378_v10  ;;  %v419_v19 = vsel %vm418_vm7, %v416_v20, %v417_v46  ;;  %845 = vmatpush.msra.mxu0 %v812_v40  ;;  %v825_v12 = vld [vmem:[%s2168_s2 + $0xb0] sm:$0xff]  ;;  %v808_v26 = vld [vmem:[%s2168_s2 + $0x28] sm:$0xff]  ;;  %v2338_v10 = vld [vmem:[#allocation11_spill] sm:$0xff] }
  0xfa   :  { %v621_v32 = vmax.f32 %v619_v45, %v620_v16  ;;  %v381_v47 = vrot.slane %v380_v18, 1  ;;  %v420_v49 = vrot.slane %v419_v19, 1  ;;  %866 = vmatpush.msra.mxu1 %v827_v59  ;;  %v2335_v45 = vld [vmem:[#allocation14_spill] sm:$0xff]  ;;  %v824_v20 = vld [vmem:[%s2168_s2 + $0xa8] sm:$0xff]  ;;  %v2340_v16 = vld [vmem:[#allocation19_spill] sm:$0xff] }
  0xfb   :  { %v601_v53 = vrot.slane %v600_v48, 1  ;;  %846 = vmatpush.msra.mxu0 %v811_v55  ;;  %v2339_v46 = vld [vmem:[#allocation17_spill] sm:$0xff]  ;;  %v2343_v40 = vld [vmem:[#allocation24_spill] sm:$0xff] }
  0xfc   :  { %v622_v52 = vrot.slane %v621_v32, 1  ;;  %vm382_vm8 = vcmp.lt.s32.totalorder %v380_v18, %v381_v47  ;;  %vm421_vm0 = vcmp.lt.s32.totalorder %v419_v19, %v420_v49  ;;  %867 = vmatpush.msra.mxu1 %v826_v30  ;;  %v2341_v17 = vld [vmem:[#allocation25_spill] sm:$0xff]  ;;  %v2351_v55 = vld [vmem:[#allocation32_spill] sm:$0xff]  ;;  %v805_v30 = vld [vmem:[%s2168_s2 + $0x10] sm:$0xff] }
  0xfd   :  { %v1863_v5 = vmax.f32 %v600_v48, %v601_v53  ;;  %v383_v44 = vsel %vm382_vm8, %v380_v18, %v381_v47  ;;  %v422_v57 = vsel %vm421_vm0, %v419_v19, %v420_v49  ;;  %847 = vmatpush.msra.mxu0 %v810_v22  ;;  %v823_v48 = vld [vmem:[%s2168_s2 + $0xa0] sm:$0xff]  ;;  %v806_v19 = vld [vmem:[%s2168_s2 + $0x18] sm:$0xff]  ;;  %v2348_v47 = vld [vmem:[#allocation33_spill] sm:$0xff] }
  0xfe   :  { %v1866_v13 = vmax.f32 %v621_v32, %v622_v52  ;;  %v434_v15 = vsel %vm1789_vm5, %v383_v44, %v432_v21  ;;  %v435_v0 = vsel %vm1796_vm6, %v422_v57, %v433_v56  ;;  %868 = vmatpush.msra.mxu1 %v825_v12  ;;  %v2342_v32 = vld [vmem:[#allocation23_spill] sm:$0xff]  ;;  %v2345_v21 = vld [vmem:[#allocation29_spill] sm:$0xff]  ;;  %v2346_v18 = vld [vmem:[#allocation16_spill] sm:$0xff] }
  0xff   :  { %vm624_vm9 = vcmp.eq.f32.partialorder %v2327_v38, %v1863_v5  ;;  %vm626_vm1 = vcmp.eq.f32.partialorder %v2328_v61, %v1863_v5  ;;  %v436_v2 = vrot.slane %v435_v0, 7  ;;  %vm628_vm3 = vcmp.eq.f32.partialorder %v2331_v37, %v1863_v5  ;;  %848 = vmatpush.msra.mxu0 %v809_v58  ;;  %v822_v53 = vld [vmem:[%s2168_s2 + $0x98] sm:$0xff]  ;;  %v2347_v56 = vld [vmem:[#allocation30_spill] sm:$0xff] }
 0x100   :  { %vm625_vm10 = vcmp.eq.f32.partialorder %v2329_v1, %v1866_v13  ;;  %vm627_vm2 = vcmp.eq.f32.partialorder %v2330_v9, %v1866_v13  ;;  %vm629_vm4 = vcmp.eq.f32.partialorder %v2332_v62, %v1866_v13  ;;  %vm630_vm5 = vcmp.eq.f32.partialorder %v2333_v36, %v1863_v5  ;;  %869 = vmatpush.msra.mxu1 %v824_v20  ;;  %v2349_v49 = vld [vmem:[#allocation34_spill] sm:$0xff]  ;;  %v2350_v52 = vld [vmem:[#allocation31_spill] sm:$0xff]  ;;  %v804_v1 = vld [vmem:[%s2168_s2 + $0x8] sm:$0xff] }
 0x101   :  { %vm631_vm6 = vcmp.eq.f32.partialorder %v2334_v14, %v1866_v13  ;;  %v438_v31 = vsel %vm2249_vm11, %v434_v15, %v436_v2  ;;  %849 = vmatpush.msra.mxu0 %v808_v26  ;;  %vm643_vm14 = vcmp.eq.f32.partialorder %v2343_v40, %v1866_v13  ;;  %vm650_vm0 = vcmp.eq.f32.partialorder %v1490_v23, %v1863_v5  ;;  %v821_v44 = vld [vmem:[%s2168_s2 + $0x90] sm:$0xff]  ;;  %v820_v9 = vld [vmem:[%s2168_s2 + $0x88] sm:$0xff]  ;;  %v2360_v37 = vld [vmem:[#allocation35_spill] sm:$0xff] }
 0x102   :  { %443 = vst.msk [vmem:[#allocation3] ss:$8 sm:$0x3] %vm1812_vm12, %v438_v31  ;;  %vm651_vm8 = vcmp.eq.f32.partialorder %v2347_v56, %v1866_v13  ;;  %vm652_vm13 = vcmp.eq.f32.partialorder %v2348_v47, %v1863_v5  ;;  %vm653_vm15 = vcmp.eq.f32.partialorder %v2349_v49, %v1866_v13  ;;  %870 = vmatpush.msra.mxu1 %v823_v48  ;;  %v656_v59 = vsel %vm624_vm9, %v1385_v4, 128  ;;  %v819_v62 = vld [vmem:[%s2168_s2 + $0x80] sm:$0xff]  ;;  %v2365_v14 = vld [vmem:[#allocation37_spill] sm:$0xff] }
 0x103   :  { %850 = vmatpush.msra.mxu0 %v807_v63  ;;  %vm654_vm7 = vcmp.eq.f32.partialorder %v2350_v52, %v1863_v5  ;;  %vm655_vm11 = vcmp.eq.f32.partialorder %v2351_v55, %v1866_v13  ;;  %v657_v22 = vsel %vm625_vm10, %v1385_v4, 128  ;;  %v658_v57 = vsel %vm626_vm1, %v2296_v3, 128  ;;  %v2371_v31 = vld [vmem:[#allocation39_spill] sm:$0xff]  ;;  %v2375_v63 = vld [vmem:[#allocation41_spill] sm:$0xff]  ;;  %v2376_v48 = vld [vmem:[#allocation42_spill] sm:$0xff] }
 0x104   :  { %v659_v38 = vsel %vm627_vm2, %v2296_v3, 128  ;;  %v660_v4 = vsel %vm628_vm3, %v2297_v28, 128  ;;  %v661_v15 = vsel %vm629_vm4, %v2297_v28, 128  ;;  %871 = vmatpush.msra.mxu1 %v822_v53  ;;  %v662_v61 = vsel %vm630_vm5, %v1486_v25, 128 }
 0x105   :  { %851 = vmatpush.msra.mxu0 %v806_v19  ;;  %v663_v3 = vsel %vm631_vm6, %v1486_v25, 128  ;;  %vm2352_vm9 = vcmp.eq.f32.partialorder %v2335_v45, %v1863_v5  ;;  %vm2353_vm1 = vcmp.eq.f32.partialorder %v2336_v8, %v1866_v13  ;;  %vm2354_vm10 = vcmp.eq.f32.partialorder %v2337_v54, %v1863_v5  ;;  %v2368_v54 = vld [vmem:[#allocation38_spill] sm:$0xff] }
 0x106   :  { %v664_v0 = vsel %vm2352_vm9, %v1500_v43, 128  ;;  %v665_v28 = vsel %vm2353_vm1, %v1500_v43, 128  ;;  %v666_v25 = vsel %vm2354_vm10, %v1503_v41, 128  ;;  %vm2355_vm2 = vcmp.eq.f32.partialorder %v2338_v10, %v1866_v13  ;;  %872 = vmatpush.msra.mxu1 %v821_v44 }
 0x107   :  { %852 = vmatpush.msra.mxu0 %v805_v30  ;;  %v667_v58 = vsel %vm2355_vm2, %v1503_v41, 128  ;;  %vm2356_vm3 = vcmp.eq.f32.partialorder %v1182_v33, %v1863_v5  ;;  %vm2357_vm4 = vcmp.eq.f32.partialorder %v1185_v34, %v1866_v13  ;;  %vm2358_vm5 = vcmp.eq.f32.partialorder %v2339_v46, %v1863_v5 }
 0x108   :  { %v668_v43 = vsel %vm2356_vm3, %v1521_v7, 128  ;;  %v669_v12 = vsel %vm2357_vm4, %v1521_v7, 128  ;;  %v670_v2 = vsel %vm2358_vm5, %v1525_v39, 128  ;;  %vm2359_vm6 = vcmp.eq.f32.partialorder %v2340_v16, %v1866_v13  ;;  %v803_v7 = vld [vmem:[%s2168_s2] sm:$0xff]  ;;  %873 = vmatpush.msra.mxu1 %v820_v9 }
 0x109   :  { %v671_v41 = vsel %vm2359_vm6, %v1525_v39, 128  ;;  %vm2361_vm9 = vcmp.eq.f32.partialorder %v1442_v6, %v1863_v5  ;;  %vm2362_vm1 = vcmp.eq.f32.partialorder %v2341_v17, %v1866_v13  ;;  %853 = vmatpush.msra.mxu0 %v804_v1  ;;  %v2363_v39 = vld [vmem:[#allocation36_spill] sm:$0xff]  ;;  %vm2364_vm10 = vcmp.eq.f32.partialorder %v2342_v32, %v1863_v5 }
 0x10a   :  { %v672_v33 = vsel %vm2361_vm9, %v2360_v37, 128  ;;  %v673_v34 = vsel %vm2362_vm1, %v2360_v37, 128  ;;  %v674_v6 = vsel %vm2364_vm10, %v2363_v39, 128  ;;  %v675_v36 = vsel %vm643_vm14, %v2363_v39, 128  ;;  %v2374_v16 = vld [vmem:[#allocation40_spill] sm:$0xff]  ;;  %874 = vmatpush.msra.mxu1 %v819_v62 }
 0x10b   :  { %vm2366_vm2 = vcmp.eq.f32.partialorder %v2344_v11, %v1863_v5  ;;  %vm2367_vm3 = vcmp.eq.f32.partialorder %v2345_v21, %v1866_v13  ;;  %vm2369_vm4 = vcmp.eq.f32.partialorder %v2346_v18, %v1863_v5  ;;  %vm2370_vm14 = vcmp.eq.f32.partialorder %v1342_v35, %v1866_v13  ;;  %854 = vmatpush.msra.mxu0 %v803_v7 }
 0x10c   :  { %v676_v45 = vsel %vm2366_vm2, %v2365_v14, 128  ;;  %v677_v8 = vsel %vm2367_vm3, %v2365_v14, 128  ;;  %v678_v26 = vsel %vm2369_vm4, %v2368_v54, 128  ;;  %v679_v20 = vsel %vm2370_vm14, %v2368_v54, 128 }
 0x10d   :  { %vm2372_vm5 = vcmp.eq.f32.partialorder %v1360_v29, %v1863_v5  ;;  %vm2373_vm6 = vcmp.eq.f32.partialorder %v1393_v42, %v1866_v13  ;;  %v682_v17 = vsel %vm650_vm0, %v2374_v16, 128  ;;  %v683_v35 = vsel %vm651_vm8, %v2374_v16, 128 }
 0x10e   :  { %v680_v10 = vsel %vm2372_vm5, %v2371_v31, 128  ;;  %v681_v46 = vsel %vm2373_vm6, %v2371_v31, 128  ;;  %v684_v29 = vsel %vm652_vm13, %v2375_v63, 128  ;;  %v685_v42 = vsel %vm653_vm15, %v2375_v63, 128 }
 0x10f   :  { %v686_v23 = vsel %vm654_vm7, %v2376_v48, 128  ;;  %v687_v32 = vsel %vm655_vm11, %v2376_v48, 128  ;;  %vm688_vm8 = vcmp.lt.s32.totalorder %v656_v59, %v660_v4  ;;  %vm690_vm0 = vcmp.lt.s32.totalorder %v658_v57, %v662_v61  ;;  %v923_v48 = vld [vmem:[%s2167_s3] ss:$0 sm:$0xff] }
 0x110   :  { %v689_v40 = vsel %vm688_vm8, %v656_v59, %v660_v4  ;;  %v691_v11 = vsel %vm690_vm0, %v658_v57, %v662_v61  ;;  %vm727_vm13 = vcmp.lt.s32.totalorder %v657_v22, %v661_v15  ;;  %vm729_vm9 = vcmp.lt.s32.totalorder %v659_v38, %v663_v3 }
 0x111   :  { %vm692_vm1 = vcmp.lt.s32.totalorder %v689_v40, %v664_v0  ;;  %vm694_vm10 = vcmp.lt.s32.totalorder %v691_v11, %v666_v25  ;;  %v728_v21 = vsel %vm727_vm13, %v657_v22, %v661_v15  ;;  %v730_v18 = vsel %vm729_vm9, %v659_v38, %v663_v3 }
 0x112   :  { %v693_v19 = vsel %vm692_vm1, %v689_v40, %v664_v0  ;;  %v695_v53 = vsel %vm694_vm10, %v691_v11, %v666_v25  ;;  %vm731_vm15 = vcmp.lt.s32.totalorder %v728_v21, %v665_v28  ;;  %vm733_vm2 = vcmp.lt.s32.totalorder %v730_v18, %v667_v58 }
 0x113   :  { %vm696_vm7 = vcmp.lt.s32.totalorder %v693_v19, %v668_v43  ;;  %vm698_vm3 = vcmp.lt.s32.totalorder %v695_v53, %v670_v2  ;;  %v732_v56 = vsel %vm731_vm15, %v728_v21, %v665_v28  ;;  %v734_v47 = vsel %vm733_vm2, %v730_v18, %v667_v58 }
 0x114   :  { %v697_v49 = vsel %vm696_vm7, %v693_v19, %v668_v43  ;;  %v699_v52 = vsel %vm698_vm3, %v695_v53, %v670_v2  ;;  %vm735_vm11 = vcmp.lt.s32.totalorder %v732_v56, %v669_v12  ;;  %vm737_vm4 = vcmp.lt.s32.totalorder %v734_v47, %v671_v41 }
 0x115   :  { %vm700_vm14 = vcmp.lt.s32.totalorder %v697_v49, %v672_v33  ;;  %vm702_vm5 = vcmp.lt.s32.totalorder %v699_v52, %v674_v6  ;;  %v736_v55 = vsel %vm735_vm11, %v732_v56, %v669_v12  ;;  %v738_v59 = vsel %vm737_vm4, %v734_v47, %v671_v41 }
 0x116   :  { %v701_v30 = vsel %vm700_vm14, %v697_v49, %v672_v33  ;;  %v703_v44 = vsel %vm702_vm5, %v699_v52, %v674_v6  ;;  %vm739_vm6 = vcmp.lt.s32.totalorder %v736_v55, %v673_v34  ;;  %vm741_vm8 = vcmp.lt.s32.totalorder %v738_v59, %v675_v36 }
 0x117   :  { %vm704_vm0 = vcmp.lt.s32.totalorder %v701_v30, %v676_v45  ;;  %vm706_vm13 = vcmp.lt.s32.totalorder %v703_v44, %v678_v26  ;;  %v740_v22 = vsel %vm739_vm6, %v736_v55, %v673_v34  ;;  %v742_v57 = vsel %vm741_vm8, %v738_v59, %v675_v36 }
 0x118   :  { %v705_v38 = vsel %vm704_vm0, %v701_v30, %v676_v45  ;;  %v707_v4 = vsel %vm706_vm13, %v703_v44, %v678_v26  ;;  %vm743_vm9 = vcmp.lt.s32.totalorder %v740_v22, %v677_v8  ;;  %vm745_vm1 = vcmp.lt.s32.totalorder %v742_v57, %v679_v20 }
 0x119   :  { %vm708_vm10 = vcmp.lt.s32.totalorder %v705_v38, %v680_v10  ;;  %vm710_vm15 = vcmp.lt.s32.totalorder %v707_v4, %v682_v17  ;;  %v744_v15 = vsel %vm743_vm9, %v740_v22, %v677_v8  ;;  %v746_v61 = vsel %vm745_vm1, %v742_v57, %v679_v20  ;;  %v776_v8 = vld [vmem:[#allocation3 + $0x1] ss:$8 sm:$0x3] }
 0x11a   :  { %v709_v3 = vsel %vm708_vm10, %v705_v38, %v680_v10  ;;  %v711_v0 = vsel %vm710_vm15, %v707_v4, %v682_v17  ;;  %vm747_vm2 = vcmp.lt.s32.totalorder %v744_v15, %v681_v46  ;;  %vm749_vm7 = vcmp.lt.s32.totalorder %v746_v61, %v683_v35 }
 0x11b   :  { %vm712_vm3 = vcmp.lt.s32.totalorder %v709_v3, %v684_v29  ;;  %vm714_vm11 = vcmp.lt.s32.totalorder %v711_v0, %v686_v23  ;;  %v748_v28 = vsel %vm747_vm2, %v744_v15, %v681_v46  ;;  %v750_v1 = vsel %vm749_vm7, %v746_v61, %v683_v35 }
 0x11c   :  { %v713_v9 = vsel %vm712_vm3, %v709_v3, %v684_v29  ;;  %v715_v25 = vsel %vm714_vm11, %v711_v0, %v686_v23  ;;  %vm751_vm4 = vcmp.lt.s32.totalorder %v748_v28, %v685_v42  ;;  %vm753_vm14 = vcmp.lt.s32.totalorder %v750_v1, %v687_v32 }
 0x11d   :  { %vm716_vm5 = vcmp.lt.s32.totalorder %v713_v9, %v715_v25  ;;  %v752_v58 = vsel %vm751_vm4, %v748_v28, %v685_v42  ;;  %v754_v43 = vsel %vm753_vm14, %v750_v1, %v687_v32  ;;  %vm2118_vm8 = vcmp.gt.f32.partialorder %v1863_v5, %v769_v60 }
 0x11e   :  { %v717_v12 = vsel %vm716_vm5, %v713_v9, %v715_v25  ;;  %vm755_vm6 = vcmp.lt.s32.totalorder %v752_v58, %v754_v43  ;;  %vm2125_vm0 = vcmp.gt.f32.partialorder %v1866_v13, %v770_v51  ;;  %v785_v39 = vsel %vm2118_vm8, %v1863_v5, %v769_v60 }
 0x11f   :  { %v718_v37 = vrot.slane %v717_v12, 4  ;;  %v756_v33 = vsel %vm755_vm6, %v752_v58, %v754_v43  ;;  %v786_v34 = vsel %vm2125_vm0, %v1866_v13, %v770_v51  ;;  %vm2381_vm1 = vcmask 1040384  }
 0x120   :  { %v757_v7 = vrot.slane %v756_v33, 4  ;;  %v789_v62 = vrot.slane %v786_v34, 7  ;;  %v777_v54 = vperm.slane %v776_v8, 0  ;;  %v778_v20 = vperm.slane %v776_v8, 1  ;;  %vm2382_vm5 = vmmov %vm2381_vm1 }
 0x121   :  { %vm719_vm13 = vcmp.lt.s32.totalorder %v717_v12, %v718_v37  ;;  %v880_v23 = vand.u32 127, %v2321_v24 }
 0x122   :  { %v720_v6 = vsel %vm719_vm13, %v717_v12, %v718_v37  ;;  %vm758_vm9 = vcmp.lt.s32.totalorder %v756_v33, %v757_v7  ;;  %v790_v36 = vsel %vm2381_vm1, %v785_v39, %v789_v62 }
 0x123   :  { %v721_v14 = vrot.slane %v720_v6, 2  ;;  %v759_v45 = vsel %vm758_vm9, %v756_v33, %v757_v7  ;;  %792 = vst.msk [vmem:[#allocation2 + $0x1] ss:$8 sm:$0x3] %vm1812_vm12, %v790_v36 }
 0x124   :  { %v760_v51 = vrot.slane %v759_v45, 2 }
 0x125   :  { %vm722_vm10 = vcmp.lt.s32.totalorder %v720_v6, %v721_v14 }
 0x126   :  { %v723_v13 = vsel %vm722_vm10, %v720_v6, %v721_v14  ;;  %vm761_vm15 = vcmp.lt.s32.totalorder %v759_v45, %v760_v51 }
 0x127   :  { %v724_v50 = vrot.slane %v723_v13, 1  ;;  %v762_v26 = vsel %vm761_vm15, %v759_v45, %v760_v51 }
 0x128   :  { %v763_v31 = vrot.slane %v762_v26, 1 }
 0x129   :  { %vm725_vm2 = vcmp.lt.s32.totalorder %v723_v13, %v724_v50 }
 0x12a   :  { %v726_v60 = vsel %vm725_vm2, %v723_v13, %v724_v50  ;;  %vm764_vm7 = vcmp.lt.s32.totalorder %v762_v26, %v763_v31  ;;  %v797_v5 = vld [vmem:[#allocation2] sm:$0xff]  ;;  %v798_v10 = vld [vmem:[#allocation2 + $0x8] sm:$0xff] }
 0x12b   :  { %v765_v46 = vsel %vm764_vm7, %v762_v26, %v763_v31  ;;  %v779_v16 = vsel %vm2118_vm8, %v726_v60, %v777_v54  ;;  %vm799_vm3 = vcmp.le.f32.partialorder %v797_v5, -5e+29  ;;  %vm800_vm11 = vcmp.le.f32.partialorder %v798_v10, -5e+29 }
 0x12c   :  { %v780_v17 = vsel %vm2125_vm0, %v765_v46, %v778_v20  ;;  %vm913_vm4 = vmneg %vm799_vm3 }
 0x12d   :  { %v781_v35 = vrot.slane %v780_v17, 7  ;;  %914 = vmatmul.msk.f32.vlgmr.msra.gmra.mxu0 %vm913_vm4, %v797_v5  ;;  %vm915_vm14 = vmneg %vm800_vm11 }
 0x12e   :  { %916 = vmatmul.msk.f32.vlgmr.msra.gmra.mxu1 %vm915_vm14, %v798_v10 }
 0x12f   :  { %v782_v63 = vsel %vm2382_vm5, %v779_v16, %v781_v35 }
 0x130   :  { %783 = vst.msk [vmem:[#allocation3 + $0x1] ss:$8 sm:$0x3] %vm1812_vm12, %v782_v63  ;;  %vm881_vm12 = vcmp.lt.s32.totalorder %v880_v23, 4 }
 0x137   :  { %v897_v29 = vld [vmem:[#allocation3] sm:$0xff]  ;;  %v898_v42 = vld [vmem:[#allocation3 + $0x8] sm:$0xff] }
 0x138   :  { %899 = vst [vmem:[%s2169_s6] sm:$0xff] %v897_v29 }
 0x139   :  { %900 = vst [vmem:[%s2169_s6 + $0x8] sm:$0xff] %v898_v42 }
 0x1aa   :  { %v856_v32 = vpop.f32.mrf.mxu0 }
 0x1ab   :  { %v857_v40 = vadd.f32 %v923_v48, %v856_v32  ;;  %v876_v27 = vpop.f32.mrf.mxu1 }
 0x1ad   :  { %v877_v11 = vadd.f32 %v876_v27, %v857_v40 }
 0x1af   :  { %v882_v21 = vsel %vm881_vm12, %v877_v11, -1e+30 }
 0x1b0   :  { %883 = vmax.xlane.f32.xlu2 %v882_v21 }
 0x223   :  { %v884_v18 = vpop.xlane.xlu2 %883 }
 0x224   :  { %v885_v19 = vsub.f32 %v882_v21, %v884_v18 }
 0x226   :  { %v886_v53 = vmul.f32 1.442695, %v885_v19 }
 0x228   :  { %924 = vpow2.f32 %v886_v53 }
 0x22e   :  { %v925_v56 = vpop.eup %924 }
 0x22f   :  { %888 = vadd.xlane.f32.xlu0 %v925_v56 }
 0x2a2   :  { %v889_v47 = vpop.xlane.xlu0 %888 }
 0x2a3   :  { %926 = vlog2.f32 %v889_v47 }
 0x2a9   :  { %v927_v49 = vpop.eup %926 }
 0x2aa   :  { %v891_v52 = vmul.f32 0.6931472, %v927_v49 }
 0x2ac   :  { %v892_v55 = vsub.f32 %v885_v19, %v891_v52 }
 0x2ae   :  { %893 = vst [vmem:[%s2170_s4] sm:$0xff] %v892_v55  ;;  %v894_v24 = vmul.f32 1.442695, %v892_v55 }
 0x2b0   :  { %928 = vpow2.f32 %v894_v24 }
 0x2b6   :  { %v929_v59 = vpop.eup %928 }
 0x2b7   :  { %896 = vst [vmem:[%s2171_s5] sm:$0xff] %v929_v59 }

</bundles_post_ra>
